<compile_context>
chip_gen: v5e
topology: v5e:2x2
jax: 0.10.0
libtpu: 0.0.40
codegen_flags: <defaults>
</compile_context>

<pallas_src>
import jax
import jax.numpy as jnp
from jax.experimental import pallas as pl
from jax.experimental.pallas import tpu as pltpu

_VMEM_LIMIT = 32 * 1024 * 1024  # safe scoped-VMEM ceiling on v5e / v6e / v7x


def _round_up(x, m):
    return (x + m - 1) // m * m


# ----------------------------- Pallas kernels ------------------------------

def _conv_relu_pool_kernel(x_ref, w_ref, b_ref, o_ref):
    """Conv (im2col matmul) + bias + ReLU + 2x2 max-pool for one M tile.

    x_ref: (4, tm, Kp) bf16 -- 4 pool taps folded into the block (one tall matmul,
    no per-tap grid steps, no f32 scratch round-trips).  Output lane-dense bf16."""
    t4, tm, kp = x_ref.shape
    cout = w_ref.shape[1]
    y = jnp.dot(x_ref[...].reshape(t4 * tm, kp), w_ref[...],
                preferred_element_type=jnp.float32)          # (4*tm, 128) f32
    y = y.reshape(t4, tm, cout)
    m = jnp.max(y, axis=0)                                   # pool over the 4 taps
    # max_t relu(y_t + b) == relu(max_t y_t + b)  (monotonicity)
    o_ref[...] = jnp.maximum(m + b_ref[...], 0.0).astype(o_ref.dtype)


def _conv2_mlp_kernel(x_ref, wc_ref, bc_ref, w1_ref, b1_ref, w2_ref, b2_ref, o_ref):
    """Fused conv2 + bias + ReLU + pool + flatten + fc1 + ReLU + fc2 for one batch tile.

    x_ref: (4, 16, bn, Kp2) bf16 -- (pool tap, pooled position, image, im2col feature).
    All weights (< 1 MiB bf16) are VMEM-resident; only the logits leave the kernel."""
    T, P, bn, kp = x_ref.shape
    co = wc_ref.shape[1]                                     # 128 (conv2 Cout lane-padded)
    # conv2 as one tall MXU matmul over taps x positions x images
    y = jnp.dot(x_ref[...].reshape(T * P * bn, kp), wc_ref[...],
                preferred_element_type=jnp.float32)          # (4*16*bn, 128) f32
    y = y.reshape(T, P * bn, co)
    pooled = jnp.max(y, axis=0)                              # (16*bn, 128)
    pooled = jnp.maximum(pooled + bc_ref[...], 0.0)          # bias + ReLU
    pooled = pooled.reshape(P, bn, co).astype(jnp.bfloat16)  # (16, bn, 128)
    # fc1: contract over (pooled position, channel); unrolled over the 16 positions
    # (fc1 weight is pre-laid-out as (16, 128, 128) with zero-padded channels).
    h = jnp.zeros((bn, w1_ref.shape[2]), jnp.float32)
    for p in range(P):
        h = h + jnp.dot(pooled[p], w1_ref[p], preferred_element_type=jnp.float32)
    h = jnp.maximum(h + b1_ref[...], 0.0)
    # TODO(synk): nn.Dropout(0.5) implemented as inference-mode identity (no masking/scaling).
    logits = jnp.dot(h.astype(jnp.bfloat16), w2_ref[...],
                     preferred_element_type=jnp.float32)
    o_ref[...] = logits + b2_ref[...]


# ----------------------------- Pallas wrappers ------------------------------

def conv1_relu_pool(x_nhwc, w_mat, b_row, kh, kw, *, tm=512):
    """Conv2d(valid, stride 1) + ReLU + MaxPool2d(2,2) as one pallas_call.

    x_nhwc: (N, H, W, Cin) f32.  w_mat: (Kp, 128) bf16, rows ordered (kh, kw, cin),
    K and Cout zero-padded.  b_row: (1, 128) f32.  Returns (N, Ho//2, Wo//2, 128) bf16."""
    N, H, W, Cin = x_nhwc.shape
    Kp, Coutp = w_mat.shape
    Ho, Wo = H - kh + 1, W - kw + 1
    PH, PW = Ho // 2, Wo // 2
    K = Cin * kh * kw

    # TODO(synk): im2col is done wrapper-side (expanded patch tensor in HBM); in-kernel
    # im2col would cut HBM traffic further (mostly relevant on v5e / large batches).
    cols = [x_nhwc[:, i:i + Ho, j:j + Wo, :] for i in range(kh) for j in range(kw)]
    p = jnp.concatenate(cols, axis=-1)                              # (N, Ho, Wo, K)
    # group rows by 2x2 pool tap -> leading axis of 4, folded into the kernel body
    p = p.reshape(N, PH, 2, PW, 2, K).transpose(2, 4, 0, 1, 3, 5)   # (2, 2, N, PH, PW, K)
    p = p.reshape(4, N * PH * PW, K)
    if Kp != K:
        p = jnp.pad(p, ((0, 0), (0, 0), (0, Kp - K)))

    Np = N * PH * PW
    # >=2 blocks on the 'parallel' M axis when possible (v7x dual-TC); 16-row alignment (bf16).
    tm_eff = _round_up(min(tm, max(pl.cdiv(Np, 2), 16)), 16)
    Mp = _round_up(Np, tm_eff)
    if Mp != Np:
        p = jnp.pad(p, ((0, 0), (0, Mp - Np), (0, 0)))
    p = p.astype(jnp.bfloat16)

    out = pl.pallas_call(
        _conv_relu_pool_kernel,
        out_shape=jax.ShapeDtypeStruct((Mp, Coutp), jnp.bfloat16),
        grid=(Mp // tm_eff,),
        in_specs=[
            pl.BlockSpec((4, tm_eff, Kp), lambda i: (0, i, 0)),
            pl.BlockSpec((Kp, Coutp), lambda i: (0, 0)),
            pl.BlockSpec((1, Coutp), lambda i: (0, 0)),
        ],
        out_specs=pl.BlockSpec((tm_eff, Coutp), lambda i: (i, 0)),
        compiler_params=pltpu.CompilerParams(
            dimension_semantics=("parallel",),
            vmem_limit_bytes=_VMEM_LIMIT,
        ),
    )(p, w_mat, b_row)

    return out[:Np].reshape(N, PH, PW, Coutp)


def conv2_mlp_head(h1, wc, bc, w1, b1, w2, b2, *, bn=64):
    """Fused conv2+ReLU+pool -> flatten -> fc1+ReLU -> fc2 in one pallas_call.

    h1: (N, 12, 12, 16) bf16.  Returns (N, 128) f32 logits (lane-padded)."""
    N, Hh, Ww, Cin = h1.shape
    Kp2, Coutp = wc.shape
    kh = kw = 5
    Ho, Wo = Hh - kh + 1, Ww - kw + 1          # 8, 8
    PH, PW = Ho // 2, Wo // 2                  # 4, 4
    K2 = Cin * kh * kw                         # 400

    cols = [h1[:, i:i + Ho, j:j + Wo, :] for i in range(kh) for j in range(kw)]
    p = jnp.concatenate(cols, axis=-1)                               # (N, 8, 8, 400)
    # -> (tap, pooled position, image, feature)
    p = p.reshape(N, PH, 2, PW, 2, K2).transpose(2, 4, 1, 3, 0, 5)   # (2,2,PH,PW,N,K2)
    p = p.reshape(4, PH * PW, N, K2)
    if Kp2 != K2:
        p = jnp.pad(p, ((0, 0), (0, 0), (0, 0), (0, Kp2 - K2)))

    bn_eff = _round_up(min(bn, max(pl.cdiv(N, 2), 16)), 16)
    Npad = _round_up(N, bn_eff)
    if Npad != N:
        p = jnp.pad(p, ((0, 0), (0, 0), (0, Npad - N), (0, 0)))
    p = p.astype(jnp.bfloat16)

    NCp = w2.shape[1]
    out = pl.pallas_call(
        _conv2_mlp_kernel,
        out_shape=jax.ShapeDtypeStruct((Npad, NCp), jnp.float32),
        grid=(Npad // bn_eff,),
        in_specs=[
            pl.BlockSpec((4, PH * PW, bn_eff, Kp2), lambda i: (0, 0, i, 0)),
            pl.BlockSpec((Kp2, Coutp), lambda i: (0, 0)),
            pl.BlockSpec((1, Coutp), lambda i: (0, 0)),
            pl.BlockSpec((PH * PW, w1.shape[1], w1.shape[2]), lambda i: (0, 0, 0)),
            pl.BlockSpec((1, b1.shape[1]), lambda i: (0, 0)),
            pl.BlockSpec((w2.shape[0], NCp), lambda i: (0, 0)),
            pl.BlockSpec((1, NCp), lambda i: (0, 0)),
        ],
        out_specs=pl.BlockSpec((bn_eff, NCp), lambda i: (i, 0)),
        compiler_params=pltpu.CompilerParams(
            dimension_semantics=("parallel",),
            vmem_limit_bytes=_VMEM_LIMIT,
        ),
    )(p, wc, bc, w1, b1, w2, b2)

    return out[:N]


# --------------------------------- Model -----------------------------------

def init_params(num_classes=10, seed=0):
    """PyTorch-layout parameters (Conv2d: OIHW, Linear: (out, in))."""
    key = jax.random.PRNGKey(seed)
    ks = jax.random.split(key, 8)
    p = {}
    p["conv1_w"] = 0.05 * jax.random.normal(ks[0], (16, 1, 5, 5), jnp.float32)
    p["conv1_b"] = 0.05 * jax.random.normal(ks[1], (16,), jnp.float32)
    p["conv2_w"] = 0.05 * jax.random.normal(ks[2], (32, 16, 5, 5), jnp.float32)
    p["conv2_b"] = 0.05 * jax.random.normal(ks[3], (32,), jnp.float32)
    # conv3 / conv4 are defined in __init__ but never used in forward -> omitted.
    p["fc1_w"] = 0.05 * jax.random.normal(ks[4], (128, 32 * 4 * 4), jnp.float32)
    p["fc1_b"] = 0.05 * jax.random.normal(ks[5], (128,), jnp.float32)
    p["fc2_w"] = 0.05 * jax.random.normal(ks[6], (num_classes, 128), jnp.float32)
    p["fc2_b"] = 0.05 * jax.random.normal(ks[7], (num_classes,), jnp.float32)
    return p


def prepare_params(p, num_classes=10):
    """One-time layout/dtype transforms hoisted out of the forward pass:
    conv weights -> (Kp, 128) bf16 matrices (rows ordered (kh, kw, cin), K padded to a
    multiple of 128, Cout lane-padded to 128); fc1 -> (16 positions, 128 channels-padded,
    128 out) bf16 with columns permuted from the NCHW flatten order; fc2 lane-padded to
    128 outputs; biases zero-padded and pre-reshaped to (1, 128) f32."""
    def conv_mat(w_oihw, kpad, cpad):
        Cout, Cin, KH, KW = w_oihw.shape
        K = Cin * KH * KW
        m = jnp.transpose(w_oihw, (2, 3, 1, 0)).reshape(K, Cout)
        return jnp.pad(m, ((0, kpad - K), (0, cpad - Cout))).astype(jnp.bfloat16)

    def bias_row(b, cpad):
        return jnp.pad(b, (0, cpad - b.shape[0])).reshape(1, -1).astype(jnp.float32)

    out = {}
    out["conv1_w"] = conv_mat(p["conv1_w"], 128, 128)      # (128, 128)
    out["conv1_b"] = bias_row(p["conv1_b"], 128)
    out["conv2_w"] = conv_mat(p["conv2_w"], 512, 128)      # (512, 128)
    out["conv2_b"] = bias_row(p["conv2_b"], 128)

    # PyTorch x.view(-1, 32*4*4) flattens NCHW: column j = channel*(4*4) + pooled_pos.
    w1 = p["fc1_w"].reshape(128, 32, 16)                   # (out, channel, pos)
    w1 = jnp.transpose(w1, (2, 1, 0))                      # (pos, channel, out) = (16,32,128)
    w1 = jnp.pad(w1, ((0, 0), (0, 128 - 32), (0, 0)))      # channel lane-padded to 128
    out["fc1_w"] = w1.astype(jnp.bfloat16)                 # (16, 128, 128)
    out["fc1_b"] = p["fc1_b"].reshape(1, -1).astype(jnp.float32)

    nc_pad = _round_up(num_classes, 128)
    w2 = jnp.transpose(p["fc2_w"])                         # (128, num_classes)
    out["fc2_w"] = jnp.pad(w2, ((0, 0), (0, nc_pad - num_classes))).astype(jnp.bfloat16)
    out["fc2_b"] = (jnp.pad(p["fc2_b"], (0, nc_pad - num_classes))
                    .reshape(1, -1).astype(jnp.float32))
    return out


def net_forward(params, x_nchw, *, num_classes=10):
    """pool(relu(conv1)) -> pool(relu(conv2)) -> flatten -> relu(fc1) -> dropout(id) -> fc2."""
    x = jnp.transpose(x_nchw, (0, 2, 3, 1))                # NCHW -> NHWC once (Cin=1: free)

    h1p = conv1_relu_pool(x, params["conv1_w"], params["conv1_b"], 5, 5)  # (N,12,12,128) bf16
    h1 = h1p[..., :16]                                      # real conv1 channels

    logits_pad = conv2_mlp_head(h1, params["conv2_w"], params["conv2_b"],
                                params["fc1_w"], params["fc1_b"],
                                params["fc2_w"], params["fc2_b"])         # (N, 128) f32
    return logits_pad[:, :num_classes]


# ---------------------------------- Main ------------------------------------

if __name__ == "__main__":
    num_classes = 10
    torch_layout_params = init_params(num_classes=num_classes, seed=0)
    params = prepare_params(torch_layout_params, num_classes=num_classes)

    # MNIST-style input: batch=2, 1 channel, 28x28 (required by fc1 = 32*4*4).
    x = jax.random.normal(jax.random.PRNGKey(0), (2, 1, 28, 28), jnp.float32)

    fwd = jax.jit(net_forward, static_argnames=("num_classes",))
    logits = fwd(params, x, num_classes=num_classes)
    logits = jax.block_until_ready(logits)

    assert logits.shape == (2, num_classes), logits.shape
    assert logits.dtype == jnp.float32
    print("KERNEL_OK")
</pallas_src>

<mosaic_0001>
module attributes {stable_mosaic.version = 11 : i64} {
  func.func @_conv_relu_pool_kernel(%arg0: i32, %arg1: memref<4x144x128xbf16, #tpu.memory_space<vmem>>, %arg2: memref<128x128xbf16, #tpu.memory_space<vmem>>, %arg3: memref<1x128xf32, #tpu.memory_space<vmem>>, %arg4: memref<144x128xbf16, #tpu.memory_space<vmem>>) attributes {dimension_semantics = [#tpu.dimension_semantics<parallel>], iteration_bounds = array<i64: 2>, scalar_prefetch = 0 : i64, scratch_operands = 0 : i64, tpu.core_type = #tpu.core_type<tc>, window_params = [{transform_indices = @transform_0, window_bounds = array<i64: 4, 144, 128>}, {pipeline_mode = #tpu.pipeline_mode<synchronous>, transform_indices = @transform_1, window_bounds = array<i64: 128, 128>}, {pipeline_mode = #tpu.pipeline_mode<synchronous>, transform_indices = @transform_2, window_bounds = array<i64: 1, 128>}, {transform_indices = @transform_3, window_bounds = array<i64: 144, 128>}]} {
    %c0 = arith.constant 0 : index
    %c0_0 = arith.constant 0 : index
    %c0_1 = arith.constant 0 : index
    %0 = vector.load %arg1[%c0, %c0_0, %c0_1] : memref<4x144x128xbf16, #tpu.memory_space<vmem>>, vector<4x144x128xbf16>
    %1 = vector.shape_cast %0 : vector<4x144x128xbf16> to vector<576x128xbf16>
    %c0_2 = arith.constant 0 : index
    %c0_3 = arith.constant 0 : index
    %2 = vector.load %arg2[%c0_2, %c0_3] : memref<128x128xbf16, #tpu.memory_space<vmem>>, vector<128x128xbf16>
    %cst = arith.constant dense<0.000000e+00> : vector<576x128xf32>
    %3 = tpu.matmul %1, %2, %cst {dimension_numbers = #tpu.dot_dimension_numbers<[1], [0], [0], [1], [0, 0, 1, 1], [], []>} : vector<576x128xbf16>, vector<128x128xbf16>, vector<576x128xf32> -> vector<576x128xf32>
    %4 = vector.shape_cast %3 : vector<576x128xf32> to vector<4x144x128xf32>
    %cst_4 = arith.constant dense<0xFF800000> : vector<144x128xf32>
    %5 = vector.multi_reduction <maximumf>, %4, %cst_4 [0] : vector<4x144x128xf32> to vector<144x128xf32>
    %c0_5 = arith.constant 0 : index
    %c0_6 = arith.constant 0 : index
    %6 = vector.load %arg3[%c0_5, %c0_6] : memref<1x128xf32, #tpu.memory_space<vmem>>, vector<1x128xf32>
    %7 = vector.broadcast %6 : vector<1x128xf32> to vector<144x128xf32>
    %8 = arith.addf %5, %7 : vector<144x128xf32>
    %cst_7 = arith.constant 0.000000e+00 : f32
    %9 = vector.broadcast %cst_7 : f32 to vector<144x128xf32>
    %10 = arith.maximumf %8, %9 : vector<144x128xf32>
    %11 = arith.truncf %10 : vector<144x128xf32> to vector<144x128xbf16>
    %c0_8 = arith.constant 0 : index
    %c0_9 = arith.constant 0 : index
    %12 = vector.load %arg4[%c0_8, %c0_9] : memref<144x128xbf16, #tpu.memory_space<vmem>>, vector<144x128xbf16>
    tpu.vector_store %arg4[%c0_8, %c0_9], %11 {strides = array<i32>} : memref<144x128xbf16, #tpu.memory_space<vmem>>, vector<144x128xbf16>,
    return
  }
  func.func @transform_0(%arg0: i32) -> (i32, i32, i32) {
    %c0_i32 = arith.constant 0 : i32
    %c0_i32_0 = arith.constant 0 : i32
    %c0_i32_1 = arith.constant 0 : i32
    return %c0_i32, %arg0, %c0_i32_0 : i32, i32, i32
  }
  func.func @transform_1(%arg0: i32) -> (i32, i32) {
    %c0_i32 = arith.constant 0 : i32
    %c0_i32_0 = arith.constant 0 : i32
    %c0_i32_1 = arith.constant 0 : i32
    return %c0_i32, %c0_i32_0 : i32, i32
  }
  func.func @transform_2(%arg0: i32) -> (i32, i32) {
    %c0_i32 = arith.constant 0 : i32
    %c0_i32_0 = arith.constant 0 : i32
    %c0_i32_1 = arith.constant 0 : i32
    return %c0_i32, %c0_i32_0 : i32, i32
  }
  func.func @transform_3(%arg0: i32) -> (i32, i32) {
    %c0_i32 = arith.constant 0 : i32
    %c0_i32_0 = arith.constant 0 : i32
    return %arg0, %c0_i32 : i32, i32
  }
}

module attributes {stable_mosaic.version = 11 : i64} {
  func.func @_conv2_mlp_kernel(%arg0: i32, %arg1: memref<4x16x16x512xbf16, #tpu.memory_space<vmem>>, %arg2: memref<512x128xbf16, #tpu.memory_space<vmem>>, %arg3: memref<1x128xf32, #tpu.memory_space<vmem>>, %arg4: memref<16x128x128xbf16, #tpu.memory_space<vmem>>, %arg5: memref<1x128xf32, #tpu.memory_space<vmem>>, %arg6: memref<128x128xbf16, #tpu.memory_space<vmem>>, %arg7: memref<1x128xf32, #tpu.memory_space<vmem>>, %arg8: memref<16x128xf32, #tpu.memory_space<vmem>>) attributes {dimension_semantics = [#tpu.dimension_semantics<parallel>], iteration_bounds = array<i64: 1>, scalar_prefetch = 0 : i64, scratch_operands = 0 : i64, tpu.core_type = #tpu.core_type<tc>, window_params = [{transform_indices = @transform_0, window_bounds = array<i64: 4, 16, 16, 512>}, {pipeline_mode = #tpu.pipeline_mode<synchronous>, transform_indices = @transform_1, window_bounds = array<i64: 512, 128>}, {pipeline_mode = #tpu.pipeline_mode<synchronous>, transform_indices = @transform_2, window_bounds = array<i64: 1, 128>}, {pipeline_mode = #tpu.pipeline_mode<synchronous>, transform_indices = @transform_3, window_bounds = array<i64: 16, 128, 128>}, {pipeline_mode = #tpu.pipeline_mode<synchronous>, transform_indices = @transform_4, window_bounds = array<i64: 1, 128>}, {pipeline_mode = #tpu.pipeline_mode<synchronous>, transform_indices = @transform_5, window_bounds = array<i64: 128, 128>}, {pipeline_mode = #tpu.pipeline_mode<synchronous>, transform_indices = @transform_6, window_bounds = array<i64: 1, 128>}, {transform_indices = @transform_7, window_bounds = array<i64: 16, 128>}]} {
    %c0 = arith.constant 0 : index
    %c0_0 = arith.constant 0 : index
    %c0_1 = arith.constant 0 : index
    %c0_2 = arith.constant 0 : index
    %0 = vector.load %arg1[%c0, %c0_0, %c0_1, %c0_2] : memref<4x16x16x512xbf16, #tpu.memory_space<vmem>>, vector<4x16x16x512xbf16>
    %1 = vector.shape_cast %0 : vector<4x16x16x512xbf16> to vector<1024x512xbf16>
    %c0_3 = arith.constant 0 : index
    %c0_4 = arith.constant 0 : index
    %2 = vector.load %arg2[%c0_3, %c0_4] : memref<512x128xbf16, #tpu.memory_space<vmem>>, vector<512x128xbf16>
    %cst = arith.constant dense<0.000000e+00> : vector<1024x128xf32>
    %3 = tpu.matmul %1, %2, %cst {dimension_numbers = #tpu.dot_dimension_numbers<[1], [0], [0], [1], [0, 0, 1, 1], [], []>} : vector<1024x512xbf16>, vector<512x128xbf16>, vector<1024x128xf32> -> vector<1024x128xf32>
    %4 = vector.shape_cast %3 : vector<1024x128xf32> to vector<4x256x128xf32>
    %cst_5 = arith.constant dense<0xFF800000> : vector<256x128xf32>
    %5 = vector.multi_reduction <maximumf>, %4, %cst_5 [0] : vector<4x256x128xf32> to vector<256x128xf32>
    %c0_6 = arith.constant 0 : index
    %c0_7 = arith.constant 0 : index
    %6 = vector.load %arg3[%c0_6, %c0_7] : memref<1x128xf32, #tpu.memory_space<vmem>>, vector<1x128xf32>
    %7 = vector.broadcast %6 : vector<1x128xf32> to vector<256x128xf32>
    %8 = arith.addf %5, %7 : vector<256x128xf32>
    %cst_8 = arith.constant 0.000000e+00 : f32
    %9 = vector.broadcast %cst_8 : f32 to vector<256x128xf32>
    %10 = arith.maximumf %8, %9 : vector<256x128xf32>
    %11 = vector.shape_cast %10 : vector<256x128xf32> to vector<16x16x128xf32>
    %12 = arith.truncf %11 : vector<16x16x128xf32> to vector<16x16x128xbf16>
    %cst_9 = arith.constant 0.000000e+00 : f32
    %13 = vector.broadcast %cst_9 : f32 to vector<16x128xf32>
    %14 = vector.extract_strided_slice %12 {offsets = [0, 0, 0], sizes = [1, 16, 128], strides = [1, 1, 1]} : vector<16x16x128xbf16> to vector<1x16x128xbf16>
    %15 = vector.shape_cast %14 : vector<1x16x128xbf16> to vector<16x128xbf16>
    %c0_10 = arith.constant 0 : index
    %c0_11 = arith.constant 0 : index
    %c0_12 = arith.constant 0 : index
    %16 = vector.load %arg4[%c0_10, %c0_11, %c0_12] : memref<16x128x128xbf16, #tpu.memory_space<vmem>>, vector<1x128x128xbf16>
    %17 = vector.shape_cast %16 : vector<1x128x128xbf16> to vector<128x128xbf16>
    %cst_13 = arith.constant dense<0.000000e+00> : vector<16x128xf32>
    %18 = tpu.matmul %15, %17, %cst_13 {dimension_numbers = #tpu.dot_dimension_numbers<[1], [0], [0], [1], [0, 0, 1, 1], [], []>} : vector<16x128xbf16>, vector<128x128xbf16>, vector<16x128xf32> -> vector<16x128xf32>
    %19 = arith.addf %13, %18 : vector<16x128xf32>
    %20 = vector.extract_strided_slice %12 {offsets = [1, 0, 0], sizes = [1, 16, 128], strides = [1, 1, 1]} : vector<16x16x128xbf16> to vector<1x16x128xbf16>
    %21 = vector.shape_cast %20 : vector<1x16x128xbf16> to vector<16x128xbf16>
    %c1 = arith.constant 1 : index
    %c0_14 = arith.constant 0 : index
    %c0_15 = arith.constant 0 : index
    %22 = vector.load %arg4[%c1, %c0_14, %c0_15] : memref<16x128x128xbf16, #tpu.memory_space<vmem>>, vector<1x128x128xbf16>
    %23 = vector.shape_cast %22 : vector<1x128x128xbf16> to vector<128x128xbf16>
    %cst_16 = arith.constant dense<0.000000e+00> : vector<16x128xf32>
    %24 = tpu.matmul %21, %23, %cst_16 {dimension_numbers = #tpu.dot_dimension_numbers<[1], [0], [0], [1], [0, 0, 1, 1], [], []>} : vector<16x128xbf16>, vector<128x128xbf16>, vector<16x128xf32> -> vector<16x128xf32>
    %25 = arith.addf %19, %24 : vector<16x128xf32>
    %26 = vector.extract_strided_slice %12 {offsets = [2, 0, 0], sizes = [1, 16, 128], strides = [1, 1, 1]} : vector<16x16x128xbf16> to vector<1x16x128xbf16>
    %27 = vector.shape_cast %26 : vector<1x16x128xbf16> to vector<16x128xbf16>
    %c2 = arith.constant 2 : index
    %c0_17 = arith.constant 0 : index
    %c0_18 = arith.constant 0 : index
    %28 = vector.load %arg4[%c2, %c0_17, %c0_18] : memref<16x128x128xbf16, #tpu.memory_space<vmem>>, vector<1x128x128xbf16>
    %29 = vector.shape_cast %28 : vector<1x128x128xbf16> to vector<128x128xbf16>
    %cst_19 = arith.constant dense<0.000000e+00> : vector<16x128xf32>
    %30 = tpu.matmul %27, %29, %cst_19 {dimension_numbers = #tpu.dot_dimension_numbers<[1], [0], [0], [1], [0, 0, 1, 1], [], []>} : vector<16x128xbf16>, vector<128x128xbf16>, vector<16x128xf32> -> vector<16x128xf32>
    %31 = arith.addf %25, %30 : vector<16x128xf32>
    %32 = vector.extract_strided_slice %12 {offsets = [3, 0, 0], sizes = [1, 16, 128], strides = [1, 1, 1]} : vector<16x16x128xbf16> to vector<1x16x128xbf16>
    %33 = vector.shape_cast %32 : vector<1x16x128xbf16> to vector<16x128xbf16>
    %c3 = arith.constant 3 : index
    %c0_20 = arith.constant 0 : index
    %c0_21 = arith.constant 0 : index
    %34 = vector.load %arg4[%c3, %c0_20, %c0_21] : memref<16x128x128xbf16, #tpu.memory_space<vmem>>, vector<1x128x128xbf16>
    %35 = vector.shape_cast %34 : vector<1x128x128xbf16> to vector<128x128xbf16>
    %cst_22 = arith.constant dense<0.000000e+00> : vector<16x128xf32>
    %36 = tpu.matmul %33, %35, %cst_22 {dimension_numbers = #tpu.dot_dimension_numbers<[1], [0], [0], [1], [0, 0, 1, 1], [], []>} : vector<16x128xbf16>, vector<128x128xbf16>, vector<16x128xf32> -> vector<16x128xf32>
    %37 = arith.addf %31, %36 : vector<16x128xf32>
    %38 = vector.extract_strided_slice %12 {offsets = [4, 0, 0], sizes = [1, 16, 128], strides = [1, 1, 1]} : vector<16x16x128xbf16> to vector<1x16x128xbf16>
    %39 = vector.shape_cast %38 : vector<1x16x128xbf16> to vector<16x128xbf16>
    %c4 = arith.constant 4 : index
    %c0_23 = arith.constant 0 : index
    %c0_24 = arith.constant 0 : index
    %40 = vector.load %arg4[%c4, %c0_23, %c0_24] : memref<16x128x128xbf16, #tpu.memory_space<vmem>>, vector<1x128x128xbf16>
    %41 = vector.shape_cast %40 : vector<1x128x128xbf16> to vector<128x128xbf16>
    %cst_25 = arith.constant dense<0.000000e+00> : vector<16x128xf32>
    %42 = tpu.matmul %39, %41, %cst_25 {dimension_numbers = #tpu.dot_dimension_numbers<[1], [0], [0], [1], [0, 0, 1, 1], [], []>} : vector<16x128xbf16>, vector<128x128xbf16>, vector<16x128xf32> -> vector<16x128xf32>
    %43 = arith.addf %37, %42 : vector<16x128xf32>
    %44 = vector.extract_strided_slice %12 {offsets = [5, 0, 0], sizes = [1, 16, 128], strides = [1, 1, 1]} : vector<16x16x128xbf16> to vector<1x16x128xbf16>
    %45 = vector.shape_cast %44 : vector<1x16x128xbf16> to vector<16x128xbf16>
    %c5 = arith.constant 5 : index
    %c0_26 = arith.constant 0 : index
    %c0_27 = arith.constant 0 : index
    %46 = vector.load %arg4[%c5, %c0_26, %c0_27] : memref<16x128x128xbf16, #tpu.memory_space<vmem>>, vector<1x128x128xbf16>
    %47 = vector.shape_cast %46 : vector<1x128x128xbf16> to vector<128x128xbf16>
    %cst_28 = arith.constant dense<0.000000e+00> : vector<16x128xf32>
    %48 = tpu.matmul %45, %47, %cst_28 {dimension_numbers = #tpu.dot_dimension_numbers<[1], [0], [0], [1], [0, 0, 1, 1], [], []>} : vector<16x128xbf16>, vector<128x128xbf16>, vector<16x128xf32> -> vector<16x128xf32>
    %49 = arith.addf %43, %48 : vector<16x128xf32>
    %50 = vector.extract_strided_slice %12 {offsets = [6, 0, 0], sizes = [1, 16, 128], strides = [1, 1, 1]} : vector<16x16x128xbf16> to vector<1x16x128xbf16>
    %51 = vector.shape_cast %50 : vector<1x16x128xbf16> to vector<16x128xbf16>
    %c6 = arith.constant 6 : index
    %c0_29 = arith.constant 0 : index
    %c0_30 = arith.constant 0 : index
    %52 = vector.load %arg4[%c6, %c0_29, %c0_30] : memref<16x128x128xbf16, #tpu.memory_space<vmem>>, vector<1x128x128xbf16>
    %53 = vector.shape_cast %52 : vector<1x128x128xbf16> to vector<128x128xbf16>
    %cst_31 = arith.constant dense<0.000000e+00> : vector<16x128xf32>
    %54 = tpu.matmul %51, %53, %cst_31 {dimension_numbers = #tpu.dot_dimension_numbers<[1], [0], [0], [1], [0, 0, 1, 1], [], []>} : vector<16x128xbf16>, vector<128x128xbf16>, vector<16x128xf32> -> vector<16x128xf32>
    %55 = arith.addf %49, %54 : vector<16x128xf32>
    %56 = vector.extract_strided_slice %12 {offsets = [7, 0, 0], sizes = [1, 16, 128], strides = [1, 1, 1]} : vector<16x16x128xbf16> to vector<1x16x128xbf16>
    %57 = vector.shape_cast %56 : vector<1x16x128xbf16> to vector<16x128xbf16>
    %c7 = arith.constant 7 : index
    %c0_32 = arith.constant 0 : index
    %c0_33 = arith.constant 0 : index
    %58 = vector.load %arg4[%c7, %c0_32, %c0_33] : memref<16x128x128xbf16, #tpu.memory_space<vmem>>, vector<1x128x128xbf16>
    %59 = vector.shape_cast %58 : vector<1x128x128xbf16> to vector<128x128xbf16>
    %cst_34 = arith.constant dense<0.000000e+00> : vector<16x128xf32>
    %60 = tpu.matmul %57, %59, %cst_34 {dimension_numbers = #tpu.dot_dimension_numbers<[1], [0], [0], [1], [0, 0, 1, 1], [], []>} : vector<16x128xbf16>, vector<128x128xbf16>, vector<16x128xf32> -> vector<16x128xf32>
    %61 = arith.addf %55, %60 : vector<16x128xf32>
    %62 = vector.extract_strided_slice %12 {offsets = [8, 0, 0], sizes = [1, 16, 128], strides = [1, 1, 1]} : vector<16x16x128xbf16> to vector<1x16x128xbf16>
    %63 = vector.shape_cast %62 : vector<1x16x128xbf16> to vector<16x128xbf16>
    %c8 = arith.constant 8 : index
    %c0_35 = arith.constant 0 : index
    %c0_36 = arith.constant 0 : index
    %64 = vector.load %arg4[%c8, %c0_35, %c0_36] : memref<16x128x128xbf16, #tpu.memory_space<vmem>>, vector<1x128x128xbf16>
    %65 = vector.shape_cast %64 : vector<1x128x128xbf16> to vector<128x128xbf16>
    %cst_37 = arith.constant dense<0.000000e+00> : vector<16x128xf32>
    %66 = tpu.matmul %63, %65, %cst_37 {dimension_numbers = #tpu.dot_dimension_numbers<[1], [0], [0], [1], [0, 0, 1, 1], [], []>} : vector<16x128xbf16>, vector<128x128xbf16>, vector<16x128xf32> -> vector<16x128xf32>
    %67 = arith.addf %61, %66 : vector<16x128xf32>
    %68 = vector.extract_strided_slice %12 {offsets = [9, 0, 0], sizes = [1, 16, 128], strides = [1, 1, 1]} : vector<16x16x128xbf16> to vector<1x16x128xbf16>
    %69 = vector.shape_cast %68 : vector<1x16x128xbf16> to vector<16x128xbf16>
    %c9 = arith.constant 9 : index
    %c0_38 = arith.constant 0 : index
    %c0_39 = arith.constant 0 : index
    %70 = vector.load %arg4[%c9, %c0_38, %c0_39] : memref<16x128x128xbf16, #tpu.memory_space<vmem>>, vector<1x128x128xbf16>
    %71 = vector.shape_cast %70 : vector<1x128x128xbf16> to vector<128x128xbf16>
    %cst_40 = arith.constant dense<0.000000e+00> : vector<16x128xf32>
    %72 = tpu.matmul %69, %71, %cst_40 {dimension_numbers = #tpu.dot_dimension_numbers<[1], [0], [0], [1], [0, 0, 1, 1], [], []>} : vector<16x128xbf16>, vector<128x128xbf16>, vector<16x128xf32> -> vector<16x128xf32>
    %73 = arith.addf %67, %72 : vector<16x128xf32>
    %74 = vector.extract_strided_slice %12 {offsets = [10, 0, 0], sizes = [1, 16, 128], strides = [1, 1, 1]} : vector<16x16x128xbf16> to vector<1x16x128xbf16>
    %75 = vector.shape_cast %74 : vector<1x16x128xbf16> to vector<16x128xbf16>
    %c10 = arith.constant 10 : index
    %c0_41 = arith.constant 0 : index
    %c0_42 = arith.constant 0 : index
    %76 = vector.load %arg4[%c10, %c0_41, %c0_42] : memref<16x128x128xbf16, #tpu.memory_space<vmem>>, vector<1x128x128xbf16>
    %77 = vector.shape_cast %76 : vector<1x128x128xbf16> to vector<128x128xbf16>
    %cst_43 = arith.constant dense<0.000000e+00> : vector<16x128xf32>
    %78 = tpu.matmul %75, %77, %cst_43 {dimension_numbers = #tpu.dot_dimension_numbers<[1], [0], [0], [1], [0, 0, 1, 1], [], []>} : vector<16x128xbf16>, vector<128x128xbf16>, vector<16x128xf32> -> vector<16x128xf32>
    %79 = arith.addf %73, %78 : vector<16x128xf32>
    %80 = vector.extract_strided_slice %12 {offsets = [11, 0, 0], sizes = [1, 16, 128], strides = [1, 1, 1]} : vector<16x16x128xbf16> to vector<1x16x128xbf16>
    %81 = vector.shape_cast %80 : vector<1x16x128xbf16> to vector<16x128xbf16>
    %c11 = arith.constant 11 : index
    %c0_44 = arith.constant 0 : index
    %c0_45 = arith.constant 0 : index
    %82 = vector.load %arg4[%c11, %c0_44, %c0_45] : memref<16x128x128xbf16, #tpu.memory_space<vmem>>, vector<1x128x128xbf16>
    %83 = vector.shape_cast %82 : vector<1x128x128xbf16> to vector<128x128xbf16>
    %cst_46 = arith.constant dense<0.000000e+00> : vector<16x128xf32>
    %84 = tpu.matmul %81, %83, %cst_46 {dimension_numbers = #tpu.dot_dimension_numbers<[1], [0], [0], [1], [0, 0, 1, 1], [], []>} : vector<16x128xbf16>, vector<128x128xbf16>, vector<16x128xf32> -> vector<16x128xf32>
    %85 = arith.addf %79, %84 : vector<16x128xf32>
    %86 = vector.extract_strided_slice %12 {offsets = [12, 0, 0], sizes = [1, 16, 128], strides = [1, 1, 1]} : vector<16x16x128xbf16> to vector<1x16x128xbf16>
    %87 = vector.shape_cast %86 : vector<1x16x128xbf16> to vector<16x128xbf16>
    %c12 = arith.constant 12 : index
    %c0_47 = arith.constant 0 : index
    %c0_48 = arith.constant 0 : index
    %88 = vector.load %arg4[%c12, %c0_47, %c0_48] : memref<16x128x128xbf16, #tpu.memory_space<vmem>>, vector<1x128x128xbf16>
    %89 = vector.shape_cast %88 : vector<1x128x128xbf16> to vector<128x128xbf16>
    %cst_49 = arith.constant dense<0.000000e+00> : vector<16x128xf32>
    %90 = tpu.matmul %87, %89, %cst_49 {dimension_numbers = #tpu.dot_dimension_numbers<[1], [0], [0], [1], [0, 0, 1, 1], [], []>} : vector<16x128xbf16>, vector<128x128xbf16>, vector<16x128xf32> -> vector<16x128xf32>
    %91 = arith.addf %85, %90 : vector<16x128xf32>
    %92 = vector.extract_strided_slice %12 {offsets = [13, 0, 0], sizes = [1, 16, 128], strides = [1, 1, 1]} : vector<16x16x128xbf16> to vector<1x16x128xbf16>
    %93 = vector.shape_cast %92 : vector<1x16x128xbf16> to vector<16x128xbf16>
    %c13 = arith.constant 13 : index
    %c0_50 = arith.constant 0 : index
    %c0_51 = arith.constant 0 : index
    %94 = vector.load %arg4[%c13, %c0_50, %c0_51] : memref<16x128x128xbf16, #tpu.memory_space<vmem>>, vector<1x128x128xbf16>
    %95 = vector.shape_cast %94 : vector<1x128x128xbf16> to vector<128x128xbf16>
    %cst_52 = arith.constant dense<0.000000e+00> : vector<16x128xf32>
    %96 = tpu.matmul %93, %95, %cst_52 {dimension_numbers = #tpu.dot_dimension_numbers<[1], [0], [0], [1], [0, 0, 1, 1], [], []>} : vector<16x128xbf16>, vector<128x128xbf16>, vector<16x128xf32> -> vector<16x128xf32>
    %97 = arith.addf %91, %96 : vector<16x128xf32>
    %98 = vector.extract_strided_slice %12 {offsets = [14, 0, 0], sizes = [1, 16, 128], strides = [1, 1, 1]} : vector<16x16x128xbf16> to vector<1x16x128xbf16>
    %99 = vector.shape_cast %98 : vector<1x16x128xbf16> to vector<16x128xbf16>
    %c14 = arith.constant 14 : index
    %c0_53 = arith.constant 0 : index
    %c0_54 = arith.constant 0 : index
    %100 = vector.load %arg4[%c14, %c0_53, %c0_54] : memref<16x128x128xbf16, #tpu.memory_space<vmem>>, vector<1x128x128xbf16>
    %101 = vector.shape_cast %100 : vector<1x128x128xbf16> to vector<128x128xbf16>
    %cst_55 = arith.constant dense<0.000000e+00> : vector<16x128xf32>
    %102 = tpu.matmul %99, %101, %cst_55 {dimension_numbers = #tpu.dot_dimension_numbers<[1], [0], [0], [1], [0, 0, 1, 1], [], []>} : vector<16x128xbf16>, vector<128x128xbf16>, vector<16x128xf32> -> vector<16x128xf32>
    %103 = arith.addf %97, %102 : vector<16x128xf32>
    %104 = vector.extract_strided_slice %12 {offsets = [15, 0, 0], sizes = [1, 16, 128], strides = [1, 1, 1]} : vector<16x16x128xbf16> to vector<1x16x128xbf16>
    %105 = vector.shape_cast %104 : vector<1x16x128xbf16> to vector<16x128xbf16>
    %c15 = arith.constant 15 : index
    %c0_56 = arith.constant 0 : index
    %c0_57 = arith.constant 0 : index
    %106 = vector.load %arg4[%c15, %c0_56, %c0_57] : memref<16x128x128xbf16, #tpu.memory_space<vmem>>, vector<1x128x128xbf16>
    %107 = vector.shape_cast %106 : vector<1x128x128xbf16> to vector<128x128xbf16>
    %cst_58 = arith.constant dense<0.000000e+00> : vector<16x128xf32>
    %108 = tpu.matmul %105, %107, %cst_58 {dimension_numbers = #tpu.dot_dimension_numbers<[1], [0], [0], [1], [0, 0, 1, 1], [], []>} : vector<16x128xbf16>, vector<128x128xbf16>, vector<16x128xf32> -> vector<16x128xf32>
    %109 = arith.addf %103, %108 : vector<16x128xf32>
    %c0_59 = arith.constant 0 : index
    %c0_60 = arith.constant 0 : index
    %110 = vector.load %arg5[%c0_59, %c0_60] : memref<1x128xf32, #tpu.memory_space<vmem>>, vector<1x128xf32>
    %111 = vector.broadcast %110 : vector<1x128xf32> to vector<16x128xf32>
    %112 = arith.addf %109, %111 : vector<16x128xf32>
    %cst_61 = arith.constant 0.000000e+00 : f32
    %113 = vector.broadcast %cst_61 : f32 to vector<16x128xf32>
    %114 = arith.maximumf %112, %113 : vector<16x128xf32>
    %115 = arith.truncf %114 : vector<16x128xf32> to vector<16x128xbf16>
    %c0_62 = arith.constant 0 : index
    %c0_63 = arith.constant 0 : index
    %116 = vector.load %arg6[%c0_62, %c0_63] : memref<128x128xbf16, #tpu.memory_space<vmem>>, vector<128x128xbf16>
    %cst_64 = arith.constant dense<0.000000e+00> : vector<16x128xf32>
    %117 = tpu.matmul %115, %116, %cst_64 {dimension_numbers = #tpu.dot_dimension_numbers<[1], [0], [0], [1], [0, 0, 1, 1], [], []>} : vector<16x128xbf16>, vector<128x128xbf16>, vector<16x128xf32> -> vector<16x128xf32>
    %c0_65 = arith.constant 0 : index
    %c0_66 = arith.constant 0 : index
    %118 = vector.load %arg7[%c0_65, %c0_66] : memref<1x128xf32, #tpu.memory_space<vmem>>, vector<1x128xf32>
    %119 = vector.broadcast %118 : vector<1x128xf32> to vector<16x128xf32>
    %120 = arith.addf %117, %119 : vector<16x128xf32>
    %c0_67 = arith.constant 0 : index
    %c0_68 = arith.constant 0 : index
    %121 = vector.load %arg8[%c0_67, %c0_68] : memref<16x128xf32, #tpu.memory_space<vmem>>, vector<16x128xf32>
    tpu.vector_store %arg8[%c0_67, %c0_68], %120 {strides = array<i32>} : memref<16x128xf32, #tpu.memory_space<vmem>>, vector<16x128xf32>,
    return
  }
  func.func @transform_0(%arg0: i32) -> (i32, i32, i32, i32) {
    %c0_i32 = arith.constant 0 : i32
    %c0_i32_0 = arith.constant 0 : i32
    %c0_i32_1 = arith.constant 0 : i32
    %c0_i32_2 = arith.constant 0 : i32
    return %c0_i32, %c0_i32_0, %arg0, %c0_i32_1 : i32, i32, i32, i32
  }
  func.func @transform_1(%arg0: i32) -> (i32, i32) {
    %c0_i32 = arith.constant 0 : i32
    %c0_i32_0 = arith.constant 0 : i32
    %c0_i32_1 = arith.constant 0 : i32
    return %c0_i32, %c0_i32_0 : i32, i32
  }
  func.func @transform_2(%arg0: i32) -> (i32, i32) {
    %c0_i32 = arith.constant 0 : i32
    %c0_i32_0 = arith.constant 0 : i32
    %c0_i32_1 = arith.constant 0 : i32
    return %c0_i32, %c0_i32_0 : i32, i32
  }
  func.func @transform_3(%arg0: i32) -> (i32, i32, i32) {
    %c0_i32 = arith.constant 0 : i32
    %c0_i32_0 = arith.constant 0 : i32
    %c0_i32_1 = arith.constant 0 : i32
    %c0_i32_2 = arith.constant 0 : i32
    return %c0_i32, %c0_i32_0, %c0_i32_1 : i32, i32, i32
  }
  func.func @transform_4(%arg0: i32) -> (i32, i32) {
    %c0_i32 = arith.constant 0 : i32
    %c0_i32_0 = arith.constant 0 : i32
    %c0_i32_1 = arith.constant 0 : i32
    return %c0_i32, %c0_i32_0 : i32, i32
  }
  func.func @transform_5(%arg0: i32) -> (i32, i32) {
    %c0_i32 = arith.constant 0 : i32
    %c0_i32_0 = arith.constant 0 : i32
    %c0_i32_1 = arith.constant 0 : i32
    return %c0_i32, %c0_i32_0 : i32, i32
  }
  func.func @transform_6(%arg0: i32) -> (i32, i32) {
    %c0_i32 = arith.constant 0 : i32
    %c0_i32_0 = arith.constant 0 : i32
    %c0_i32_1 = arith.constant 0 : i32
    return %c0_i32, %c0_i32_0 : i32, i32
  }
  func.func @transform_7(%arg0: i32) -> (i32, i32) {
    %c0_i32 = arith.constant 0 : i32
    %c0_i32_0 = arith.constant 0 : i32
    return %arg0, %c0_i32 : i32, i32
  }
}

</mosaic_0001>

<bundles_post_ra>
// kernel: net_forward.2
= control target key start
LH: loop header
LB: loop body
LE: loop exit
PB: predicated region body
PF: predicated region fallthrough
CT: control target
= control target key end

     0   :  { %s1612_s12 = smov 0   ;;  %s1614_s13 = smov 0   ;;  %s1836_s0 = inlined_call_operand.vmem [shape: bf16[4,288,128], index: 0, kind: input, shape index: {}]   ;;  %s1837_s1 = inlined_call_operand.vmem [shape: bf16[128,128], index: 1, kind: input, shape index: {}]   ;;  %s1838_s2 = inlined_call_operand.vmem [shape: f32[1,128], index: 2, kind: input, shape index: {}]   ;;  %s1839_s3 = inlined_call_operand.vmem [shape: bf16[288,128], index: 3, kind: output, shape index: {}]  }
   0x1   :  { %s1616_s14 = smov 0  }
   0x2 LB: > { %s1234_s15 = sadd.s32 4294967295, %s1590_s14   ;;  %s1629_s16 = sadd.s32 1, %s1590_s14   ;;  %s1590_s14 = sphi %s1616_s14, %s1842_s14   ;;  %s1586_s13 = sphi %s1614_s13, %s1841_s13   ;;  %s1582_s12 = sphi %s1612_s12, %s1840_s12  }
   0x3   : > { %s17_s17 = ssub.s32 %s1590_s14, %s1629_s16  ;;  %s20_s18 = sadd.s32 1, %s1586_s13 }
   0x4   : > { %p18_p0 = scmp.eq.s32.totalorder %s17_s17, 0  ;;  %p27_p1 = scmp.ne.s32.totalorder %s1586_s13, %s1582_s12 }
   0x5   : > { %p28_p2 = scmp.eq.s32.totalorder %s1590_s14, 0  ;;  %p1237_p4 = scmp.ge.s32.totalorder %s1590_s14, 2 }
   0x6   : > { %s1638_s19 = scalar_select %p18_p0, %s1586_s13, %s20_s18  }
   0x7   : > { %p29_p3 = por %p28_p2, %p27_p1  ;;  %127 = sbr.rel (%p1237_p4) target bundleno = 53 (0x35), region = 24 }
   0xc   : > { %130 = sbr.rel (!%p29_p3) target bundleno = 53 (0x35), region = 28  ;;  %s132_s20 = sand.u32 (%p29_p3), 1, %s1586_s13  }
   0xd   : > { %s1419_s21 = smul.u32 (%p29_p3), 72, %s1590_s14 }
   0xe   : > { %s1541_s22 = smul.u32 (%p29_p3), 288, %s132_s20 }
   0xf   : > { %s1646_s25 = scalar_lea.vmem (%p29_p3), %s1836_s0, %s1419_s21 }
  0x10   : > { %v154_v0 = vld [vmem:[%s1646_s25] sm:$0xff] (%p29_p3)   ;;  %v158_v1 = vld [vmem:[%s1646_s25 + $0x8] sm:$0xff] (%p29_p3)   ;;  %v162_v2 = vld [vmem:[%s1646_s25 + $0x10] sm:$0xff] (%p29_p3)   ;;  %s1651_s26 = scalar_lea.vmem (%p29_p3), [#allocation2], %s1541_s22 }
  0x11   : > { %155 = vst [vmem:[%s1651_s26] sm:$0xff] %v154_v0   ;;  %v166_v3 = vld [vmem:[%s1646_s25 + $0x18] sm:$0xff]   ;;  %v170_v4 = vld [vmem:[%s1646_s25 + $0x20] sm:$0xff]   ;;  %v174_v5 = vld [vmem:[%s1646_s25 + $0x28] sm:$0xff]  }
  0x12   : > { %159 = vst [vmem:[%s1651_s26 + $0x8] sm:$0xff] %v158_v1   ;;  %v178_v6 = vld [vmem:[%s1646_s25 + $0x30] sm:$0xff]   ;;  %v182_v7 = vld [vmem:[%s1646_s25 + $0x38] sm:$0xff]   ;;  %v186_v8 = vld [vmem:[%s1646_s25 + $0x40] sm:$0xff]  }
  0x13   : > { %163 = vst [vmem:[%s1651_s26 + $0x10] sm:$0xff] %v162_v2   ;;  %v190_v9 = vld [vmem:[%s1646_s25 + $0x90] sm:$0xff]   ;;  %v194_v10 = vld [vmem:[%s1646_s25 + $0x98] sm:$0xff]   ;;  %v198_v11 = vld [vmem:[%s1646_s25 + $0xa0] sm:$0xff]  }
  0x14   : > { %167 = vst [vmem:[%s1651_s26 + $0x18] sm:$0xff] %v166_v3   ;;  %v202_v12 = vld [vmem:[%s1646_s25 + $0xa8] sm:$0xff]   ;;  %v206_v13 = vld [vmem:[%s1646_s25 + $0xb0] sm:$0xff]   ;;  %v210_v14 = vld [vmem:[%s1646_s25 + $0xb8] sm:$0xff]  }
  0x15   : > { %171 = vst [vmem:[%s1651_s26 + $0x20] sm:$0xff] %v170_v4   ;;  %v214_v15 = vld [vmem:[%s1646_s25 + $0xc0] sm:$0xff]   ;;  %v218_v16 = vld [vmem:[%s1646_s25 + $0xc8] sm:$0xff]   ;;  %v222_v17 = vld [vmem:[%s1646_s25 + $0xd0] sm:$0xff]  }
  0x16   : > { %175 = vst [vmem:[%s1651_s26 + $0x28] sm:$0xff] %v174_v5   ;;  %v226_v18 = vld [vmem:[%s1646_s25 + $0x120] sm:$0xff]   ;;  %v230_v19 = vld [vmem:[%s1646_s25 + $0x128] sm:$0xff]   ;;  %v234_v20 = vld [vmem:[%s1646_s25 + $0x130] sm:$0xff]  }
  0x17   : > { %179 = vst [vmem:[%s1651_s26 + $0x30] sm:$0xff] %v178_v6   ;;  %v238_v21 = vld [vmem:[%s1646_s25 + $0x138] sm:$0xff]   ;;  %v242_v22 = vld [vmem:[%s1646_s25 + $0x140] sm:$0xff]   ;;  %v246_v23 = vld [vmem:[%s1646_s25 + $0x148] sm:$0xff]  }
  0x18   : > { %183 = vst [vmem:[%s1651_s26 + $0x38] sm:$0xff] %v182_v7   ;;  %v250_v24 = vld [vmem:[%s1646_s25 + $0x150] sm:$0xff]   ;;  %v254_v25 = vld [vmem:[%s1646_s25 + $0x158] sm:$0xff]   ;;  %v258_v26 = vld [vmem:[%s1646_s25 + $0x160] sm:$0xff]  }
  0x19   : > { %187 = vst [vmem:[%s1651_s26 + $0x40] sm:$0xff] %v186_v8   ;;  %v262_v27 = vld [vmem:[%s1646_s25 + $0x1b0] sm:$0xff]   ;;  %v266_v28 = vld [vmem:[%s1646_s25 + $0x1b8] sm:$0xff]   ;;  %v270_v29 = vld [vmem:[%s1646_s25 + $0x1c0] sm:$0xff]  }
  0x1a   : > { %191 = vst [vmem:[%s1651_s26 + $0x48] sm:$0xff] %v190_v9   ;;  %v274_v30 = vld [vmem:[%s1646_s25 + $0x1c8] sm:$0xff]   ;;  %v278_v31 = vld [vmem:[%s1646_s25 + $0x1d0] sm:$0xff]   ;;  %v282_v32 = vld [vmem:[%s1646_s25 + $0x1d8] sm:$0xff]  }
  0x1b   : > { %195 = vst [vmem:[%s1651_s26 + $0x50] sm:$0xff] %v194_v10   ;;  %v286_v33 = vld [vmem:[%s1646_s25 + $0x1e0] sm:$0xff]   ;;  %v290_v34 = vld [vmem:[%s1646_s25 + $0x1e8] sm:$0xff]   ;;  %v294_v35 = vld [vmem:[%s1646_s25 + $0x1f0] sm:$0xff]  }
  0x1c   : > { %199 = vst [vmem:[%s1651_s26 + $0x58] sm:$0xff] %v198_v11  }
  0x1d   : > { %203 = vst [vmem:[%s1651_s26 + $0x60] sm:$0xff] %v202_v12  }
  0x1e   : > { %207 = vst [vmem:[%s1651_s26 + $0x68] sm:$0xff] %v206_v13  }
  0x1f   : > { %211 = vst [vmem:[%s1651_s26 + $0x70] sm:$0xff] %v210_v14  }
  0x20   : > { %215 = vst [vmem:[%s1651_s26 + $0x78] sm:$0xff] %v214_v15  }
  0x21   : > { %219 = vst [vmem:[%s1651_s26 + $0x80] sm:$0xff] %v218_v16  }
  0x22   : > { %223 = vst [vmem:[%s1651_s26 + $0x88] sm:$0xff] %v222_v17  }
  0x23   : > { %227 = vst [vmem:[%s1651_s26 + $0x90] sm:$0xff] %v226_v18  }
  0x24   : > { %231 = vst [vmem:[%s1651_s26 + $0x98] sm:$0xff] %v230_v19  }
  0x25   : > { %235 = vst [vmem:[%s1651_s26 + $0xa0] sm:$0xff] %v234_v20  }
  0x26   : > { %239 = vst [vmem:[%s1651_s26 + $0xa8] sm:$0xff] %v238_v21  }
  0x27   : > { %243 = vst [vmem:[%s1651_s26 + $0xb0] sm:$0xff] %v242_v22  }
  0x28   : > { %247 = vst [vmem:[%s1651_s26 + $0xb8] sm:$0xff] %v246_v23  }
  0x29   : > { %251 = vst [vmem:[%s1651_s26 + $0xc0] sm:$0xff] %v250_v24  }
  0x2a   : > { %255 = vst [vmem:[%s1651_s26 + $0xc8] sm:$0xff] %v254_v25  }
  0x2b   : > { %259 = vst [vmem:[%s1651_s26 + $0xd0] sm:$0xff] %v258_v26  }
  0x2c   : > { %263 = vst [vmem:[%s1651_s26 + $0xd8] sm:$0xff] %v262_v27  }
  0x2d   : > { %267 = vst [vmem:[%s1651_s26 + $0xe0] sm:$0xff] %v266_v28  }
  0x2e   : > { %271 = vst [vmem:[%s1651_s26 + $0xe8] sm:$0xff] %v270_v29  }
  0x2f   : > { %275 = vst [vmem:[%s1651_s26 + $0xf0] sm:$0xff] %v274_v30  }
  0x30   : > { %279 = vst [vmem:[%s1651_s26 + $0xf8] sm:$0xff] %v278_v31  }
  0x31   : > { %283 = vst [vmem:[%s1651_s26 + $0x100] sm:$0xff] %v282_v32  }
  0x32   : > { %287 = vst [vmem:[%s1651_s26 + $0x108] sm:$0xff] %v286_v33  }
  0x33   : > { %291 = vst [vmem:[%s1651_s26 + $0x110] sm:$0xff] %v290_v34  }
  0x34   : > { %295 = vst [vmem:[%s1651_s26 + $0x118] sm:$0xff] %v294_v35  }
  0x35 PF: > { %p1239_p5 = scmp.ge.s32.totalorder %s1590_s14, 1  ;;  %p464_p6 = scmp.lt.s32.totalorder %s1590_s14, 3 }
  0x37   : > { %p465_p7 = pnand %p1239_p5, %p464_p6 }
  0x38   : > { %s471_s17 = sand.u32 (!%p465_p7), 1, %s1582_s12   ;;  %s495_s12 = smul.u32 (!%p465_p7), 18, %s1234_s15 }
  0x39   : > { %468 = sbr.rel (%p465_p7) target bundleno = 374 (0x176), region = 69 }
  0x3a   : > { %s1542_s21 = smul.u32 (!%p465_p7), 288, %s471_s17  ;;  %p496_p8 = scmp.lt.s32.totalorder (!%p465_p7), %s495_s12, 35 }
  0x3c   : > { %s1749_s24 = scalar_lea.vmem (!%p465_p7), [#allocation2], %s1542_s21 }
  0x3e   : > { %v1463_v36 = vld [vmem:[%s1837_s1 + $0x38] sm:$0xff]  ;;  %v1462_v37 = vld [vmem:[%s1837_s1 + $0x30] sm:$0xff]  ;;  %v1461_v38 = vld [vmem:[%s1837_s1 + $0x28] sm:$0xff]  ;;  %s1844_s12 = smov (!%p496_p8, %s495_s12), 35 }
  0x3f   : > { %853 = vmatpush.bf16.msra.mxu0 %v1463_v36  ;;  %1517 = vmatpush.bf16.msra.mxu1 %v1463_v36  ;;  %v1460_v39 = vld [vmem:[%s1837_s1 + $0x20] sm:$0xff]  ;;  %v1459_v40 = vld [vmem:[%s1837_s1 + $0x18] sm:$0xff]  ;;  %v1458_v41 = vld [vmem:[%s1837_s1 + $0x10] sm:$0xff]  ;;  %s1240_s14 = sshll.u32 %s1844_s12, 2 }
  0x40   : > { %1518 = vmatpush.bf16.msra.mxu2 %v1463_v36  ;;  %1519 = vmatpush.bf16.msra.mxu3 %v1463_v36  ;;  %v1457_v42 = vld [vmem:[%s1837_s1 + $0x8] sm:$0xff]  ;;  %v1456_v43 = vld [vmem:[%s1837_s1] sm:$0xff]  ;;  %v1438_v46 = vld [vmem:[%s1749_s24 + $0x90] sm:$0xff]  ;;  %s1799_s28 = scalar_lea.vmem %s1839_s3, %s1240_s14 }
  0x41   : > { %v1420_v44 = vld [vmem:[%s1749_s24] sm:$0xff]  ;;  %v1429_v45 = vld [vmem:[%s1749_s24 + $0x48] sm:$0xff]  ;;  %v1447_v47 = vld [vmem:[%s1749_s24 + $0xd8] sm:$0xff] }
  0x42   : > { %v1421_v48 = vld [vmem:[%s1749_s24 + $0x8] sm:$0xff]  ;;  %v1430_v49 = vld [vmem:[%s1749_s24 + $0x50] sm:$0xff]  ;;  %v1439_v50 = vld [vmem:[%s1749_s24 + $0x98] sm:$0xff] }
  0x43   : > { %854 = vmatpush.bf16.msra.mxu0 %v1462_v37  ;;  %1520 = vmatpush.bf16.msra.mxu1 %v1462_v37  ;;  %v1448_v51 = vld [vmem:[%s1749_s24 + $0xe0] sm:$0xff]  ;;  %v1422_v52 = vld [vmem:[%s1749_s24 + $0x10] sm:$0xff]  ;;  %v1431_v53 = vld [vmem:[%s1749_s24 + $0x58] sm:$0xff] }
  0x44   : > { %1521 = vmatpush.bf16.msra.mxu2 %v1462_v37  ;;  %1522 = vmatpush.bf16.msra.mxu3 %v1462_v37  ;;  %v1440_v54 = vld [vmem:[%s1749_s24 + $0xa0] sm:$0xff]  ;;  %v1449_v55 = vld [vmem:[%s1749_s24 + $0xe8] sm:$0xff]  ;;  %v1423_v56 = vld [vmem:[%s1749_s24 + $0x18] sm:$0xff] }
  0x45   : > { %v1432_v57 = vld [vmem:[%s1749_s24 + $0x60] sm:$0xff]  ;;  %v1441_v58 = vld [vmem:[%s1749_s24 + $0xa8] sm:$0xff]  ;;  %v1450_v59 = vld [vmem:[%s1749_s24 + $0xf0] sm:$0xff] }
  0x46   : > { %v1424_v60 = vld [vmem:[%s1749_s24 + $0x20] sm:$0xff]  ;;  %v1433_v61 = vld [vmem:[%s1749_s24 + $0x68] sm:$0xff]  ;;  %v1442_v62 = vld [vmem:[%s1749_s24 + $0xb0] sm:$0xff] }
  0x47   : > { %855 = vmatpush.bf16.msra.mxu0 %v1461_v38  ;;  %1523 = vmatpush.bf16.msra.mxu1 %v1461_v38  ;;  %v1451_v63 = vld [vmem:[%s1749_s24 + $0xf8] sm:$0xff]  ;;  %v1425_v0 = vld [vmem:[%s1749_s24 + $0x28] sm:$0xff]  ;;  %v1434_v1 = vld [vmem:[%s1749_s24 + $0x70] sm:$0xff] }
  0x48   : > { %1524 = vmatpush.bf16.msra.mxu2 %v1461_v38  ;;  %1525 = vmatpush.bf16.msra.mxu3 %v1461_v38  ;;  %v1443_v2 = vld [vmem:[%s1749_s24 + $0xb8] sm:$0xff]  ;;  %v1452_v3 = vld [vmem:[%s1749_s24 + $0x100] sm:$0xff]  ;;  %v1426_v4 = vld [vmem:[%s1749_s24 + $0x30] sm:$0xff] }
  0x49   : > { %v1435_v5 = vld [vmem:[%s1749_s24 + $0x78] sm:$0xff]  ;;  %v1444_v6 = vld [vmem:[%s1749_s24 + $0xc0] sm:$0xff]  ;;  %v1453_v7 = vld [vmem:[%s1749_s24 + $0x108] sm:$0xff] }
  0x4a   : > { %v1427_v8 = vld [vmem:[%s1749_s24 + $0x38] sm:$0xff]  ;;  %v1436_v9 = vld [vmem:[%s1749_s24 + $0x80] sm:$0xff]  ;;  %v1445_v10 = vld [vmem:[%s1749_s24 + $0xc8] sm:$0xff] }
  0x4b   : > { %856 = vmatpush.bf16.msra.mxu0 %v1460_v39  ;;  %1526 = vmatpush.bf16.msra.mxu1 %v1460_v39  ;;  %v1454_v11 = vld [vmem:[%s1749_s24 + $0x110] sm:$0xff]  ;;  %v1428_v12 = vld [vmem:[%s1749_s24 + $0x40] sm:$0xff]  ;;  %v1437_v13 = vld [vmem:[%s1749_s24 + $0x88] sm:$0xff] }
  0x4c   : > { %1527 = vmatpush.bf16.msra.mxu2 %v1460_v39  ;;  %1528 = vmatpush.bf16.msra.mxu3 %v1460_v39  ;;  %v1446_v16 = vld [vmem:[%s1749_s24 + $0xd0] sm:$0xff]  ;;  %v1455_v17 = vld [vmem:[%s1749_s24 + $0x118] sm:$0xff]  ;;  %v1792_v25 = vld [vmem:[%s1838_s2] ss:$0 sm:$0xff] }
  0x4f   : > { %857 = vmatpush.bf16.msra.mxu0 %v1459_v40  ;;  %1529 = vmatpush.bf16.msra.mxu1 %v1459_v40 }
  0x50   : > { %1530 = vmatpush.bf16.msra.mxu2 %v1459_v40  ;;  %1531 = vmatpush.bf16.msra.mxu3 %v1459_v40 }
  0x53   : > { %858 = vmatpush.bf16.msra.mxu0 %v1458_v41  ;;  %1532 = vmatpush.bf16.msra.mxu1 %v1458_v41 }
  0x54   : > { %1533 = vmatpush.bf16.msra.mxu2 %v1458_v41  ;;  %1534 = vmatpush.bf16.msra.mxu3 %v1458_v41 }
  0x57   : > { %859 = vmatpush.bf16.msra.mxu0 %v1457_v42  ;;  %1535 = vmatpush.bf16.msra.mxu1 %v1457_v42 }
  0x58   : > { %1536 = vmatpush.bf16.msra.mxu2 %v1457_v42  ;;  %1537 = vmatpush.bf16.msra.mxu3 %v1457_v42 }
  0x5b   : > { %860 = vmatpush.bf16.msra.mxu0 %v1456_v43  ;;  %1538 = vmatpush.bf16.msra.mxu1 %v1456_v43 }
  0x5c   : > { %1539 = vmatpush.bf16.msra.mxu2 %v1456_v43  ;;  %1540 = vmatpush.bf16.msra.mxu3 %v1456_v43 }
  0x5e   : > { %861 = vmatmul.bf16.vlgmr.msra.gmra.mxu0 %v1420_v44  ;;  %906 = vmatmul.bf16.vlgmr.msra.gmra.mxu1 %v1429_v45 }
  0x5f   : > { %951 = vmatmul.bf16.vlgmr.msra.gmra.mxu2 %v1438_v46  ;;  %996 = vmatmul.bf16.vlgmr.msra.gmra.mxu3 %v1447_v47 }
  0x6e   : > { %866 = vmatmul.bf16.gmra.mxu0 %v1421_v48  ;;  %911 = vmatmul.bf16.gmra.mxu1 %v1430_v49 }
  0x6f   : > { %956 = vmatmul.bf16.gmra.mxu2 %v1439_v50  ;;  %1001 = vmatmul.bf16.gmra.mxu3 %v1448_v51 }
  0x7e   : > { %871 = vmatmul.bf16.gmra.mxu0 %v1422_v52  ;;  %916 = vmatmul.bf16.gmra.mxu1 %v1431_v53 }
  0x7f   : > { %961 = vmatmul.bf16.gmra.mxu2 %v1440_v54  ;;  %1006 = vmatmul.bf16.gmra.mxu3 %v1449_v55 }
  0x8e   : > { %876 = vmatmul.bf16.gmra.mxu0 %v1423_v56  ;;  %921 = vmatmul.bf16.gmra.mxu1 %v1432_v57 }
  0x8f   : > { %966 = vmatmul.bf16.gmra.mxu2 %v1441_v58  ;;  %1011 = vmatmul.bf16.gmra.mxu3 %v1450_v59 }
  0x9e   : > { %881 = vmatmul.bf16.gmra.mxu0 %v1424_v60  ;;  %926 = vmatmul.bf16.gmra.mxu1 %v1433_v61 }
  0x9f   : > { %971 = vmatmul.bf16.gmra.mxu2 %v1442_v62  ;;  %1016 = vmatmul.bf16.gmra.mxu3 %v1451_v63 }
  0xae   : > { %886 = vmatmul.bf16.gmra.mxu0 %v1425_v0  ;;  %931 = vmatmul.bf16.gmra.mxu1 %v1434_v1 }
  0xaf   : > { %976 = vmatmul.bf16.gmra.mxu2 %v1443_v2  ;;  %1021 = vmatmul.bf16.gmra.mxu3 %v1452_v3 }
  0xbe   : > { %891 = vmatmul.bf16.gmra.mxu0 %v1426_v4  ;;  %936 = vmatmul.bf16.gmra.mxu1 %v1435_v5 }
  0xbf   : > { %981 = vmatmul.bf16.gmra.mxu2 %v1444_v6  ;;  %1026 = vmatmul.bf16.gmra.mxu3 %v1453_v7 }
  0xce   : > { %896 = vmatmul.bf16.gmra.mxu0 %v1427_v8  ;;  %941 = vmatmul.bf16.gmra.mxu1 %v1436_v9 }
  0xcf   : > { %986 = vmatmul.bf16.gmra.mxu2 %v1445_v10  ;;  %1031 = vmatmul.bf16.gmra.mxu3 %v1454_v11 }
  0xdb   : > { %v862_v14 = vpop.f32.mrf.mxu0  ;;  %v907_v15 = vpop.f32.mrf.mxu1 }
  0xdc   : > { %v1042_v18 = vmax.f32 %v862_v14, %v907_v15 }
  0xde   : > { %901 = vmatmul.bf16.gmra.mxu0 %v1428_v12  ;;  %946 = vmatmul.bf16.gmra.mxu1 %v1437_v13 }
  0xdf   : > { %991 = vmatmul.bf16.gmra.mxu2 %v1446_v16  ;;  %1036 = vmatmul.bf16.gmra.mxu3 %v1455_v17 }
  0xe2   : > { %v952_v19 = vpop.f32.mrf.mxu2  ;;  %v997_v20 = vpop.f32.mrf.mxu3 }
  0xe3   : > { %v864_v21 = vpop.f32.mrf.mxu0  ;;  %v909_v22 = vpop.f32.mrf.mxu1  ;;  %v1043_v23 = vmax.f32 %v1042_v18, %v952_v19 }
  0xe4   : > { %v1045_v26 = vmax.f32 %v864_v21, %v909_v22 }
  0xe5   : > { %v1044_v24 = vmax.f32 %v1043_v23, %v997_v20 }
  0xe7   : > { %v1100_v32 = vadd.f32 %v1792_v25, %v1044_v24 }
  0xe9   : > { %v1118_v35 = vmax.f32 %v1100_v32, 0.0 }
  0xea   : > { %v954_v27 = vpop.f32.mrf.mxu2  ;;  %v999_v28 = vpop.f32.mrf.mxu3 }
  0xeb   : > { %v1046_v29 = vmax.f32 %v1045_v26, %v954_v27  ;;  %v867_v30 = vpop.f32.mrf.mxu0  ;;  %v912_v31 = vpop.f32.mrf.mxu1 }
  0xec   : > { %v1048_v37 = vmax.f32 %v867_v30, %v912_v31 }
  0xed   : > { %v1047_v33 = vmax.f32 %v1046_v29, %v999_v28 }
  0xef   : > { %v1101_v34 = vadd.f32 %v1792_v25, %v1047_v33 }
  0xf1   : > { %v1119_v36 = vmax.f32 %v1101_v34, 0.0 }
  0xf2   : > { %v957_v38 = vpop.f32.mrf.mxu2  ;;  %v1002_v39 = vpop.f32.mrf.mxu3 }
  0xf3   : > { %v1467_v40 = vpack.c.bf16 %v1119_v36, %v1118_v35  ;;  %v869_v41 = vpop.f32.mrf.mxu0  ;;  %v914_v42 = vpop.f32.mrf.mxu1  ;;  %v1049_v43 = vmax.f32 %v1048_v37, %v957_v38 }
  0xf4   : > { %v1051_v45 = vmax.f32 %v869_v41, %v914_v42 }
  0xf5   : > { %1468 = vst [vmem:[%s1799_s28] sm:$0xff] %v1467_v40   ;;  %v1050_v44 = vmax.f32 %v1049_v43, %v1002_v39 }
  0xf7   : > { %v1102_v51 = vadd.f32 %v1792_v25, %v1050_v44 }
  0xf9   : > { %v1120_v54 = vmax.f32 %v1102_v51, 0.0 }
  0xfa   : > { %v959_v46 = vpop.f32.mrf.mxu2  ;;  %v1004_v47 = vpop.f32.mrf.mxu3 }
  0xfb   : > { %v1052_v48 = vmax.f32 %v1051_v45, %v959_v46  ;;  %v872_v49 = vpop.f32.mrf.mxu0  ;;  %v917_v50 = vpop.f32.mrf.mxu1 }
  0xfc   : > { %v1054_v56 = vmax.f32 %v872_v49, %v917_v50 }
  0xfd   : > { %v1053_v52 = vmax.f32 %v1052_v48, %v1004_v47 }
  0xff   : > { %v1103_v53 = vadd.f32 %v1792_v25, %v1053_v52 }
 0x101   : > { %v1121_v55 = vmax.f32 %v1103_v53, 0.0 }
 0x102   : > { %v962_v57 = vpop.f32.mrf.mxu2  ;;  %v1007_v58 = vpop.f32.mrf.mxu3 }
 0x103   : > { %v1472_v59 = vpack.c.bf16 %v1121_v55, %v1120_v54  ;;  %v874_v60 = vpop.f32.mrf.mxu0  ;;  %v919_v61 = vpop.f32.mrf.mxu1  ;;  %v1055_v62 = vmax.f32 %v1054_v56, %v962_v57 }
 0x104   : > { %v1057_v0 = vmax.f32 %v874_v60, %v919_v61 }
 0x105   : > { %1509 = vst [vmem:[%s1799_s28 + $0x8] sm:$0xff] %v1472_v59   ;;  %v1056_v63 = vmax.f32 %v1055_v62, %v1007_v58 }
 0x107   : > { %v1104_v6 = vadd.f32 %v1792_v25, %v1056_v63 }
 0x109   : > { %v1122_v9 = vmax.f32 %v1104_v6, 0.0 }
 0x10a   : > { %v964_v1 = vpop.f32.mrf.mxu2  ;;  %v1009_v2 = vpop.f32.mrf.mxu3 }
 0x10b   : > { %v1058_v3 = vmax.f32 %v1057_v0, %v964_v1  ;;  %v877_v4 = vpop.f32.mrf.mxu0  ;;  %v922_v5 = vpop.f32.mrf.mxu1 }
 0x10c   : > { %v1060_v11 = vmax.f32 %v877_v4, %v922_v5 }
 0x10d   : > { %v1059_v7 = vmax.f32 %v1058_v3, %v1009_v2 }
 0x10f   : > { %v1105_v8 = vadd.f32 %v1792_v25, %v1059_v7 }
 0x111   : > { %v1123_v10 = vmax.f32 %v1105_v8, 0.0 }
 0x112   : > { %v967_v12 = vpop.f32.mrf.mxu2  ;;  %v1012_v13 = vpop.f32.mrf.mxu3 }
 0x113   : > { %v1477_v14 = vpack.c.bf16 %v1123_v10, %v1122_v9  ;;  %v879_v15 = vpop.f32.mrf.mxu0  ;;  %v924_v16 = vpop.f32.mrf.mxu1  ;;  %v1061_v17 = vmax.f32 %v1060_v11, %v967_v12 }
 0x114   : > { %v1063_v19 = vmax.f32 %v879_v15, %v924_v16 }
 0x115   : > { %1510 = vst [vmem:[%s1799_s28 + $0x10] sm:$0xff] %v1477_v14   ;;  %v1062_v18 = vmax.f32 %v1061_v17, %v1012_v13 }
 0x117   : > { %v1106_v26 = vadd.f32 %v1792_v25, %v1062_v18 }
 0x119   : > { %v1124_v29 = vmax.f32 %v1106_v26, 0.0 }
 0x11a   : > { %v969_v20 = vpop.f32.mrf.mxu2  ;;  %v1014_v21 = vpop.f32.mrf.mxu3 }
 0x11b   : > { %v1064_v22 = vmax.f32 %v1063_v19, %v969_v20  ;;  %v882_v23 = vpop.f32.mrf.mxu0  ;;  %v927_v24 = vpop.f32.mrf.mxu1 }
 0x11c   : > { %v1066_v31 = vmax.f32 %v882_v23, %v927_v24 }
 0x11d   : > { %v1065_v27 = vmax.f32 %v1064_v22, %v1014_v21 }
 0x11f   : > { %v1107_v28 = vadd.f32 %v1792_v25, %v1065_v27 }
 0x121   : > { %v1125_v30 = vmax.f32 %v1107_v28, 0.0 }
 0x122   : > { %v972_v32 = vpop.f32.mrf.mxu2  ;;  %v1017_v33 = vpop.f32.mrf.mxu3 }
 0x123   : > { %v1482_v34 = vpack.c.bf16 %v1125_v30, %v1124_v29  ;;  %v884_v35 = vpop.f32.mrf.mxu0  ;;  %v929_v36 = vpop.f32.mrf.mxu1  ;;  %v1067_v37 = vmax.f32 %v1066_v31, %v972_v32 }
 0x124   : > { %v1069_v39 = vmax.f32 %v884_v35, %v929_v36 }
 0x125   : > { %1511 = vst [vmem:[%s1799_s28 + $0x18] sm:$0xff] %v1482_v34   ;;  %v1068_v38 = vmax.f32 %v1067_v37, %v1017_v33 }
 0x127   : > { %v1108_v45 = vadd.f32 %v1792_v25, %v1068_v38 }
 0x129   : > { %v1126_v48 = vmax.f32 %v1108_v45, 0.0 }
 0x12a   : > { %v974_v40 = vpop.f32.mrf.mxu2  ;;  %v1019_v41 = vpop.f32.mrf.mxu3 }
 0x12b   : > { %v1070_v42 = vmax.f32 %v1069_v39, %v974_v40  ;;  %v887_v43 = vpop.f32.mrf.mxu0  ;;  %v932_v44 = vpop.f32.mrf.mxu1 }
 0x12c   : > { %v1072_v50 = vmax.f32 %v887_v43, %v932_v44 }
 0x12d   : > { %v1071_v46 = vmax.f32 %v1070_v42, %v1019_v41 }
 0x12f   : > { %v1109_v47 = vadd.f32 %v1792_v25, %v1071_v46 }
 0x131   : > { %v1127_v49 = vmax.f32 %v1109_v47, 0.0 }
 0x132   : > { %v977_v51 = vpop.f32.mrf.mxu2  ;;  %v1022_v52 = vpop.f32.mrf.mxu3 }
 0x133   : > { %v1487_v53 = vpack.c.bf16 %v1127_v49, %v1126_v48  ;;  %v889_v54 = vpop.f32.mrf.mxu0  ;;  %v934_v55 = vpop.f32.mrf.mxu1  ;;  %v1073_v56 = vmax.f32 %v1072_v50, %v977_v51 }
 0x134   : > { %v1075_v58 = vmax.f32 %v889_v54, %v934_v55 }
 0x135   : > { %1512 = vst [vmem:[%s1799_s28 + $0x20] sm:$0xff] %v1487_v53   ;;  %v1074_v57 = vmax.f32 %v1073_v56, %v1022_v52 }
 0x137   : > { %v1110_v0 = vadd.f32 %v1792_v25, %v1074_v57 }
 0x139   : > { %v1128_v3 = vmax.f32 %v1110_v0, 0.0 }
 0x13a   : > { %v979_v59 = vpop.f32.mrf.mxu2  ;;  %v1024_v60 = vpop.f32.mrf.mxu3 }
 0x13b   : > { %v1076_v61 = vmax.f32 %v1075_v58, %v979_v59  ;;  %v892_v62 = vpop.f32.mrf.mxu0  ;;  %v937_v63 = vpop.f32.mrf.mxu1 }
 0x13c   : > { %v1078_v5 = vmax.f32 %v892_v62, %v937_v63 }
 0x13d   : > { %v1077_v1 = vmax.f32 %v1076_v61, %v1024_v60 }
 0x13f   : > { %v1111_v2 = vadd.f32 %v1792_v25, %v1077_v1 }
 0x141   : > { %v1129_v4 = vmax.f32 %v1111_v2, 0.0 }
 0x142   : > { %v982_v6 = vpop.f32.mrf.mxu2  ;;  %v1027_v7 = vpop.f32.mrf.mxu3 }
 0x143   : > { %v1492_v8 = vpack.c.bf16 %v1129_v4, %v1128_v3  ;;  %v894_v9 = vpop.f32.mrf.mxu0  ;;  %v939_v10 = vpop.f32.mrf.mxu1  ;;  %v1079_v11 = vmax.f32 %v1078_v5, %v982_v6 }
 0x144   : > { %v1081_v13 = vmax.f32 %v894_v9, %v939_v10 }
 0x145   : > { %1513 = vst [vmem:[%s1799_s28 + $0x28] sm:$0xff] %v1492_v8   ;;  %v1080_v12 = vmax.f32 %v1079_v11, %v1027_v7 }
 0x147   : > { %v1112_v19 = vadd.f32 %v1792_v25, %v1080_v12 }
 0x149   : > { %v1130_v22 = vmax.f32 %v1112_v19, 0.0 }
 0x14a   : > { %v984_v14 = vpop.f32.mrf.mxu2  ;;  %v1029_v15 = vpop.f32.mrf.mxu3 }
 0x14b   : > { %v1082_v16 = vmax.f32 %v1081_v13, %v984_v14  ;;  %v897_v17 = vpop.f32.mrf.mxu0  ;;  %v942_v18 = vpop.f32.mrf.mxu1 }
 0x14c   : > { %v1084_v24 = vmax.f32 %v897_v17, %v942_v18 }
 0x14d   : > { %v1083_v20 = vmax.f32 %v1082_v16, %v1029_v15 }
 0x14f   : > { %v1113_v21 = vadd.f32 %v1792_v25, %v1083_v20 }
 0x151   : > { %v1131_v23 = vmax.f32 %v1113_v21, 0.0 }
 0x152   : > { %v987_v26 = vpop.f32.mrf.mxu2  ;;  %v1032_v27 = vpop.f32.mrf.mxu3 }
 0x153   : > { %v1497_v28 = vpack.c.bf16 %v1131_v23, %v1130_v22  ;;  %v899_v29 = vpop.f32.mrf.mxu0  ;;  %v944_v30 = vpop.f32.mrf.mxu1  ;;  %v1085_v31 = vmax.f32 %v1084_v24, %v987_v26 }
 0x154   : > { %v1087_v33 = vmax.f32 %v899_v29, %v944_v30 }
 0x155   : > { %1514 = vst [vmem:[%s1799_s28 + $0x30] sm:$0xff] %v1497_v28   ;;  %v1086_v32 = vmax.f32 %v1085_v31, %v1032_v27 }
 0x157   : > { %v1114_v39 = vadd.f32 %v1792_v25, %v1086_v32 }
 0x159   : > { %v1132_v42 = vmax.f32 %v1114_v39, 0.0 }
 0x15a   : > { %v989_v34 = vpop.f32.mrf.mxu2  ;;  %v1034_v35 = vpop.f32.mrf.mxu3 }
 0x15b   : > { %v1088_v36 = vmax.f32 %v1087_v33, %v989_v34  ;;  %v902_v37 = vpop.f32.mrf.mxu0  ;;  %v947_v38 = vpop.f32.mrf.mxu1 }
 0x15c   : > { %v1090_v44 = vmax.f32 %v902_v37, %v947_v38 }
 0x15d   : > { %v1089_v40 = vmax.f32 %v1088_v36, %v1034_v35 }
 0x15f   : > { %v1115_v41 = vadd.f32 %v1792_v25, %v1089_v40 }
 0x161   : > { %v1133_v43 = vmax.f32 %v1115_v41, 0.0 }
 0x162   : > { %v992_v45 = vpop.f32.mrf.mxu2  ;;  %v1037_v46 = vpop.f32.mrf.mxu3 }
 0x163   : > { %v1502_v47 = vpack.c.bf16 %v1133_v43, %v1132_v42  ;;  %v1091_v48 = vmax.f32 %v1090_v44, %v992_v45  ;;  %v904_v49 = vpop.f32.mrf.mxu0  ;;  %v949_v50 = vpop.f32.mrf.mxu1 }
 0x164   : > { %v1093_v52 = vmax.f32 %v904_v49, %v949_v50 }
 0x165   : > { %1515 = vst [vmem:[%s1799_s28 + $0x38] sm:$0xff] %v1502_v47   ;;  %v1092_v51 = vmax.f32 %v1091_v48, %v1037_v46 }
 0x167   : > { %v1116_v56 = vadd.f32 %v1792_v25, %v1092_v51 }
 0x169   : > { %v1134_v59 = vmax.f32 %v1116_v56, 0.0 }
 0x16a   : > { %v994_v53 = vpop.f32.mrf.mxu2  ;;  %v1039_v55 = vpop.f32.mrf.mxu3 }
 0x16b   : > { %v1094_v54 = vmax.f32 %v1093_v52, %v994_v53 }
 0x16d   : > { %v1095_v57 = vmax.f32 %v1094_v54, %v1039_v55 }
 0x16f   : > { %v1117_v58 = vadd.f32 %v1792_v25, %v1095_v57 }
 0x171   : > { %v1135_v60 = vmax.f32 %v1117_v58, 0.0 }
 0x173   : > { %v1507_v61 = vpack.c.bf16 %v1135_v60, %v1134_v59 }
 0x175   : > { %1516 = vst [vmem:[%s1799_s28 + $0x40] sm:$0xff] %v1507_v61  }
 0x176 PF: > { %p10_p9 = scmp.ge.s32.totalorder %s1629_s16, 4   ;;  %s1840_s12 = smov %s1586_s13 }
 0x177   : > { %s1841_s13 = smov %s1638_s19  ;;  %s1842_s14 = smov %s1629_s16 }
 0x178   :  { %12 = sbr.rel (!%p10_p9) target bundleno = 2 (0x2), region = 108 }

// kernel: net_forward.3
= control target key start
LH: loop header
LB: loop body
LE: loop exit
PB: predicated region body
PF: predicated region fallthrough
CT: control target
= control target key end

     0   :  { %s9717_s1 = inlined_call_operand.vmem [shape: bf16[512,128], index: 1, kind: input, shape index: {}]   ;;  %s9718_s0 = inlined_call_operand.vmem [shape: bf16[4,16,16,512], index: 0, kind: input, shape index: {}]   ;;  %s9719_s3 = inlined_call_operand.vmem [shape: bf16[16,128,128], index: 3, kind: input, shape index: {}]   ;;  %s9720_s2 = inlined_call_operand.vmem [shape: f32[1,128], index: 2, kind: input, shape index: {}]   ;;  %s9721_s4 = inlined_call_operand.vmem [shape: f32[1,128], index: 4, kind: input, shape index: {}]   ;;  %s9722_s6 = inlined_call_operand.vmem [shape: f32[1,128], index: 6, kind: input, shape index: {}]   ;;  %s9723_s5 = inlined_call_operand.vmem [shape: bf16[128,128], index: 5, kind: input, shape index: {}]   ;;  %s9724_s7 = inlined_call_operand.vmem [shape: f32[16,128], index: 7, kind: output, shape index: {}]  }
   0x1   :  { %v7013_v0 = vld [vmem:[%s9717_s1 + $0x38] sm:$0xff]  ;;  %v7012_v4 = vld [vmem:[%s9717_s1 + $0x30] sm:$0xff]  ;;  %v7011_v8 = vld [vmem:[%s9717_s1 + $0x28] sm:$0xff] }
   0x2   :  { %v7021_v1 = vld [vmem:[%s9717_s1 + $0x78] sm:$0xff]  ;;  %1818 = vmatpush.bf16.msra.mxu0 %v7013_v0  ;;  %v7020_v5 = vld [vmem:[%s9717_s1 + $0x70] sm:$0xff]  ;;  %v7019_v9 = vld [vmem:[%s9717_s1 + $0x68] sm:$0xff] }
   0x3   :  { %v7029_v2 = vld [vmem:[%s9717_s1 + $0xb8] sm:$0xff]  ;;  %2147 = vmatpush.bf16.msra.mxu1 %v7021_v1  ;;  %v7028_v6 = vld [vmem:[%s9717_s1 + $0xb0] sm:$0xff]  ;;  %v7027_v10 = vld [vmem:[%s9717_s1 + $0xa8] sm:$0xff] }
   0x4   :  { %v7037_v3 = vld [vmem:[%s9717_s1 + $0xf8] sm:$0xff]  ;;  %2476 = vmatpush.bf16.msra.mxu2 %v7029_v2  ;;  %v7036_v7 = vld [vmem:[%s9717_s1 + $0xf0] sm:$0xff]  ;;  %v7035_v11 = vld [vmem:[%s9717_s1 + $0xe8] sm:$0xff] }
   0x5   :  { %2805 = vmatpush.bf16.msra.mxu3 %v7037_v3  ;;  %v7010_v12 = vld [vmem:[%s9717_s1 + $0x20] sm:$0xff]  ;;  %v7009_v16 = vld [vmem:[%s9717_s1 + $0x18] sm:$0xff]  ;;  %v7008_v20 = vld [vmem:[%s9717_s1 + $0x10] sm:$0xff] }
   0x6   :  { %1819 = vmatpush.bf16.msra.mxu0 %v7012_v4  ;;  %v7018_v13 = vld [vmem:[%s9717_s1 + $0x60] sm:$0xff]  ;;  %v7017_v17 = vld [vmem:[%s9717_s1 + $0x58] sm:$0xff]  ;;  %v7016_v21 = vld [vmem:[%s9717_s1 + $0x50] sm:$0xff] }
   0x7   :  { %2148 = vmatpush.bf16.msra.mxu1 %v7020_v5  ;;  %v7026_v14 = vld [vmem:[%s9717_s1 + $0xa0] sm:$0xff]  ;;  %v7025_v18 = vld [vmem:[%s9717_s1 + $0x98] sm:$0xff]  ;;  %v7024_v22 = vld [vmem:[%s9717_s1 + $0x90] sm:$0xff] }
   0x8   :  { %2477 = vmatpush.bf16.msra.mxu2 %v7028_v6  ;;  %v7034_v15 = vld [vmem:[%s9717_s1 + $0xe0] sm:$0xff]  ;;  %v7033_v19 = vld [vmem:[%s9717_s1 + $0xd8] sm:$0xff]  ;;  %v7032_v23 = vld [vmem:[%s9717_s1 + $0xd0] sm:$0xff] }
   0x9   :  { %2806 = vmatpush.bf16.msra.mxu3 %v7036_v7  ;;  %v7007_v24 = vld [vmem:[%s9717_s1 + $0x8] sm:$0xff]  ;;  %v7006_v28 = vld [vmem:[%s9717_s1] sm:$0xff]  ;;  %v6752_v33 = vld [vmem:[%s9718_s0 + $0xc] sm:$0xf0] }
   0xa   :  { %1820 = vmatpush.bf16.msra.mxu0 %v7011_v8  ;;  %v7015_v25 = vld [vmem:[%s9717_s1 + $0x48] sm:$0xff]  ;;  %v7014_v29 = vld [vmem:[%s9717_s1 + $0x40] sm:$0xff]  ;;  %v4818_v35 = vld [vmem:[%s9718_s0 + $0x10] sm:$0xf0] }
   0xb   :  { %2149 = vmatpush.bf16.msra.mxu1 %v7019_v9  ;;  %v7023_v26 = vld [vmem:[%s9717_s1 + $0x88] sm:$0xff]  ;;  %v7022_v30 = vld [vmem:[%s9717_s1 + $0x80] sm:$0xff]  ;;  %v6753_v37 = vld [vmem:[%s9718_s0 + $0x14] sm:$0xf0] }
   0xc   :  { %2478 = vmatpush.bf16.msra.mxu2 %v7027_v10  ;;  %v7031_v27 = vld [vmem:[%s9717_s1 + $0xc8] sm:$0xff]  ;;  %v7030_v31 = vld [vmem:[%s9717_s1 + $0xc0] sm:$0xff]  ;;  %v4826_v39 = vld [vmem:[%s9718_s0 + $0x18] sm:$0xf0] }
   0xd   :  { %2807 = vmatpush.bf16.msra.mxu3 %v7035_v11  ;;  %v4816_v32 = vld [vmem:[%s9718_s0] sm:$0xf]  ;;  %v6750_v34 = vld [vmem:[%s9718_s0 + $0x4] sm:$0xf]  ;;  %v4824_v36 = vld [vmem:[%s9718_s0 + $0x8] sm:$0xf] }
   0xe   :  { %1821 = vmatpush.bf16.msra.mxu0 %v7010_v12  ;;  %v6751_v38 = vld [vmem:[%s9718_s0 + $0xc] sm:$0xf]  ;;  %v4817_v40 = vor.u32 %v6752_v33, %v4816_v32  ;;  %v4821_v41 = vor.u32 %v6750_v34, %v4818_v35  ;;  %v4825_v42 = vor.u32 %v6753_v37, %v4824_v36  ;;  %v4832_v44 = vld [vmem:[%s9718_s0 + $0x20] sm:$0xf]  ;;  %v6756_v45 = vld [vmem:[%s9718_s0 + $0x2c] sm:$0xf0] }
   0xf   :  { %2150 = vmatpush.bf16.msra.mxu1 %v7018_v13  ;;  %v4829_v43 = vor.u32 %v6751_v38, %v4826_v39  ;;  %v6754_v46 = vld [vmem:[%s9718_s0 + $0x24] sm:$0xf]  ;;  %v4834_v47 = vld [vmem:[%s9718_s0 + $0x30] sm:$0xf0]  ;;  %v4840_v48 = vld [vmem:[%s9718_s0 + $0x28] sm:$0xf]  ;;  %v4833_v52 = vor.u32 %v6756_v45, %v4832_v44 }
  0x10   :  { %2479 = vmatpush.bf16.msra.mxu2 %v7026_v14  ;;  %v6757_v49 = vld [vmem:[%s9718_s0 + $0x34] sm:$0xf0]  ;;  %v6755_v50 = vld [vmem:[%s9718_s0 + $0x2c] sm:$0xf]  ;;  %v4842_v51 = vld [vmem:[%s9718_s0 + $0x38] sm:$0xf0]  ;;  %v4837_v53 = vor.u32 %v6754_v46, %v4834_v47 }
  0x11   :  { %2808 = vmatpush.bf16.msra.mxu3 %v7034_v15  ;;  %v4841_v54 = vor.u32 %v6757_v49, %v4840_v48  ;;  %v4845_v55 = vor.u32 %v6755_v50, %v4842_v51  ;;  %v4848_v56 = vld [vmem:[%s9718_s0 + $0x40] sm:$0xf]  ;;  %v6760_v57 = vld [vmem:[%s9718_s0 + $0x4c] sm:$0xf0]  ;;  %v6758_v58 = vld [vmem:[%s9718_s0 + $0x44] sm:$0xf] }
  0x12   :  { %1822 = vmatpush.bf16.msra.mxu0 %v7009_v16  ;;  %v4850_v59 = vld [vmem:[%s9718_s0 + $0x50] sm:$0xf0]  ;;  %v4856_v60 = vld [vmem:[%s9718_s0 + $0x48] sm:$0xf]  ;;  %v6761_v61 = vld [vmem:[%s9718_s0 + $0x54] sm:$0xf0]  ;;  %v4849_v0 = vor.u32 %v6760_v57, %v4848_v56 }
  0x13   :  { %2151 = vmatpush.bf16.msra.mxu1 %v7017_v17  ;;  %v6759_v62 = vld [vmem:[%s9718_s0 + $0x4c] sm:$0xf]  ;;  %v4858_v63 = vld [vmem:[%s9718_s0 + $0x58] sm:$0xf0]  ;;  %v4853_v1 = vor.u32 %v6758_v58, %v4850_v59  ;;  %v4857_v2 = vor.u32 %v6761_v61, %v4856_v60  ;;  %v4864_v4 = vld [vmem:[%s9718_s0 + $0x60] sm:$0xf] }
  0x14   :  { %2480 = vmatpush.bf16.msra.mxu2 %v7025_v18  ;;  %v4861_v3 = vor.u32 %v6759_v62, %v4858_v63  ;;  %v6764_v5 = vld [vmem:[%s9718_s0 + $0x6c] sm:$0xf0]  ;;  %v6762_v6 = vld [vmem:[%s9718_s0 + $0x64] sm:$0xf]  ;;  %v4866_v7 = vld [vmem:[%s9718_s0 + $0x70] sm:$0xf0] }
  0x15   :  { %2809 = vmatpush.bf16.msra.mxu3 %v7033_v19  ;;  %v4872_v8 = vld [vmem:[%s9718_s0 + $0x68] sm:$0xf]  ;;  %v6765_v9 = vld [vmem:[%s9718_s0 + $0x74] sm:$0xf0]  ;;  %v6763_v10 = vld [vmem:[%s9718_s0 + $0x6c] sm:$0xf]  ;;  %v4865_v12 = vor.u32 %v6764_v5, %v4864_v4  ;;  %v4869_v13 = vor.u32 %v6762_v6, %v4866_v7 }
  0x16   :  { %1823 = vmatpush.bf16.msra.mxu0 %v7008_v20  ;;  %v4874_v11 = vld [vmem:[%s9718_s0 + $0x78] sm:$0xf0]  ;;  %v4873_v14 = vor.u32 %v6765_v9, %v4872_v8  ;;  %v4880_v20 = vld [vmem:[%s9718_s0 + $0x80] sm:$0xf]  ;;  %v6772_v33 = vld [vmem:[%s9718_s0 + $0xac] sm:$0xf0] }
  0x17   :  { %2152 = vmatpush.bf16.msra.mxu1 %v7016_v21  ;;  %v4877_v15 = vor.u32 %v6763_v10, %v4874_v11  ;;  %v7061_v16 = vld [vmem:[%s9719_s3 + $0xb8] sm:$0xff]  ;;  %v6768_v21 = vld [vmem:[%s9718_s0 + $0x8c] sm:$0xf0]  ;;  %v4896_v32 = vld [vmem:[%s9718_s0 + $0xa0] sm:$0xf] }
  0x18   :  { %2481 = vmatpush.bf16.msra.mxu2 %v7024_v22  ;;  %v7053_v17 = vld [vmem:[%s9719_s3 + $0x78] sm:$0xff]  ;;  %v6766_v22 = vld [vmem:[%s9718_s0 + $0x84] sm:$0xf]  ;;  %v4898_v35 = vld [vmem:[%s9718_s0 + $0xb0] sm:$0xf0] }
  0x19   :  { %2810 = vmatpush.bf16.msra.mxu3 %v7032_v23  ;;  %v7069_v18 = vld [vmem:[%s9719_s3 + $0xf8] sm:$0xff]  ;;  %v4882_v23 = vld [vmem:[%s9718_s0 + $0x90] sm:$0xf0]  ;;  %v6770_v34 = vld [vmem:[%s9718_s0 + $0xa4] sm:$0xf] }
  0x1a   :  { %1824 = vmatpush.bf16.msra.mxu0 %v7007_v24  ;;  %v7045_v19 = vld [vmem:[%s9719_s3 + $0x38] sm:$0xff]  ;;  %v4888_v24 = vld [vmem:[%s9718_s0 + $0x88] sm:$0xf]  ;;  %v6771_v38 = vld [vmem:[%s9718_s0 + $0xac] sm:$0xf] }
  0x1b   :  { %2153 = vmatpush.bf16.msra.mxu1 %v7015_v25  ;;  %v6769_v25 = vld [vmem:[%s9718_s0 + $0x94] sm:$0xf0]  ;;  %v4904_v36 = vld [vmem:[%s9718_s0 + $0xa8] sm:$0xf]  ;;  %v4906_v39 = vld [vmem:[%s9718_s0 + $0xb8] sm:$0xf0] }
  0x1c   :  { %2482 = vmatpush.bf16.msra.mxu2 %v7023_v26  ;;  %v6767_v26 = vld [vmem:[%s9718_s0 + $0x8c] sm:$0xf]  ;;  %v6773_v37 = vld [vmem:[%s9718_s0 + $0xb4] sm:$0xf0]  ;;  %v4912_v44 = vld [vmem:[%s9718_s0 + $0xc0] sm:$0xf] }
  0x1d   :  { %2811 = vmatpush.bf16.msra.mxu3 %v7031_v27  ;;  %v4890_v27 = vld [vmem:[%s9718_s0 + $0x98] sm:$0xf0]  ;;  %v6776_v45 = vld [vmem:[%s9718_s0 + $0xcc] sm:$0xf0]  ;;  %v6774_v46 = vld [vmem:[%s9718_s0 + $0xc4] sm:$0xf] }
  0x1e   :  { %1825 = vmatpush.bf16.msra.mxu0 %v7006_v28  ;;  %v4881_v28 = vor.u32 %v6768_v21, %v4880_v20  ;;  %v4914_v47 = vld [vmem:[%s9718_s0 + $0xd0] sm:$0xf0]  ;;  %v4920_v48 = vld [vmem:[%s9718_s0 + $0xc8] sm:$0xf]  ;;  %v6777_v49 = vld [vmem:[%s9718_s0 + $0xd4] sm:$0xf0] }
  0x1f   :  { %2154 = vmatpush.bf16.msra.mxu1 %v7014_v29  ;;  %v4885_v29 = vor.u32 %v6766_v22, %v4882_v23  ;;  %v6775_v50 = vld [vmem:[%s9718_s0 + $0xcc] sm:$0xf]  ;;  %v4922_v51 = vld [vmem:[%s9718_s0 + $0xd8] sm:$0xf0]  ;;  %v4928_v56 = vld [vmem:[%s9718_s0 + $0xe0] sm:$0xf] }
  0x20   :  { %2483 = vmatpush.bf16.msra.mxu2 %v7022_v30  ;;  %v4889_v30 = vor.u32 %v6769_v25, %v4888_v24  ;;  %v6780_v57 = vld [vmem:[%s9718_s0 + $0xec] sm:$0xf0]  ;;  %v6778_v58 = vld [vmem:[%s9718_s0 + $0xe4] sm:$0xf]  ;;  %v4930_v59 = vld [vmem:[%s9718_s0 + $0xf0] sm:$0xf0] }
  0x21   :  { %2812 = vmatpush.bf16.msra.mxu3 %v7030_v31  ;;  %1826 = vmatmul.bf16.vlgmr.msra.gmra.mxu0 %v4817_v40  ;;  %v4893_v31 = vor.u32 %v6767_v26, %v4890_v27  ;;  %v4897_v40 = vor.u32 %v6772_v33, %v4896_v32  ;;  %v4936_v60 = vld [vmem:[%s9718_s0 + $0xe8] sm:$0xf]  ;;  %v6781_v61 = vld [vmem:[%s9718_s0 + $0xf4] sm:$0xf0]  ;;  %v6779_v62 = vld [vmem:[%s9718_s0 + $0xec] sm:$0xf] }
  0x22   :  { %2155 = vmatmul.bf16.vlgmr.msra.gmra.mxu1 %v4821_v41  ;;  %3417 = vmatpush.bf16.msrb.mxu0 %v7053_v17  ;;  %v4901_v41 = vor.u32 %v6770_v34, %v4898_v35  ;;  %v4938_v63 = vld [vmem:[%s9718_s0 + $0xf8] sm:$0xf0]  ;;  %v4944_v4 = vld [vmem:[%s9718_s0 + $0x100] sm:$0xf]  ;;  %v6784_v5 = vld [vmem:[%s9718_s0 + $0x10c] sm:$0xf0] }
  0x23   :  { %2484 = vmatmul.bf16.vlgmr.msra.gmra.mxu2 %v4825_v42  ;;  %3485 = vmatpush.bf16.msrb.mxu1 %v7045_v19  ;;  %v4905_v42 = vor.u32 %v6773_v37, %v4904_v36  ;;  %v6782_v6 = vld [vmem:[%s9718_s0 + $0x104] sm:$0xf]  ;;  %v4946_v7 = vld [vmem:[%s9718_s0 + $0x110] sm:$0xf0]  ;;  %v4952_v8 = vld [vmem:[%s9718_s0 + $0x108] sm:$0xf] }
  0x24   :  { %2813 = vmatmul.bf16.vlgmr.msra.gmra.mxu3 %v4829_v43  ;;  %3570 = vmatpush.bf16.msrb.mxu2 %v7061_v16  ;;  %v4909_v43 = vor.u32 %v6771_v38, %v4906_v39  ;;  %v6785_v9 = vld [vmem:[%s9718_s0 + $0x114] sm:$0xf0]  ;;  %v6783_v10 = vld [vmem:[%s9718_s0 + $0x10c] sm:$0xf]  ;;  %v4954_v11 = vld [vmem:[%s9718_s0 + $0x118] sm:$0xf0] }
  0x25   :  { %3657 = vmatpush.bf16.msrb.mxu3 %v7069_v18  ;;  %v4953_v16 = vor.u32 %v6785_v9, %v4952_v8  ;;  %v4957_v17 = vor.u32 %v6783_v10, %v4954_v11  ;;  %v4960_v26 = vld [vmem:[%s9718_s0 + $0x120] sm:$0xf]  ;;  %v6788_v27 = vld [vmem:[%s9718_s0 + $0x12c] sm:$0xf0]  ;;  %v6787_v32 = vld [vmem:[%s9718_s0 + $0x12c] sm:$0xf] }
  0x26   :  { %v4970_v33 = vld [vmem:[%s9718_s0 + $0x138] sm:$0xf0]  ;;  %v4961_v36 = vor.u32 %v6788_v27, %v4960_v26 }
  0x31   :  { %1831 = vmatmul.bf16.gmra.mxu0 %v4833_v52  ;;  %v4913_v52 = vor.u32 %v6776_v45, %v4912_v44 }
  0x32   :  { %2160 = vmatmul.bf16.gmra.mxu1 %v4837_v53  ;;  %v4917_v53 = vor.u32 %v6774_v46, %v4914_v47 }
  0x33   :  { %2489 = vmatmul.bf16.gmra.mxu2 %v4841_v54  ;;  %v4921_v54 = vor.u32 %v6777_v49, %v4920_v48 }
  0x34   :  { %2818 = vmatmul.bf16.gmra.mxu3 %v4845_v55  ;;  %v4925_v55 = vor.u32 %v6775_v50, %v4922_v51 }
  0x41   :  { %1836 = vmatmul.bf16.gmra.mxu0 %v4849_v0  ;;  %v4929_v0 = vor.u32 %v6780_v57, %v4928_v56  ;;  %v4984_v56 = vld [vmem:[%s9718_s0 + $0x148] sm:$0xf]  ;;  %v6793_v57 = vld [vmem:[%s9718_s0 + $0x154] sm:$0xf0] }
  0x42   :  { %2165 = vmatmul.bf16.gmra.mxu1 %v4853_v1  ;;  %v4933_v1 = vor.u32 %v6778_v58, %v4930_v59  ;;  %v6791_v58 = vld [vmem:[%s9718_s0 + $0x14c] sm:$0xf]  ;;  %v4986_v59 = vld [vmem:[%s9718_s0 + $0x158] sm:$0xf0] }
  0x43   :  { %2494 = vmatmul.bf16.gmra.mxu2 %v4857_v2  ;;  %v4937_v2 = vor.u32 %v6781_v61, %v4936_v60 }
  0x44   :  { %2823 = vmatmul.bf16.gmra.mxu3 %v4861_v3  ;;  %v4941_v3 = vor.u32 %v6779_v62, %v4938_v63 }
  0x51   :  { %1841 = vmatmul.bf16.gmra.mxu0 %v4865_v12  ;;  %v4945_v12 = vor.u32 %v6784_v5, %v4944_v4  ;;  %v4989_v4 = vor.u32 %v6791_v58, %v4986_v59 }
  0x52   :  { %2170 = vmatmul.bf16.gmra.mxu1 %v4869_v13  ;;  %v4949_v13 = vor.u32 %v6782_v6, %v4946_v7 }
  0x53   :  { %2499 = vmatmul.bf16.gmra.mxu2 %v4873_v14 }
  0x54   :  { %2828 = vmatmul.bf16.gmra.mxu3 %v4877_v15 }
  0x61   :  { %1846 = vmatmul.bf16.gmra.mxu0 %v4881_v28  ;;  %v6786_v28 = vld [vmem:[%s9718_s0 + $0x124] sm:$0xf] }
  0x62   :  { %2175 = vmatmul.bf16.gmra.mxu1 %v4885_v29  ;;  %v4962_v29 = vld [vmem:[%s9718_s0 + $0x130] sm:$0xf0] }
  0x63   :  { %2504 = vmatmul.bf16.gmra.mxu2 %v4889_v30  ;;  %v4968_v30 = vld [vmem:[%s9718_s0 + $0x128] sm:$0xf]  ;;  %v4965_v37 = vor.u32 %v6786_v28, %v4962_v29 }
  0x64   :  { %2833 = vmatmul.bf16.gmra.mxu3 %v4893_v31  ;;  %v6789_v31 = vld [vmem:[%s9718_s0 + $0x134] sm:$0xf0] }
  0x71   :  { %1851 = vmatmul.bf16.gmra.mxu0 %v4897_v40 }
  0x72   :  { %2180 = vmatmul.bf16.gmra.mxu1 %v4901_v41  ;;  %v4969_v41 = vor.u32 %v6789_v31, %v4968_v30 }
  0x73   :  { %2509 = vmatmul.bf16.gmra.mxu2 %v4905_v42  ;;  %v4973_v42 = vor.u32 %v6787_v32, %v4970_v33 }
  0x74   :  { %2838 = vmatmul.bf16.gmra.mxu3 %v4909_v43 }
  0x81   :  { %1856 = vmatmul.bf16.gmra.mxu0 %v4913_v52  ;;  %v4976_v52 = vld [vmem:[%s9718_s0 + $0x140] sm:$0xf] }
  0x82   :  { %2185 = vmatmul.bf16.gmra.mxu1 %v4917_v53  ;;  %v6792_v53 = vld [vmem:[%s9718_s0 + $0x14c] sm:$0xf0] }
  0x83   :  { %2514 = vmatmul.bf16.gmra.mxu2 %v4921_v54  ;;  %v6790_v54 = vld [vmem:[%s9718_s0 + $0x144] sm:$0xf]  ;;  %v4977_v62 = vor.u32 %v6792_v53, %v4976_v52 }
  0x84   :  { %2843 = vmatmul.bf16.gmra.mxu3 %v4925_v55  ;;  %v4978_v55 = vld [vmem:[%s9718_s0 + $0x150] sm:$0xf0] }
  0x85   :  { %v4981_v63 = vor.u32 %v6790_v54, %v4978_v55 }
  0x91   :  { %1861 = vmatmul.bf16.gmra.mxu0 %v4929_v0 }
  0x92   :  { %2190 = vmatmul.bf16.gmra.mxu1 %v4933_v1 }
  0x93   :  { %2519 = vmatmul.bf16.gmra.mxu2 %v4937_v2 }
  0x94   :  { %2848 = vmatmul.bf16.gmra.mxu3 %v4941_v3  ;;  %v4985_v3 = vor.u32 %v6793_v57, %v4984_v56 }
  0x9e   :  { %v1827_v14 = vpop.f32.mrf.mxu0 }
  0x9f   :  { %v2156_v15 = vpop.f32.mrf.mxu1 }
  0xa0   :  { %v2157_v18 = vadd.f32 %v2156_v15, %v1827_v14  ;;  %v4992_v14 = vld [vmem:[%s9718_s0 + $0x160] sm:$0xf]  ;;  %v6796_v15 = vld [vmem:[%s9718_s0 + $0x16c] sm:$0xf0] }
  0xa1   :  { %1866 = vmatmul.bf16.gmra.mxu0 %v4945_v12 }
  0xa2   :  { %2195 = vmatmul.bf16.gmra.mxu1 %v4949_v13 }
  0xa3   :  { %2524 = vmatmul.bf16.gmra.mxu2 %v4953_v16  ;;  %v6794_v16 = vld [vmem:[%s9718_s0 + $0x164] sm:$0xf] }
  0xa4   :  { %2853 = vmatmul.bf16.gmra.mxu3 %v4957_v17  ;;  %v4994_v17 = vld [vmem:[%s9718_s0 + $0x170] sm:$0xf0] }
  0xa5   :  { %v4997_v26 = vor.u32 %v6794_v16, %v4994_v17  ;;  %v6805_v16 = vld [vmem:[%s9718_s0 + $0x1b4] sm:$0xf0]  ;;  %v6803_v17 = vld [vmem:[%s9718_s0 + $0x1ac] sm:$0xf] }
  0xa6   :  { %v2485_v19 = vpop.f32.mrf.mxu2  ;;  %v1829_v22 = vpop.f32.mrf.mxu0 }
  0xa7   :  { %v2814_v20 = vpop.f32.mrf.mxu3  ;;  %v2486_v21 = vadd.f32 %v2485_v19, %v2157_v18  ;;  %v2158_v23 = vpop.f32.mrf.mxu1  ;;  %v5000_v18 = vld [vmem:[%s9718_s0 + $0x168] sm:$0xf]  ;;  %v6797_v19 = vld [vmem:[%s9718_s0 + $0x174] sm:$0xf0] }
  0xa8   :  { %v2159_v24 = vadd.f32 %v2158_v23, %v1829_v22  ;;  %v5001_v30 = vor.u32 %v6797_v19, %v5000_v18  ;;  %v5034_v18 = vld [vmem:[%s9718_s0 + $0x1b8] sm:$0xf0] }
  0xa9   :  { %v7542_v25 = vadd.f32 %v2814_v20, %v2486_v21  ;;  %v6795_v20 = vld [vmem:[%s9718_s0 + $0x16c] sm:$0xf]  ;;  %v5002_v21 = vld [vmem:[%s9718_s0 + $0x178] sm:$0xf0] }
  0xaa   :  { %v5005_v31 = vor.u32 %v6795_v20, %v5002_v21 }
  0xae   :  { %v2487_v34 = vpop.f32.mrf.mxu2  ;;  %v1832_v39 = vpop.f32.mrf.mxu0 }
  0xaf   :  { %v2816_v35 = vpop.f32.mrf.mxu3  ;;  %v2488_v38 = vadd.f32 %v2487_v34, %v2159_v24  ;;  %v2161_v40 = vpop.f32.mrf.mxu1  ;;  %v4993_v24 = vor.u32 %v6796_v15, %v4992_v14  ;;  %v5026_v14 = vld [vmem:[%s9718_s0 + $0x1b0] sm:$0xf0]  ;;  %v5032_v15 = vld [vmem:[%s9718_s0 + $0x1a8] sm:$0xf] }
  0xb0   :  { %v2162_v43 = vadd.f32 %v2161_v40, %v1832_v39 }
  0xb1   :  { %v7568_v44 = vadd.f32 %v2816_v35, %v2488_v38  ;;  %1871 = vmatmul.bf16.gmra.mxu0 %v4961_v36 }
  0xb2   :  { %2200 = vmatmul.bf16.gmra.mxu1 %v4965_v37 }
  0xb3   :  { %2529 = vmatmul.bf16.gmra.mxu2 %v4969_v41  ;;  %v7060_v41 = vld [vmem:[%s9719_s3 + $0xb0] sm:$0xff] }
  0xb4   :  { %2858 = vmatmul.bf16.gmra.mxu3 %v4973_v42  ;;  %v5008_v42 = vld [vmem:[%s9718_s0 + $0x180] sm:$0xf]  ;;  %3571 = vmatpush.bf16.msrb.mxu2 %v7060_v41  ;;  %v6808_v41 = vld [vmem:[%s9718_s0 + $0x1cc] sm:$0xf0] }
  0xb6   :  { %v2490_v45 = vpop.f32.mrf.mxu2  ;;  %v1834_v48 = vpop.f32.mrf.mxu0 }
  0xb7   :  { %v2819_v46 = vpop.f32.mrf.mxu3  ;;  %v2491_v47 = vadd.f32 %v2490_v45, %v2162_v43  ;;  %v2163_v49 = vpop.f32.mrf.mxu1  ;;  %v6800_v43 = vld [vmem:[%s9718_s0 + $0x18c] sm:$0xf0]  ;;  %v6798_v45 = vld [vmem:[%s9718_s0 + $0x184] sm:$0xf] }
  0xb8   :  { %v2164_v50 = vadd.f32 %v2163_v49, %v1834_v48  ;;  %v6801_v48 = vld [vmem:[%s9718_s0 + $0x194] sm:$0xf0]  ;;  %v6799_v49 = vld [vmem:[%s9718_s0 + $0x18c] sm:$0xf]  ;;  %v5009_v54 = vor.u32 %v6800_v43, %v5008_v42  ;;  %v6806_v42 = vld [vmem:[%s9718_s0 + $0x1c4] sm:$0xf] }
  0xb9   :  { %v7570_v51 = vadd.f32 %v2819_v46, %v2491_v47  ;;  %v5010_v46 = vld [vmem:[%s9718_s0 + $0x190] sm:$0xf0]  ;;  %v5016_v47 = vld [vmem:[%s9718_s0 + $0x188] sm:$0xf] }
  0xba   :  { %v5013_v55 = vor.u32 %v6798_v45, %v5010_v46  ;;  %v5017_v59 = vor.u32 %v6801_v48, %v5016_v47  ;;  %v5042_v43 = vld [vmem:[%s9718_s0 + $0x1d0] sm:$0xf0]  ;;  %v5048_v45 = vld [vmem:[%s9718_s0 + $0x1c8] sm:$0xf]  ;;  %v6809_v46 = vld [vmem:[%s9718_s0 + $0x1d4] sm:$0xf0] }
  0xbb   :  { %v6807_v47 = vld [vmem:[%s9718_s0 + $0x1cc] sm:$0xf]  ;;  %v5050_v48 = vld [vmem:[%s9718_s0 + $0x1d8] sm:$0xf0] }
  0xbe   :  { %v2492_v60 = vpop.f32.mrf.mxu2  ;;  %v1837_v1 = vpop.f32.mrf.mxu0 }
  0xbf   :  { %v2821_v61 = vpop.f32.mrf.mxu3  ;;  %v2493_v0 = vadd.f32 %v2492_v60, %v2164_v50  ;;  %v2166_v2 = vpop.f32.mrf.mxu1  ;;  %v5018_v50 = vld [vmem:[%s9718_s0 + $0x198] sm:$0xf0] }
  0xc0   :  { %v2167_v5 = vadd.f32 %v2166_v2, %v1837_v1  ;;  %v5021_v60 = vor.u32 %v6799_v49, %v5018_v50  ;;  %v7044_v1 = vld [vmem:[%s9719_s3 + $0x30] sm:$0xff] }
  0xc1   :  { %v7596_v6 = vadd.f32 %v2821_v61, %v2493_v0  ;;  %1876 = vmatmul.bf16.gmra.mxu0 %v4977_v62  ;;  %v7068_v0 = vld [vmem:[%s9719_s3 + $0xf0] sm:$0xff]  ;;  %3486 = vmatpush.bf16.msrb.mxu1 %v7044_v1 }
  0xc2   :  { %2205 = vmatmul.bf16.gmra.mxu1 %v4981_v63  ;;  %v7052_v63 = vld [vmem:[%s9719_s3 + $0x70] sm:$0xff]  ;;  %3658 = vmatpush.bf16.msrb.mxu3 %v7068_v0 }
  0xc3   :  { %2534 = vmatmul.bf16.gmra.mxu2 %v4985_v3  ;;  %3418 = vmatpush.bf16.msrb.mxu0 %v7052_v63 }
  0xc4   :  { %2863 = vmatmul.bf16.gmra.mxu3 %v4989_v4 }
  0xc6   :  { %v2495_v7 = vpop.f32.mrf.mxu2  ;;  %v1839_v10 = vpop.f32.mrf.mxu0 }
  0xc7   :  { %v2824_v8 = vpop.f32.mrf.mxu3  ;;  %v2496_v9 = vadd.f32 %v2495_v7, %v2167_v5  ;;  %v2168_v11 = vpop.f32.mrf.mxu1 }
  0xc8   :  { %v2169_v12 = vadd.f32 %v2168_v11, %v1839_v10  ;;  %v5024_v10 = vld [vmem:[%s9718_s0 + $0x1a0] sm:$0xf]  ;;  %v6804_v11 = vld [vmem:[%s9718_s0 + $0x1ac] sm:$0xf0] }
  0xc9   :  { %v7598_v13 = vadd.f32 %v2824_v8, %v2496_v9  ;;  %v5025_v21 = vor.u32 %v6804_v11, %v5024_v10  ;;  %v5058_v10 = vld [vmem:[%s9718_s0 + $0x1f0] sm:$0xf0]  ;;  %v5064_v11 = vld [vmem:[%s9718_s0 + $0x1e8] sm:$0xf] }
  0xce   :  { %v2497_v22 = vpop.f32.mrf.mxu2  ;;  %v1842_v28 = vpop.f32.mrf.mxu0 }
  0xcf   :  { %v2826_v23 = vpop.f32.mrf.mxu3  ;;  %v2498_v27 = vadd.f32 %v2497_v22, %v2169_v12  ;;  %v2171_v29 = vpop.f32.mrf.mxu1  ;;  %v6802_v12 = vld [vmem:[%s9718_s0 + $0x1a4] sm:$0xf] }
  0xd0   :  { %v2172_v32 = vadd.f32 %v2171_v29, %v1842_v28  ;;  %v5029_v22 = vor.u32 %v6802_v12, %v5026_v14  ;;  %v5037_v28 = vor.u32 %v6803_v17, %v5034_v18  ;;  %v6813_v12 = vld [vmem:[%s9718_s0 + $0x1f4] sm:$0xf0]  ;;  %v6811_v14 = vld [vmem:[%s9718_s0 + $0x1ec] sm:$0xf] }
  0xd1   :  { %v7624_v33 = vadd.f32 %v2826_v23, %v2498_v27  ;;  %1881 = vmatmul.bf16.gmra.mxu0 %v4993_v24  ;;  %v5033_v27 = vor.u32 %v6805_v16, %v5032_v15  ;;  %v5066_v15 = vld [vmem:[%s9718_s0 + $0x1f8] sm:$0xf0] }
  0xd2   :  { %2210 = vmatmul.bf16.gmra.mxu1 %v4997_v26 }
  0xd3   :  { %2539 = vmatmul.bf16.gmra.mxu2 %v5001_v30 }
  0xd4   :  { %2868 = vmatmul.bf16.gmra.mxu3 %v5005_v31 }
  0xd6   :  { %v2500_v34 = vpop.f32.mrf.mxu2  ;;  %v1844_v37 = vpop.f32.mrf.mxu0 }
  0xd7   :  { %v2829_v35 = vpop.f32.mrf.mxu3  ;;  %v2501_v36 = vadd.f32 %v2500_v34, %v2172_v32  ;;  %v2173_v38 = vpop.f32.mrf.mxu1 }
  0xd8   :  { %v2174_v39 = vadd.f32 %v2173_v38, %v1844_v37 }
  0xd9   :  { %v7626_v40 = vadd.f32 %v2829_v35, %v2501_v36 }
  0xde   :  { %v2502_v52 = vpop.f32.mrf.mxu2  ;;  %v1847_v57 = vpop.f32.mrf.mxu0 }
  0xdf   :  { %v2831_v53 = vpop.f32.mrf.mxu3  ;;  %v2503_v56 = vadd.f32 %v2502_v52, %v2174_v39  ;;  %v2176_v58 = vpop.f32.mrf.mxu1  ;;  %v5040_v39 = vld [vmem:[%s9718_s0 + $0x1c0] sm:$0xf] }
  0xe0   :  { %v2177_v61 = vadd.f32 %v2176_v58, %v1847_v57  ;;  %v5041_v52 = vor.u32 %v6808_v41, %v5040_v39  ;;  %v5049_v57 = vor.u32 %v6809_v46, %v5048_v45  ;;  %v5053_v58 = vor.u32 %v6807_v47, %v5050_v48  ;;  %v6816_v39 = vld [vmem:[%s9718_s0 + $0x20c] sm:$0xf0]  ;;  %v6814_v41 = vld [vmem:[%s9718_s0 + $0x204] sm:$0xf]  ;;  %v6817_v45 = vld [vmem:[%s9718_s0 + $0x214] sm:$0xf0] }
  0xe1   :  { %v7655_v62 = vadd.f32 %v2831_v53, %v2503_v56  ;;  %1886 = vmatmul.bf16.gmra.mxu0 %v5009_v54  ;;  %v5045_v53 = vor.u32 %v6806_v42, %v5042_v43  ;;  %v5074_v42 = vld [vmem:[%s9718_s0 + $0x210] sm:$0xf0]  ;;  %v5080_v43 = vld [vmem:[%s9718_s0 + $0x208] sm:$0xf]  ;;  %v6815_v46 = vld [vmem:[%s9718_s0 + $0x20c] sm:$0xf] }
  0xe2   :  { %2215 = vmatmul.bf16.gmra.mxu1 %v5013_v55  ;;  %v5082_v47 = vld [vmem:[%s9718_s0 + $0x218] sm:$0xf0] }
  0xe3   :  { %2544 = vmatmul.bf16.gmra.mxu2 %v5017_v59 }
  0xe4   :  { %2873 = vmatmul.bf16.gmra.mxu3 %v5021_v60 }
  0xe6   :  { %v2505_v2 = vpop.f32.mrf.mxu2  ;;  %v1849_v5 = vpop.f32.mrf.mxu0 }
  0xe7   :  { %v2834_v3 = vpop.f32.mrf.mxu3  ;;  %v2506_v4 = vadd.f32 %v2505_v2, %v2177_v61  ;;  %v2178_v7 = vpop.f32.mrf.mxu1 }
  0xe8   :  { %v2179_v8 = vadd.f32 %v2178_v7, %v1849_v5  ;;  %v5056_v5 = vld [vmem:[%s9718_s0 + $0x1e0] sm:$0xf]  ;;  %v6812_v7 = vld [vmem:[%s9718_s0 + $0x1ec] sm:$0xf0] }
  0xe9   :  { %v7666_v9 = vadd.f32 %v2834_v3, %v2506_v4  ;;  %v5057_v18 = vor.u32 %v6812_v7, %v5056_v5  ;;  %v5088_v7 = vld [vmem:[%s9718_s0 + $0x220] sm:$0xf] }
  0xee   :  { %v2507_v19 = vpop.f32.mrf.mxu2  ;;  %v1852_v24 = vpop.f32.mrf.mxu0 }
  0xef   :  { %v2836_v20 = vpop.f32.mrf.mxu3  ;;  %v2508_v23 = vadd.f32 %v2507_v19, %v2179_v8  ;;  %v2181_v26 = vpop.f32.mrf.mxu1  ;;  %v6810_v8 = vld [vmem:[%s9718_s0 + $0x1e4] sm:$0xf] }
  0xf0   :  { %v2182_v29 = vadd.f32 %v2181_v26, %v1852_v24  ;;  %v5061_v19 = vor.u32 %v6810_v8, %v5058_v10  ;;  %v5069_v24 = vor.u32 %v6811_v14, %v5066_v15  ;;  %v6820_v8 = vld [vmem:[%s9718_s0 + $0x22c] sm:$0xf0]  ;;  %v6818_v10 = vld [vmem:[%s9718_s0 + $0x224] sm:$0xf]  ;;  %v6821_v14 = vld [vmem:[%s9718_s0 + $0x234] sm:$0xf0] }
  0xf1   :  { %v7692_v30 = vadd.f32 %v2836_v20, %v2508_v23  ;;  %1891 = vmatmul.bf16.gmra.mxu0 %v5025_v21  ;;  %v5065_v23 = vor.u32 %v6813_v12, %v5064_v11  ;;  %v5090_v11 = vld [vmem:[%s9718_s0 + $0x230] sm:$0xf0]  ;;  %v5096_v12 = vld [vmem:[%s9718_s0 + $0x228] sm:$0xf]  ;;  %v6819_v15 = vld [vmem:[%s9718_s0 + $0x22c] sm:$0xf] }
  0xf2   :  { %2220 = vmatmul.bf16.gmra.mxu1 %v5029_v22 }
  0xf3   :  { %2549 = vmatmul.bf16.gmra.mxu2 %v5033_v27 }
  0xf4   :  { %2878 = vmatmul.bf16.gmra.mxu3 %v5037_v28 }
  0xf6   :  { %v2510_v31 = vpop.f32.mrf.mxu2  ;;  %v1854_v35 = vpop.f32.mrf.mxu0 }
  0xf7   :  { %v2839_v32 = vpop.f32.mrf.mxu3  ;;  %v2511_v34 = vadd.f32 %v2510_v31, %v2182_v29  ;;  %v2183_v36 = vpop.f32.mrf.mxu1 }
  0xf8   :  { %v2184_v37 = vadd.f32 %v2183_v36, %v1854_v35 }
  0xf9   :  { %v7694_v38 = vadd.f32 %v2839_v32, %v2511_v34 }
  0xfb   :  { %9748 = vst [vmem:[#allocation2_spill] sm:$0xff] %v7694_v38 }
  0xfe   :  { %v2512_v49 = vpop.f32.mrf.mxu2  ;;  %v1857_v55 = vpop.f32.mrf.mxu0 }
  0xff   :  { %v2841_v50 = vpop.f32.mrf.mxu3  ;;  %v2513_v54 = vadd.f32 %v2512_v49, %v2184_v37  ;;  %v2186_v56 = vpop.f32.mrf.mxu1  ;;  %v5072_v37 = vld [vmem:[%s9718_s0 + $0x200] sm:$0xf] }
 0x100   :  { %v2187_v59 = vadd.f32 %v2186_v56, %v1857_v55  ;;  %v5081_v56 = vor.u32 %v6817_v45, %v5080_v43  ;;  %v6824_v43 = vld [vmem:[%s9718_s0 + $0x24c] sm:$0xf0]  ;;  %v6822_v45 = vld [vmem:[%s9718_s0 + $0x244] sm:$0xf] }
 0x101   :  { %v7720_v60 = vadd.f32 %v2841_v50, %v2513_v54  ;;  %1896 = vmatmul.bf16.gmra.mxu0 %v5041_v52  ;;  %v5073_v50 = vor.u32 %v6816_v39, %v5072_v37  ;;  %v5077_v52 = vor.u32 %v6814_v41, %v5074_v42  ;;  %v5104_v42 = vld [vmem:[%s9718_s0 + $0x240] sm:$0xf] }
 0x102   :  { %2225 = vmatmul.bf16.gmra.mxu1 %v5045_v53 }
 0x103   :  { %2554 = vmatmul.bf16.gmra.mxu2 %v5049_v57  ;;  %v5085_v57 = vor.u32 %v6815_v46, %v5082_v47  ;;  %v5106_v46 = vld [vmem:[%s9718_s0 + $0x250] sm:$0xf0]  ;;  %v5112_v47 = vld [vmem:[%s9718_s0 + $0x248] sm:$0xf] }
 0x104   :  { %2883 = vmatmul.bf16.gmra.mxu3 %v5053_v58 }
 0x106   :  { %v2515_v61 = vpop.f32.mrf.mxu2  ;;  %v1859_v1 = vpop.f32.mrf.mxu0 }
 0x107   :  { %v2844_v63 = vpop.f32.mrf.mxu3  ;;  %v2516_v0 = vadd.f32 %v2515_v61, %v2187_v59  ;;  %v2188_v2 = vpop.f32.mrf.mxu1 }
 0x108   :  { %v2189_v3 = vadd.f32 %v2188_v2, %v1859_v1 }
 0x109   :  { %v7722_v4 = vadd.f32 %v2844_v63, %v2516_v0 }
 0x10b   :  { %9749 = vst [vmem:[#allocation3_spill] sm:$0xff] %v7722_v4 }
 0x10e   :  { %v2517_v16 = vpop.f32.mrf.mxu2  ;;  %v1862_v21 = vpop.f32.mrf.mxu0 }
 0x10f   :  { %v2846_v17 = vpop.f32.mrf.mxu3  ;;  %v2518_v20 = vadd.f32 %v2517_v16, %v2189_v3  ;;  %v2191_v22 = vpop.f32.mrf.mxu1  ;;  %v5098_v16 = vld [vmem:[%s9718_s0 + $0x238] sm:$0xf0] }
 0x110   :  { %v2192_v26 = vadd.f32 %v2191_v22, %v1862_v21 }
 0x111   :  { %v7748_v27 = vadd.f32 %v2846_v17, %v2518_v20  ;;  %1901 = vmatmul.bf16.gmra.mxu0 %v5057_v18  ;;  %v5093_v20 = vor.u32 %v6818_v10, %v5090_v11 }
 0x112   :  { %2230 = vmatmul.bf16.gmra.mxu1 %v5061_v19  ;;  %v5089_v19 = vor.u32 %v6820_v8, %v5088_v7 }
 0x113   :  { %2559 = vmatmul.bf16.gmra.mxu2 %v5065_v23 }
 0x114   :  { %2888 = vmatmul.bf16.gmra.mxu3 %v5069_v24  ;;  %v5097_v24 = vor.u32 %v6821_v14, %v5096_v12  ;;  %v5120_v14 = vld [vmem:[%s9718_s0 + $0x260] sm:$0xf] }
 0x116   :  { %v2520_v28 = vpop.f32.mrf.mxu2  ;;  %v1864_v32 = vpop.f32.mrf.mxu0 }
 0x117   :  { %v2849_v29 = vpop.f32.mrf.mxu3  ;;  %v2521_v31 = vadd.f32 %v2520_v28, %v2192_v26  ;;  %v2193_v34 = vpop.f32.mrf.mxu1  ;;  %v5101_v26 = vor.u32 %v6819_v15, %v5098_v16  ;;  %v6828_v15 = vld [vmem:[%s9718_s0 + $0x26c] sm:$0xf0]  ;;  %v6826_v16 = vld [vmem:[%s9718_s0 + $0x264] sm:$0xf] }
 0x118   :  { %v2194_v35 = vadd.f32 %v2193_v34, %v1864_v32 }
 0x119   :  { %v7750_v36 = vadd.f32 %v2849_v29, %v2521_v31 }
 0x11b   :  { %9750 = vst [vmem:[#allocation4_spill] sm:$0xff] %v7750_v36 }
 0x11e   :  { %v2522_v48 = vpop.f32.mrf.mxu2  ;;  %v1867_v54 = vpop.f32.mrf.mxu0 }
 0x11f   :  { %v2851_v49 = vpop.f32.mrf.mxu3  ;;  %v2523_v53 = vadd.f32 %v2522_v48, %v2194_v35  ;;  %v2196_v55 = vpop.f32.mrf.mxu1  ;;  %v6825_v48 = vld [vmem:[%s9718_s0 + $0x254] sm:$0xf0] }
 0x120   :  { %v2197_v58 = vadd.f32 %v2196_v55, %v1867_v54  ;;  %v5105_v54 = vor.u32 %v6824_v43, %v5104_v42  ;;  %v5109_v55 = vor.u32 %v6822_v45, %v5106_v46 }
 0x121   :  { %v7776_v59 = vadd.f32 %v2851_v49, %v2523_v53  ;;  %1906 = vmatmul.bf16.gmra.mxu0 %v5073_v50  ;;  %v6823_v49 = vld [vmem:[%s9718_s0 + $0x24c] sm:$0xf]  ;;  %v5114_v50 = vld [vmem:[%s9718_s0 + $0x258] sm:$0xf0] }
 0x122   :  { %2235 = vmatmul.bf16.gmra.mxu1 %v5077_v52 }
 0x123   :  { %2564 = vmatmul.bf16.gmra.mxu2 %v5081_v56 }
 0x124   :  { %2893 = vmatmul.bf16.gmra.mxu3 %v5085_v57 }
 0x126   :  { %v2525_v61 = vpop.f32.mrf.mxu2  ;;  %v1869_v1 = vpop.f32.mrf.mxu0 }
 0x127   :  { %v2854_v63 = vpop.f32.mrf.mxu3  ;;  %v2526_v0 = vadd.f32 %v2525_v61, %v2197_v58  ;;  %v2198_v2 = vpop.f32.mrf.mxu1  ;;  %v5113_v61 = vor.u32 %v6825_v48, %v5112_v47 }
 0x128   :  { %v2199_v3 = vadd.f32 %v2198_v2, %v1869_v1 }
 0x129   :  { %v7778_v5 = vadd.f32 %v2854_v63, %v2526_v0  ;;  %v5117_v63 = vor.u32 %v6823_v49, %v5114_v50  ;;  %v7059_v50 = vld [vmem:[%s9719_s3 + $0xa8] sm:$0xff] }
 0x12a   :  { %3572 = vmatpush.bf16.msrb.mxu2 %v7059_v50 }
 0x12b   :  { %9751 = vst [vmem:[#allocation5_spill] sm:$0xff] %v7778_v5 }
 0x12e   :  { %v2527_v17 = vpop.f32.mrf.mxu2  ;;  %v1872_v22 = vpop.f32.mrf.mxu0 }
 0x12f   :  { %v2856_v18 = vpop.f32.mrf.mxu3  ;;  %v2528_v21 = vadd.f32 %v2527_v17, %v2199_v3  ;;  %v2201_v23 = vpop.f32.mrf.mxu1  ;;  %v5122_v17 = vld [vmem:[%s9718_s0 + $0x270] sm:$0xf0] }
 0x130   :  { %v2202_v28 = vadd.f32 %v2201_v23, %v1872_v22 }
 0x131   :  { %v7804_v29 = vadd.f32 %v2856_v18, %v2528_v21  ;;  %1911 = vmatmul.bf16.gmra.mxu0 %v5089_v19  ;;  %v5128_v18 = vld [vmem:[%s9718_s0 + $0x268] sm:$0xf]  ;;  %v6829_v19 = vld [vmem:[%s9718_s0 + $0x274] sm:$0xf0]  ;;  %v5130_v21 = vld [vmem:[%s9718_s0 + $0x278] sm:$0xf0] }
 0x132   :  { %2240 = vmatmul.bf16.gmra.mxu1 %v5093_v20  ;;  %v6827_v20 = vld [vmem:[%s9718_s0 + $0x26c] sm:$0xf] }
 0x133   :  { %2569 = vmatmul.bf16.gmra.mxu2 %v5097_v24  ;;  %v5121_v24 = vor.u32 %v6828_v15, %v5120_v14 }
 0x134   :  { %2898 = vmatmul.bf16.gmra.mxu3 %v5101_v26  ;;  %v5125_v26 = vor.u32 %v6826_v16, %v5122_v17  ;;  %v7051_v17 = vld [vmem:[%s9719_s3 + $0x68] sm:$0xff] }
 0x135   :  { %3419 = vmatpush.bf16.msrb.mxu0 %v7051_v17  ;;  %v5176_v17 = vld [vmem:[%s9718_s0 + $0x2c8] sm:$0xf] }
 0x136   :  { %v2530_v31 = vpop.f32.mrf.mxu2  ;;  %v1874_v35 = vpop.f32.mrf.mxu0 }
 0x137   :  { %v2859_v32 = vpop.f32.mrf.mxu3  ;;  %v2531_v34 = vadd.f32 %v2530_v31, %v2202_v28  ;;  %v2203_v37 = vpop.f32.mrf.mxu1 }
 0x138   :  { %v2204_v39 = vadd.f32 %v2203_v37, %v1874_v35  ;;  %v5133_v35 = vor.u32 %v6827_v20, %v5130_v21 }
 0x139   :  { %v7806_v41 = vadd.f32 %v2859_v32, %v2531_v34  ;;  %v5129_v34 = vor.u32 %v6829_v19, %v5128_v18  ;;  %v7067_v18 = vld [vmem:[%s9719_s3 + $0xe8] sm:$0xff] }
 0x13a   :  { %v7043_v19 = vld [vmem:[%s9719_s3 + $0x28] sm:$0xff]  ;;  %3659 = vmatpush.bf16.msrb.mxu3 %v7067_v18  ;;  %v6841_v18 = vld [vmem:[%s9718_s0 + $0x2d4] sm:$0xf0] }
 0x13b   :  { %9752 = vst [vmem:[#allocation6_spill] sm:$0xff] %v7806_v41  ;;  %3487 = vmatpush.bf16.msrb.mxu1 %v7043_v19  ;;  %v6839_v19 = vld [vmem:[%s9718_s0 + $0x2cc] sm:$0xf] }
 0x13e   :  { %v2532_v52 = vpop.f32.mrf.mxu2  ;;  %v1877_v57 = vpop.f32.mrf.mxu0 }
 0x13f   :  { %v2861_v53 = vpop.f32.mrf.mxu3  ;;  %v2533_v56 = vadd.f32 %v2532_v52, %v2204_v39  ;;  %v2206_v58 = vpop.f32.mrf.mxu1  ;;  %v5136_v52 = vld [vmem:[%s9718_s0 + $0x280] sm:$0xf] }
 0x140   :  { %v2207_v0 = vadd.f32 %v2206_v58, %v1877_v57  ;;  %v6833_v57 = vld [vmem:[%s9718_s0 + $0x294] sm:$0xf0]  ;;  %v6831_v58 = vld [vmem:[%s9718_s0 + $0x28c] sm:$0xf] }
 0x141   :  { %v7832_v1 = vadd.f32 %v2861_v53, %v2533_v56  ;;  %1916 = vmatmul.bf16.gmra.mxu0 %v5105_v54  ;;  %v6832_v53 = vld [vmem:[%s9718_s0 + $0x28c] sm:$0xf0]  ;;  %v6830_v54 = vld [vmem:[%s9718_s0 + $0x284] sm:$0xf]  ;;  %v5144_v56 = vld [vmem:[%s9718_s0 + $0x288] sm:$0xf] }
 0x142   :  { %2245 = vmatmul.bf16.gmra.mxu1 %v5109_v55  ;;  %v5138_v55 = vld [vmem:[%s9718_s0 + $0x290] sm:$0xf0] }
 0x143   :  { %2574 = vmatmul.bf16.gmra.mxu2 %v5113_v61  ;;  %v5146_v61 = vld [vmem:[%s9718_s0 + $0x298] sm:$0xf0] }
 0x144   :  { %2903 = vmatmul.bf16.gmra.mxu3 %v5117_v63  ;;  %v5149_v14 = vor.u32 %v6831_v58, %v5146_v61 }
 0x146   :  { %v2535_v2 = vpop.f32.mrf.mxu2  ;;  %v1879_v8 = vpop.f32.mrf.mxu0 }
 0x147   :  { %v2864_v3 = vpop.f32.mrf.mxu3  ;;  %v2536_v7 = vadd.f32 %v2535_v2, %v2207_v0  ;;  %v2208_v10 = vpop.f32.mrf.mxu1  ;;  %v5137_v2 = vor.u32 %v6832_v53, %v5136_v52 }
 0x148   :  { %v2209_v11 = vadd.f32 %v2208_v10, %v1879_v8 }
 0x149   :  { %v7834_v12 = vadd.f32 %v2864_v3, %v2536_v7  ;;  %v5141_v3 = vor.u32 %v6830_v54, %v5138_v55 }
 0x14b   :  { %9753 = vst [vmem:[#allocation7_spill] sm:$0xff] %v7834_v12 }
 0x14e   :  { %v2537_v22 = vpop.f32.mrf.mxu2  ;;  %v1882_v31 = vpop.f32.mrf.mxu0 }
 0x14f   :  { %v2866_v23 = vpop.f32.mrf.mxu3  ;;  %v2538_v28 = vadd.f32 %v2537_v22, %v2209_v11  ;;  %v2211_v32 = vpop.f32.mrf.mxu1  ;;  %v5145_v11 = vor.u32 %v6833_v57, %v5144_v56 }
 0x150   :  { %v2212_v37 = vadd.f32 %v2211_v32, %v1882_v31  ;;  %v5152_v31 = vld [vmem:[%s9718_s0 + $0x2a0] sm:$0xf]  ;;  %v6836_v32 = vld [vmem:[%s9718_s0 + $0x2ac] sm:$0xf0] }
 0x151   :  { %v7860_v39 = vadd.f32 %v2866_v23, %v2538_v28  ;;  %1921 = vmatmul.bf16.gmra.mxu0 %v5121_v24 }
 0x152   :  { %2250 = vmatmul.bf16.gmra.mxu1 %v5125_v26 }
 0x153   :  { %2579 = vmatmul.bf16.gmra.mxu2 %v5129_v34  ;;  %v6834_v34 = vld [vmem:[%s9718_s0 + $0x2a4] sm:$0xf] }
 0x154   :  { %2908 = vmatmul.bf16.gmra.mxu3 %v5133_v35  ;;  %v5154_v35 = vld [vmem:[%s9718_s0 + $0x2b0] sm:$0xf0] }
 0x155   :  { %v5157_v50 = vor.u32 %v6834_v34, %v5154_v35  ;;  %v5177_v34 = vor.u32 %v6841_v18, %v5176_v17 }
 0x156   :  { %v2540_v42 = vpop.f32.mrf.mxu2  ;;  %v1884_v46 = vpop.f32.mrf.mxu0 }
 0x157   :  { %v2869_v43 = vpop.f32.mrf.mxu3  ;;  %v2541_v45 = vadd.f32 %v2540_v42, %v2212_v37  ;;  %v2213_v47 = vpop.f32.mrf.mxu1  ;;  %v5160_v37 = vld [vmem:[%s9718_s0 + $0x2a8] sm:$0xf]  ;;  %v6837_v42 = vld [vmem:[%s9718_s0 + $0x2b4] sm:$0xf0] }
 0x158   :  { %v2214_v48 = vadd.f32 %v2213_v47, %v1884_v46  ;;  %v5161_v55 = vor.u32 %v6837_v42, %v5160_v37 }
 0x159   :  { %v7862_v49 = vadd.f32 %v2869_v43, %v2541_v45  ;;  %v6835_v43 = vld [vmem:[%s9718_s0 + $0x2ac] sm:$0xf]  ;;  %v5162_v45 = vld [vmem:[%s9718_s0 + $0x2b8] sm:$0xf0] }
 0x15a   :  { %v5165_v56 = vor.u32 %v6835_v43, %v5162_v45 }
 0x15e   :  { %v2542_v63 = vpop.f32.mrf.mxu2  ;;  %v1887_v8 = vpop.f32.mrf.mxu0 }
 0x15f   :  { %v2871_v0 = vpop.f32.mrf.mxu3  ;;  %v2543_v7 = vadd.f32 %v2542_v63, %v2214_v48  ;;  %v2216_v10 = vpop.f32.mrf.mxu1  ;;  %v5153_v48 = vor.u32 %v6836_v32, %v5152_v31 }
 0x160   :  { %v2217_v15 = vadd.f32 %v2216_v10, %v1887_v8  ;;  %v5168_v10 = vld [vmem:[%s9718_s0 + $0x2c0] sm:$0xf] }
 0x161   :  { %v7891_v16 = vadd.f32 %v2871_v0, %v2543_v7  ;;  %1926 = vmatmul.bf16.gmra.mxu0 %v5137_v2 }
 0x162   :  { %2255 = vmatmul.bf16.gmra.mxu1 %v5141_v3 }
 0x163   :  { %9754 = vst [vmem:[#allocation8_spill] sm:$0xff] %v7891_v16  ;;  %2584 = vmatmul.bf16.gmra.mxu2 %v5145_v11  ;;  %v6840_v11 = vld [vmem:[%s9718_s0 + $0x2cc] sm:$0xf0] }
 0x164   :  { %2913 = vmatmul.bf16.gmra.mxu3 %v5149_v14  ;;  %v6838_v14 = vld [vmem:[%s9718_s0 + $0x2c4] sm:$0xf] }
 0x166   :  { %v2545_v20 = vpop.f32.mrf.mxu2  ;;  %v1889_v23 = vpop.f32.mrf.mxu0 }
 0x167   :  { %v2874_v21 = vpop.f32.mrf.mxu3  ;;  %v2546_v22 = vadd.f32 %v2545_v20, %v2217_v15  ;;  %v2218_v24 = vpop.f32.mrf.mxu1  ;;  %v5170_v15 = vld [vmem:[%s9718_s0 + $0x2d0] sm:$0xf0]  ;;  %v5178_v20 = vld [vmem:[%s9718_s0 + $0x2d8] sm:$0xf0] }
 0x168   :  { %v2219_v26 = vadd.f32 %v2218_v24, %v1889_v23  ;;  %v5169_v23 = vor.u32 %v6840_v11, %v5168_v10  ;;  %v5173_v24 = vor.u32 %v6838_v14, %v5170_v15  ;;  %v5181_v35 = vor.u32 %v6839_v19, %v5178_v20 }
 0x169   :  { %v7902_v28 = vadd.f32 %v2874_v21, %v2546_v22 }
 0x16b   :  { %9755 = vst [vmem:[#allocation9_spill] sm:$0xff] %v7902_v28 }
 0x16e   :  { %v2547_v46 = vpop.f32.mrf.mxu2  ;;  %v1892_v53 = vpop.f32.mrf.mxu0 }
 0x16f   :  { %v2876_v47 = vpop.f32.mrf.mxu3  ;;  %v2548_v52 = vadd.f32 %v2547_v46, %v2219_v26  ;;  %v2221_v54 = vpop.f32.mrf.mxu1 }
 0x170   :  { %v2222_v57 = vadd.f32 %v2221_v54, %v1892_v53  ;;  %v5184_v53 = vld [vmem:[%s9718_s0 + $0x2e0] sm:$0xf]  ;;  %v6844_v54 = vld [vmem:[%s9718_s0 + $0x2ec] sm:$0xf0] }
 0x171   :  { %v7928_v58 = vadd.f32 %v2876_v47, %v2548_v52  ;;  %1931 = vmatmul.bf16.gmra.mxu0 %v5153_v48 }
 0x172   :  { %2260 = vmatmul.bf16.gmra.mxu1 %v5157_v50 }
 0x173   :  { %2589 = vmatmul.bf16.gmra.mxu2 %v5161_v55  ;;  %v6842_v55 = vld [vmem:[%s9718_s0 + $0x2e4] sm:$0xf] }
 0x174   :  { %2918 = vmatmul.bf16.gmra.mxu3 %v5165_v56  ;;  %v5186_v56 = vld [vmem:[%s9718_s0 + $0x2f0] sm:$0xf0] }
 0x175   :  { %v5189_v10 = vor.u32 %v6842_v55, %v5186_v56 }
 0x176   :  { %v2550_v61 = vpop.f32.mrf.mxu2  ;;  %v1894_v2 = vpop.f32.mrf.mxu0 }
 0x177   :  { %v2879_v63 = vpop.f32.mrf.mxu3  ;;  %v2551_v0 = vadd.f32 %v2550_v61, %v2222_v57  ;;  %v2223_v3 = vpop.f32.mrf.mxu1  ;;  %v5192_v57 = vld [vmem:[%s9718_s0 + $0x2e8] sm:$0xf]  ;;  %v6845_v61 = vld [vmem:[%s9718_s0 + $0x2f4] sm:$0xf0] }
 0x178   :  { %v2224_v7 = vadd.f32 %v2223_v3, %v1894_v2  ;;  %v5193_v17 = vor.u32 %v6845_v61, %v5192_v57 }
 0x179   :  { %v7930_v8 = vadd.f32 %v2879_v63, %v2551_v0  ;;  %v6843_v63 = vld [vmem:[%s9718_s0 + $0x2ec] sm:$0xf]  ;;  %v5194_v0 = vld [vmem:[%s9718_s0 + $0x2f8] sm:$0xf0] }
 0x17a   :  { %v5197_v18 = vor.u32 %v6843_v63, %v5194_v0 }
 0x17b   :  { %9756 = vst [vmem:[#allocation10_spill] sm:$0xff] %v7930_v8 }
 0x17e   :  { %v2552_v21 = vpop.f32.mrf.mxu2  ;;  %v1897_v31 = vpop.f32.mrf.mxu0 }
 0x17f   :  { %v2881_v22 = vpop.f32.mrf.mxu3  ;;  %v2553_v26 = vadd.f32 %v2552_v21, %v2224_v7  ;;  %v2226_v32 = vpop.f32.mrf.mxu1  ;;  %v5185_v7 = vor.u32 %v6844_v54, %v5184_v53 }
 0x180   :  { %v2227_v37 = vadd.f32 %v2226_v32, %v1897_v31 }
 0x181   :  { %v7956_v42 = vadd.f32 %v2881_v22, %v2553_v26  ;;  %1936 = vmatmul.bf16.gmra.mxu0 %v5169_v23 }
 0x182   :  { %2265 = vmatmul.bf16.gmra.mxu1 %v5173_v24 }
 0x183   :  { %2594 = vmatmul.bf16.gmra.mxu2 %v5177_v34  ;;  %v5200_v34 = vld [vmem:[%s9718_s0 + $0x300] sm:$0xf] }
 0x184   :  { %2923 = vmatmul.bf16.gmra.mxu3 %v5181_v35  ;;  %v6848_v35 = vld [vmem:[%s9718_s0 + $0x30c] sm:$0xf0] }
 0x185   :  { %v5201_v54 = vor.u32 %v6848_v35, %v5200_v34  ;;  %v6851_v34 = vld [vmem:[%s9718_s0 + $0x32c] sm:$0xf]  ;;  %v5226_v35 = vld [vmem:[%s9718_s0 + $0x338] sm:$0xf0] }
 0x186   :  { %v2555_v43 = vpop.f32.mrf.mxu2  ;;  %v1899_v47 = vpop.f32.mrf.mxu0 }
 0x187   :  { %v2884_v45 = vpop.f32.mrf.mxu3  ;;  %v2556_v46 = vadd.f32 %v2555_v43, %v2227_v37  ;;  %v2228_v48 = vpop.f32.mrf.mxu1  ;;  %v6846_v37 = vld [vmem:[%s9718_s0 + $0x304] sm:$0xf]  ;;  %v5202_v43 = vld [vmem:[%s9718_s0 + $0x310] sm:$0xf0] }
 0x188   :  { %v2229_v50 = vadd.f32 %v2228_v48, %v1899_v47  ;;  %v6847_v47 = vld [vmem:[%s9718_s0 + $0x30c] sm:$0xf]  ;;  %v5210_v48 = vld [vmem:[%s9718_s0 + $0x318] sm:$0xf0]  ;;  %v5205_v55 = vor.u32 %v6846_v37, %v5202_v43 }
 0x189   :  { %v7958_v52 = vadd.f32 %v2884_v45, %v2556_v46  ;;  %v5208_v45 = vld [vmem:[%s9718_s0 + $0x308] sm:$0xf]  ;;  %v6849_v46 = vld [vmem:[%s9718_s0 + $0x314] sm:$0xf0]  ;;  %v5213_v0 = vor.u32 %v6847_v47, %v5210_v48 }
 0x18a   :  { %v5209_v63 = vor.u32 %v6849_v46, %v5208_v45 }
 0x18b   :  { %9757 = vst [vmem:[#allocation11_spill] sm:$0xff] %v7958_v52 }
 0x18e   :  { %v2557_v2 = vpop.f32.mrf.mxu2  ;;  %v1902_v14 = vpop.f32.mrf.mxu0 }
 0x18f   :  { %v2886_v3 = vpop.f32.mrf.mxu3  ;;  %v2558_v11 = vadd.f32 %v2557_v2, %v2229_v50  ;;  %v2231_v15 = vpop.f32.mrf.mxu1 }
 0x190   :  { %v2232_v19 = vadd.f32 %v2231_v15, %v1902_v14 }
 0x191   :  { %v7984_v20 = vadd.f32 %v2886_v3, %v2558_v11  ;;  %1941 = vmatmul.bf16.gmra.mxu0 %v5185_v7 }
 0x192   :  { %2270 = vmatmul.bf16.gmra.mxu1 %v5189_v10 }
 0x193   :  { %2599 = vmatmul.bf16.gmra.mxu2 %v5193_v17 }
 0x194   :  { %2928 = vmatmul.bf16.gmra.mxu3 %v5197_v18 }
 0x196   :  { %v2560_v21 = vpop.f32.mrf.mxu2  ;;  %v1904_v24 = vpop.f32.mrf.mxu0 }
 0x197   :  { %v2889_v22 = vpop.f32.mrf.mxu3  ;;  %v2561_v23 = vadd.f32 %v2560_v21, %v2232_v19  ;;  %v2233_v26 = vpop.f32.mrf.mxu1  ;;  %v5216_v19 = vld [vmem:[%s9718_s0 + $0x320] sm:$0xf]  ;;  %v6852_v21 = vld [vmem:[%s9718_s0 + $0x32c] sm:$0xf0] }
 0x198   :  { %v2234_v31 = vadd.f32 %v2233_v26, %v1904_v24  ;;  %v5218_v24 = vld [vmem:[%s9718_s0 + $0x330] sm:$0xf0]  ;;  %v5224_v26 = vld [vmem:[%s9718_s0 + $0x328] sm:$0xf]  ;;  %v5217_v45 = vor.u32 %v6852_v21, %v5216_v19  ;;  %v6854_v19 = vld [vmem:[%s9718_s0 + $0x344] sm:$0xf] }
 0x199   :  { %v7986_v32 = vadd.f32 %v2889_v22, %v2561_v23  ;;  %v6850_v23 = vld [vmem:[%s9718_s0 + $0x324] sm:$0xf]  ;;  %v5234_v21 = vld [vmem:[%s9718_s0 + $0x350] sm:$0xf0] }
 0x19a   :  { %v5221_v46 = vor.u32 %v6850_v23, %v5218_v24  ;;  %v5240_v23 = vld [vmem:[%s9718_s0 + $0x348] sm:$0xf]  ;;  %v6857_v24 = vld [vmem:[%s9718_s0 + $0x354] sm:$0xf0] }
 0x19b   :  { %9758 = vst [vmem:[#allocation12_spill] sm:$0xff] %v7986_v32 }
 0x19e   :  { %v2562_v50 = vpop.f32.mrf.mxu2  ;;  %v1907_v57 = vpop.f32.mrf.mxu0 }
 0x19f   :  { %v2891_v53 = vpop.f32.mrf.mxu3  ;;  %v2563_v56 = vadd.f32 %v2562_v50, %v2234_v31  ;;  %v2236_v61 = vpop.f32.mrf.mxu1  ;;  %v6853_v31 = vld [vmem:[%s9718_s0 + $0x334] sm:$0xf0] }
 0x1a0   :  { %v2237_v2 = vadd.f32 %v2236_v61, %v1907_v57 }
 0x1a1   :  { %v8012_v3 = vadd.f32 %v2891_v53, %v2563_v56  ;;  %1946 = vmatmul.bf16.gmra.mxu0 %v5201_v54  ;;  %v5225_v53 = vor.u32 %v6853_v31, %v5224_v26  ;;  %v5229_v54 = vor.u32 %v6851_v34, %v5226_v35  ;;  %v6855_v26 = vld [vmem:[%s9718_s0 + $0x34c] sm:$0xf]  ;;  %v5242_v31 = vld [vmem:[%s9718_s0 + $0x358] sm:$0xf0] }
 0x1a2   :  { %2275 = vmatmul.bf16.gmra.mxu1 %v5205_v55 }
 0x1a3   :  { %2604 = vmatmul.bf16.gmra.mxu2 %v5209_v63 }
 0x1a4   :  { %2933 = vmatmul.bf16.gmra.mxu3 %v5213_v0 }
 0x1a6   :  { %v2565_v7 = vpop.f32.mrf.mxu2  ;;  %v1909_v14 = vpop.f32.mrf.mxu0 }
 0x1a7   :  { %v2894_v10 = vpop.f32.mrf.mxu3  ;;  %v2566_v11 = vadd.f32 %v2565_v7, %v2237_v2  ;;  %v2238_v15 = vpop.f32.mrf.mxu1 }
 0x1a8   :  { %v2239_v17 = vadd.f32 %v2238_v15, %v1909_v14  ;;  %v5232_v14 = vld [vmem:[%s9718_s0 + $0x340] sm:$0xf]  ;;  %v6856_v15 = vld [vmem:[%s9718_s0 + $0x34c] sm:$0xf0] }
 0x1a9   :  { %v8014_v18 = vadd.f32 %v2894_v10, %v2566_v11 }
 0x1ae   :  { %v2567_v37 = vpop.f32.mrf.mxu2  ;;  %v1912_v48 = vpop.f32.mrf.mxu0 }
 0x1af   :  { %v2896_v43 = vpop.f32.mrf.mxu3  ;;  %v2568_v47 = vadd.f32 %v2567_v37, %v2239_v17  ;;  %v2241_v50 = vpop.f32.mrf.mxu1  ;;  %v5233_v37 = vor.u32 %v6856_v15, %v5232_v14  ;;  %v5248_v15 = vld [vmem:[%s9718_s0 + $0x360] sm:$0xf] }
 0x1b0   :  { %v2242_v55 = vadd.f32 %v2241_v50, %v1912_v48  ;;  %v5241_v48 = vor.u32 %v6857_v24, %v5240_v23  ;;  %v5245_v50 = vor.u32 %v6855_v26, %v5242_v31  ;;  %v6858_v23 = vld [vmem:[%s9718_s0 + $0x364] sm:$0xf]  ;;  %v5250_v24 = vld [vmem:[%s9718_s0 + $0x370] sm:$0xf0]  ;;  %v5256_v26 = vld [vmem:[%s9718_s0 + $0x368] sm:$0xf] }
 0x1b1   :  { %v8042_v56 = vadd.f32 %v2896_v43, %v2568_v47  ;;  %1951 = vmatmul.bf16.gmra.mxu0 %v5217_v45  ;;  %v5237_v43 = vor.u32 %v6854_v19, %v5234_v21  ;;  %v6860_v19 = vld [vmem:[%s9718_s0 + $0x36c] sm:$0xf0]  ;;  %v6861_v31 = vld [vmem:[%s9718_s0 + $0x374] sm:$0xf0] }
 0x1b2   :  { %2280 = vmatmul.bf16.gmra.mxu1 %v5221_v46 }
 0x1b3   :  { %2609 = vmatmul.bf16.gmra.mxu2 %v5225_v53 }
 0x1b4   :  { %2938 = vmatmul.bf16.gmra.mxu3 %v5229_v54 }
 0x1b6   :  { %v2570_v61 = vpop.f32.mrf.mxu2  ;;  %v1914_v2 = vpop.f32.mrf.mxu0 }
 0x1b7   :  { %v2899_v63 = vpop.f32.mrf.mxu3  ;;  %v2571_v0 = vadd.f32 %v2570_v61, %v2242_v55  ;;  %v2243_v7 = vpop.f32.mrf.mxu1 }
 0x1b8   :  { %v2244_v10 = vadd.f32 %v2243_v7, %v1914_v2 }
 0x1b9   :  { %v8046_v11 = vadd.f32 %v2899_v63, %v2571_v0 }
 0x1be   :  { %v2572_v34 = vpop.f32.mrf.mxu2  ;;  %v1917_v46 = vpop.f32.mrf.mxu0 }
 0x1bf   :  { %v2901_v35 = vpop.f32.mrf.mxu3  ;;  %v2573_v45 = vadd.f32 %v2572_v34, %v2244_v10  ;;  %v2246_v47 = vpop.f32.mrf.mxu1  ;;  %v6859_v34 = vld [vmem:[%s9718_s0 + $0x36c] sm:$0xf] }
 0x1c0   :  { %v2247_v53 = vadd.f32 %v2246_v47, %v1917_v46  ;;  %v5253_v46 = vor.u32 %v6858_v23, %v5250_v24  ;;  %v5264_v24 = vld [vmem:[%s9718_s0 + $0x380] sm:$0xf] }
 0x1c1   :  { %v8074_v54 = vadd.f32 %v2901_v35, %v2573_v45  ;;  %1956 = vmatmul.bf16.gmra.mxu0 %v5233_v37  ;;  %v5258_v35 = vld [vmem:[%s9718_s0 + $0x378] sm:$0xf0]  ;;  %v5249_v45 = vor.u32 %v6860_v19, %v5248_v15 }
 0x1c2   :  { %2285 = vmatmul.bf16.gmra.mxu1 %v5237_v43 }
 0x1c3   :  { %2614 = vmatmul.bf16.gmra.mxu2 %v5241_v48 }
 0x1c4   :  { %2943 = vmatmul.bf16.gmra.mxu3 %v5245_v50 }
 0x1c6   :  { %v2575_v61 = vpop.f32.mrf.mxu2  ;;  %v1919_v2 = vpop.f32.mrf.mxu0 }
 0x1c7   :  { %v2904_v63 = vpop.f32.mrf.mxu3  ;;  %v2576_v0 = vadd.f32 %v2575_v61, %v2247_v53  ;;  %v2248_v7 = vpop.f32.mrf.mxu1  ;;  %v5257_v53 = vor.u32 %v6861_v31, %v5256_v26  ;;  %v5261_v61 = vor.u32 %v6859_v34, %v5258_v35  ;;  %v6864_v26 = vld [vmem:[%s9718_s0 + $0x38c] sm:$0xf0]  ;;  %v6862_v31 = vld [vmem:[%s9718_s0 + $0x384] sm:$0xf] }
 0x1c8   :  { %v2249_v10 = vadd.f32 %v2248_v7, %v1919_v2  ;;  %v7058_v35 = vld [vmem:[%s9719_s3 + $0xa0] sm:$0xff] }
 0x1c9   :  { %v8078_v14 = vadd.f32 %v2904_v63, %v2576_v0  ;;  %3573 = vmatpush.bf16.msrb.mxu2 %v7058_v35 }
 0x1ce   :  { %v2577_v37 = vpop.f32.mrf.mxu2  ;;  %v1922_v48 = vpop.f32.mrf.mxu0 }
 0x1cf   :  { %v2906_v43 = vpop.f32.mrf.mxu3  ;;  %v2578_v47 = vadd.f32 %v2577_v37, %v2249_v10  ;;  %v2251_v50 = vpop.f32.mrf.mxu1  ;;  %v6865_v37 = vld [vmem:[%s9718_s0 + $0x394] sm:$0xf0] }
 0x1d0   :  { %v2252_v63 = vadd.f32 %v2251_v50, %v1922_v48  ;;  %v5265_v48 = vor.u32 %v6864_v26, %v5264_v24  ;;  %v7050_v24 = vld [vmem:[%s9719_s3 + $0x60] sm:$0xff] }
 0x1d1   :  { %v8106_v0 = vadd.f32 %v2906_v43, %v2578_v47  ;;  %1961 = vmatmul.bf16.gmra.mxu0 %v5249_v45  ;;  %v6863_v43 = vld [vmem:[%s9718_s0 + $0x38c] sm:$0xf]  ;;  %v5274_v45 = vld [vmem:[%s9718_s0 + $0x398] sm:$0xf0]  ;;  %v7042_v26 = vld [vmem:[%s9719_s3 + $0x20] sm:$0xff] }
 0x1d2   :  { %2290 = vmatmul.bf16.gmra.mxu1 %v5253_v46  ;;  %3420 = vmatpush.bf16.msrb.mxu0 %v7050_v24 }
 0x1d3   :  { %2619 = vmatmul.bf16.gmra.mxu2 %v5257_v53  ;;  %3488 = vmatpush.bf16.msrb.mxu1 %v7042_v26 }
 0x1d4   :  { %2948 = vmatmul.bf16.gmra.mxu3 %v5261_v61 }
 0x1d6   :  { %v2580_v7 = vpop.f32.mrf.mxu2  ;;  %v1924_v15 = vpop.f32.mrf.mxu0 }
 0x1d7   :  { %v2909_v21 = vpop.f32.mrf.mxu3  ;;  %v2581_v55 = vadd.f32 %v2580_v7, %v2252_v63  ;;  %v2253_v19 = vpop.f32.mrf.mxu1 }
 0x1d8   :  { %v2254_v10 = vadd.f32 %v2253_v19, %v1924_v15  ;;  %v5277_v15 = vor.u32 %v6863_v43, %v5274_v45 }
 0x1d9   :  { %v8110_v23 = vadd.f32 %v2909_v21, %v2581_v55  ;;  %v5266_v55 = vld [vmem:[%s9718_s0 + $0x390] sm:$0xf0]  ;;  %v5272_v21 = vld [vmem:[%s9718_s0 + $0x388] sm:$0xf] }
 0x1da   :  { %v5269_v50 = vor.u32 %v6862_v31, %v5266_v55  ;;  %v5273_v7 = vor.u32 %v6865_v37, %v5272_v21 }
 0x1de   :  { %v2582_v46 = vpop.f32.mrf.mxu2  ;;  %v1927_v61 = vpop.f32.mrf.mxu0 }
 0x1df   :  { %v2911_v47 = vpop.f32.mrf.mxu3  ;;  %v2583_v53 = vadd.f32 %v2582_v46, %v2254_v10  ;;  %v2256_v63 = vpop.f32.mrf.mxu1  ;;  %v7066_v10 = vld [vmem:[%s9719_s3 + $0xe0] sm:$0xff] }
 0x1e0   :  { %v2257_v19 = vadd.f32 %v2256_v63, %v1927_v61  ;;  %3660 = vmatpush.bf16.msrb.mxu3 %v7066_v10  ;;  %v5280_v46 = vld [vmem:[%s9718_s0 + $0x3a0] sm:$0xf]  ;;  %v5288_v61 = vld [vmem:[%s9718_s0 + $0x3a8] sm:$0xf]  ;;  %v6869_v63 = vld [vmem:[%s9718_s0 + $0x3b4] sm:$0xf0] }
 0x1e1   :  { %v8141_v34 = vadd.f32 %v2911_v47, %v2583_v53  ;;  %1966 = vmatmul.bf16.gmra.mxu0 %v5265_v48  ;;  %v6868_v47 = vld [vmem:[%s9718_s0 + $0x3ac] sm:$0xf0]  ;;  %v5282_v53 = vld [vmem:[%s9718_s0 + $0x3b0] sm:$0xf0] }
 0x1e2   :  { %2295 = vmatmul.bf16.gmra.mxu1 %v5269_v50  ;;  %v6866_v50 = vld [vmem:[%s9718_s0 + $0x3a4] sm:$0xf]  ;;  %v5281_v10 = vor.u32 %v6868_v47, %v5280_v46 }
 0x1e3   :  { %2624 = vmatmul.bf16.gmra.mxu2 %v5273_v7  ;;  %v6867_v7 = vld [vmem:[%s9718_s0 + $0x3ac] sm:$0xf]  ;;  %v5285_v26 = vor.u32 %v6866_v50, %v5282_v53  ;;  %v5296_v53 = vld [vmem:[%s9718_s0 + $0x3c0] sm:$0xf] }
 0x1e4   :  { %2953 = vmatmul.bf16.gmra.mxu3 %v5277_v15  ;;  %v5290_v15 = vld [vmem:[%s9718_s0 + $0x3b8] sm:$0xf0] }
 0x1e6   :  { %v2585_v31 = vpop.f32.mrf.mxu2  ;;  %v1929_v35 = vpop.f32.mrf.mxu0 }
 0x1e7   :  { %v2914_v55 = vpop.f32.mrf.mxu3  ;;  %v2586_v21 = vadd.f32 %v2585_v31, %v2257_v19  ;;  %v2258_v37 = vpop.f32.mrf.mxu1 }
 0x1e8   :  { %v2259_v43 = vadd.f32 %v2258_v37, %v1929_v35  ;;  %v5289_v35 = vor.u32 %v6869_v63, %v5288_v61  ;;  %v5293_v37 = vor.u32 %v6867_v7, %v5290_v15  ;;  %v6872_v61 = vld [vmem:[%s9718_s0 + $0x3cc] sm:$0xf0]  ;;  %v6871_v7 = vld [vmem:[%s9718_s0 + $0x3cc] sm:$0xf]  ;;  %v5306_v15 = vld [vmem:[%s9718_s0 + $0x3d8] sm:$0xf0] }
 0x1e9   :  { %v8154_v45 = vadd.f32 %v2914_v55, %v2586_v21 }
 0x1eb   :  { %9759 = vst [vmem:[#allocation13_spill] sm:$0xff] %v8154_v45 }
 0x1ee   :  { %v2587_v19 = vpop.f32.mrf.mxu2  ;;  %v1932_v55 = vpop.f32.mrf.mxu0 }
 0x1ef   :  { %v2916_v24 = vpop.f32.mrf.mxu3  ;;  %v2588_v31 = vadd.f32 %v2587_v19, %v2259_v43  ;;  %v2261_v21 = vpop.f32.mrf.mxu1 }
 0x1f0   :  { %v2262_v48 = vadd.f32 %v2261_v21, %v1932_v55 }
 0x1f1   :  { %v8182_v2 = vadd.f32 %v2916_v24, %v2588_v31  ;;  %1971 = vmatmul.bf16.gmra.mxu0 %v5281_v10  ;;  %v5297_v10 = vor.u32 %v6872_v61, %v5296_v53 }
 0x1f2   :  { %2300 = vmatmul.bf16.gmra.mxu1 %v5285_v26 }
 0x1f3   :  { %2629 = vmatmul.bf16.gmra.mxu2 %v5289_v35 }
 0x1f4   :  { %2958 = vmatmul.bf16.gmra.mxu3 %v5293_v37  ;;  %v5309_v37 = vor.u32 %v6871_v7, %v5306_v15  ;;  %v6877_v7 = vld [vmem:[%s9718_s0 + $0x3f4] sm:$0xf0]  ;;  %v6875_v15 = vld [vmem:[%s9718_s0 + $0x3ec] sm:$0xf] }
 0x1f6   :  { %v2590_v57 = vpop.f32.mrf.mxu2  ;;  %v1934_v46 = vpop.f32.mrf.mxu0 }
 0x1f7   :  { %v2919_v22 = vpop.f32.mrf.mxu3  ;;  %v2591_v45 = vadd.f32 %v2590_v57, %v2262_v48  ;;  %v2263_v47 = vpop.f32.mrf.mxu1  ;;  %v6870_v57 = vld [vmem:[%s9718_s0 + $0x3c4] sm:$0xf]  ;;  %v6873_v48 = vld [vmem:[%s9718_s0 + $0x3d4] sm:$0xf0] }
 0x1f8   :  { %v2264_v43 = vadd.f32 %v2263_v47, %v1934_v46 }
 0x1f9   :  { %v8186_v50 = vadd.f32 %v2919_v22, %v2591_v45  ;;  %v5298_v22 = vld [vmem:[%s9718_s0 + $0x3d0] sm:$0xf0]  ;;  %v5304_v45 = vld [vmem:[%s9718_s0 + $0x3c8] sm:$0xf] }
 0x1fa   :  { %v5301_v26 = vor.u32 %v6870_v57, %v5298_v22  ;;  %v5305_v35 = vor.u32 %v6873_v48, %v5304_v45  ;;  %v5312_v22 = vld [vmem:[%s9718_s0 + $0x3e0] sm:$0xf]  ;;  %v6876_v45 = vld [vmem:[%s9718_s0 + $0x3ec] sm:$0xf0] }
 0x1fb   :  { %9760 = vst [vmem:[#allocation14_spill] sm:$0xff] %v8186_v50 }
 0x1fe   :  { %v2592_v19 = vpop.f32.mrf.mxu2  ;;  %v1937_v55 = vpop.f32.mrf.mxu0 }
 0x1ff   :  { %v2921_v24 = vpop.f32.mrf.mxu3  ;;  %v2593_v31 = vadd.f32 %v2592_v19, %v2264_v43  ;;  %v2266_v21 = vpop.f32.mrf.mxu1  ;;  %v5322_v19 = vld [vmem:[%s9718_s0 + $0x3f8] sm:$0xf0] }
 0x200   :  { %v2267_v46 = vadd.f32 %v2266_v21, %v1937_v55 }
 0x201   :  { %v8214_v47 = vadd.f32 %v2921_v24, %v2593_v31  ;;  %1976 = vmatmul.bf16.gmra.mxu0 %v5297_v10 }
 0x202   :  { %2305 = vmatmul.bf16.gmra.mxu1 %v5301_v26  ;;  %v5313_v26 = vor.u32 %v6876_v45, %v5312_v22 }
 0x203   :  { %2634 = vmatmul.bf16.gmra.mxu2 %v5305_v35 }
 0x204   :  { %2963 = vmatmul.bf16.gmra.mxu3 %v5309_v37 }
 0x206   :  { %v2595_v17 = vpop.f32.mrf.mxu2  ;;  %v1939_v53 = vpop.f32.mrf.mxu0 }
 0x207   :  { %v2924_v50 = vpop.f32.mrf.mxu3  ;;  %v2596_v38 = vadd.f32 %v2595_v17, %v2267_v46  ;;  %v2268_v61 = vpop.f32.mrf.mxu1  ;;  %v6874_v17 = vld [vmem:[%s9718_s0 + $0x3e4] sm:$0xf]  ;;  %v5325_v46 = vor.u32 %v6875_v15, %v5322_v19  ;;  %v6881_v15 = vld [vmem:[%s9718_s0 + $0x414] sm:$0xf0]  ;;  %v6879_v19 = vld [vmem:[%s9718_s0 + $0x40c] sm:$0xf] }
 0x208   :  { %v2269_v43 = vadd.f32 %v2268_v61, %v1939_v53 }
 0x209   :  { %v8218_v57 = vadd.f32 %v2924_v50, %v2596_v38  ;;  %v5314_v38 = vld [vmem:[%s9718_s0 + $0x3f0] sm:$0xf0]  ;;  %v5320_v50 = vld [vmem:[%s9718_s0 + $0x3e8] sm:$0xf] }
 0x20a   :  { %v5317_v31 = vor.u32 %v6874_v17, %v5314_v38  ;;  %v5321_v37 = vor.u32 %v6877_v7, %v5320_v50  ;;  %v5328_v38 = vld [vmem:[%s9718_s0 + $0x400] sm:$0xf]  ;;  %v6880_v50 = vld [vmem:[%s9718_s0 + $0x40c] sm:$0xf0] }
 0x20b   :  { %9761 = vst [vmem:[#allocation15_spill] sm:$0xff] %v8218_v57 }
 0x20e   :  { %v2597_v24 = vpop.f32.mrf.mxu2  ;;  %v1942_v21 = vpop.f32.mrf.mxu0 }
 0x20f   :  { %v2926_v10 = vpop.f32.mrf.mxu3  ;;  %v2598_v55 = vadd.f32 %v2597_v24, %v2269_v43  ;;  %v2271_v35 = vpop.f32.mrf.mxu1  ;;  %v5338_v24 = vld [vmem:[%s9718_s0 + $0x418] sm:$0xf0] }
 0x210   :  { %v2272_v53 = vadd.f32 %v2271_v35, %v1942_v21 }
 0x211   :  { %v8246_v61 = vadd.f32 %v2926_v10, %v2598_v55  ;;  %1981 = vmatmul.bf16.gmra.mxu0 %v5313_v26 }
 0x212   :  { %2310 = vmatmul.bf16.gmra.mxu1 %v5317_v31  ;;  %v5329_v31 = vor.u32 %v6880_v50, %v5328_v38 }
 0x213   :  { %2639 = vmatmul.bf16.gmra.mxu2 %v5321_v37 }
 0x214   :  { %2968 = vmatmul.bf16.gmra.mxu3 %v5325_v46 }
 0x216   :  { %v2600_v63 = vpop.f32.mrf.mxu2  ;;  %v1944_v22 = vpop.f32.mrf.mxu0 }
 0x217   :  { %v2929_v57 = vpop.f32.mrf.mxu3  ;;  %v2601_v4 = vadd.f32 %v2600_v63, %v2272_v53  ;;  %v2273_v45 = vpop.f32.mrf.mxu1  ;;  %v6878_v63 = vld [vmem:[%s9718_s0 + $0x404] sm:$0xf]  ;;  %v5341_v53 = vor.u32 %v6879_v19, %v5338_v24  ;;  %v6885_v19 = vld [vmem:[%s9718_s0 + $0x434] sm:$0xf0]  ;;  %v6883_v24 = vld [vmem:[%s9718_s0 + $0x42c] sm:$0xf] }
 0x218   :  { %v2274_v43 = vadd.f32 %v2273_v45, %v1944_v22 }
 0x219   :  { %v8250_v17 = vadd.f32 %v2929_v57, %v2601_v4  ;;  %v5330_v4 = vld [vmem:[%s9718_s0 + $0x410] sm:$0xf0]  ;;  %v5336_v57 = vld [vmem:[%s9718_s0 + $0x408] sm:$0xf] }
 0x21a   :  { %v5333_v55 = vor.u32 %v6878_v63, %v5330_v4  ;;  %v5337_v46 = vor.u32 %v6881_v15, %v5336_v57  ;;  %v5344_v4 = vld [vmem:[%s9718_s0 + $0x420] sm:$0xf]  ;;  %v6884_v57 = vld [vmem:[%s9718_s0 + $0x42c] sm:$0xf0] }
 0x21b   :  { %9762 = vst [vmem:[#allocation16_spill] sm:$0xff] %v8250_v17 }
 0x21e   :  { %v2602_v10 = vpop.f32.mrf.mxu2  ;;  %v1947_v35 = vpop.f32.mrf.mxu0 }
 0x21f   :  { %v2931_v26 = vpop.f32.mrf.mxu3  ;;  %v2603_v21 = vadd.f32 %v2602_v10, %v2274_v43  ;;  %v2276_v37 = vpop.f32.mrf.mxu1  ;;  %v5354_v10 = vld [vmem:[%s9718_s0 + $0x438] sm:$0xf0] }
 0x220   :  { %v2277_v22 = vadd.f32 %v2276_v37, %v1947_v35 }
 0x221   :  { %v8278_v45 = vadd.f32 %v2931_v26, %v2603_v21  ;;  %1986 = vmatmul.bf16.gmra.mxu0 %v5329_v31 }
 0x222   :  { %2315 = vmatmul.bf16.gmra.mxu1 %v5333_v55  ;;  %v5345_v55 = vor.u32 %v6884_v57, %v5344_v4 }
 0x223   :  { %2644 = vmatmul.bf16.gmra.mxu2 %v5337_v46 }
 0x224   :  { %2973 = vmatmul.bf16.gmra.mxu3 %v5341_v53 }
 0x226   :  { %v2605_v48 = vpop.f32.mrf.mxu2  ;;  %v1949_v38 = vpop.f32.mrf.mxu0 }
 0x227   :  { %v2934_v17 = vpop.f32.mrf.mxu3  ;;  %v2606_v36 = vadd.f32 %v2605_v48, %v2277_v22  ;;  %v2278_v50 = vpop.f32.mrf.mxu1  ;;  %v6882_v48 = vld [vmem:[%s9718_s0 + $0x424] sm:$0xf]  ;;  %v5357_v22 = vor.u32 %v6883_v24, %v5354_v10  ;;  %v6889_v24 = vld [vmem:[%s9718_s0 + $0x454] sm:$0xf0]  ;;  %v6887_v10 = vld [vmem:[%s9718_s0 + $0x44c] sm:$0xf] }
 0x228   :  { %v2279_v43 = vadd.f32 %v2278_v50, %v1949_v38 }
 0x229   :  { %v8282_v63 = vadd.f32 %v2934_v17, %v2606_v36  ;;  %v5346_v36 = vld [vmem:[%s9718_s0 + $0x430] sm:$0xf0]  ;;  %v5352_v17 = vld [vmem:[%s9718_s0 + $0x428] sm:$0xf] }
 0x22a   :  { %v5349_v21 = vor.u32 %v6882_v48, %v5346_v36  ;;  %v5353_v53 = vor.u32 %v6885_v19, %v5352_v17  ;;  %v5360_v36 = vld [vmem:[%s9718_s0 + $0x440] sm:$0xf]  ;;  %v6888_v17 = vld [vmem:[%s9718_s0 + $0x44c] sm:$0xf0] }
 0x22b   :  { %9763 = vst [vmem:[#allocation17_spill] sm:$0xff] %v8282_v63 }
 0x22e   :  { %v2607_v26 = vpop.f32.mrf.mxu2  ;;  %v1952_v37 = vpop.f32.mrf.mxu0 }
 0x22f   :  { %v2936_v31 = vpop.f32.mrf.mxu3  ;;  %v2608_v35 = vadd.f32 %v2607_v26, %v2279_v43  ;;  %v2281_v46 = vpop.f32.mrf.mxu1  ;;  %v5370_v26 = vld [vmem:[%s9718_s0 + $0x458] sm:$0xf0] }
 0x230   :  { %v2282_v38 = vadd.f32 %v2281_v46, %v1952_v37 }
 0x231   :  { %v8310_v50 = vadd.f32 %v2936_v31, %v2608_v35  ;;  %1991 = vmatmul.bf16.gmra.mxu0 %v5345_v55 }
 0x232   :  { %2320 = vmatmul.bf16.gmra.mxu1 %v5349_v21  ;;  %v5361_v21 = vor.u32 %v6888_v17, %v5360_v36 }
 0x233   :  { %2649 = vmatmul.bf16.gmra.mxu2 %v5353_v53 }
 0x234   :  { %2978 = vmatmul.bf16.gmra.mxu3 %v5357_v22 }
 0x236   :  { %v2610_v7 = vpop.f32.mrf.mxu2  ;;  %v1954_v4 = vpop.f32.mrf.mxu0 }
 0x237   :  { %v2939_v63 = vpop.f32.mrf.mxu3  ;;  %v2611_v5 = vadd.f32 %v2610_v7, %v2282_v38  ;;  %v2283_v57 = vpop.f32.mrf.mxu1  ;;  %v6886_v7 = vld [vmem:[%s9718_s0 + $0x444] sm:$0xf]  ;;  %v5373_v38 = vor.u32 %v6887_v10, %v5370_v26  ;;  %v6893_v10 = vld [vmem:[%s9718_s0 + $0x474] sm:$0xf0]  ;;  %v6891_v26 = vld [vmem:[%s9718_s0 + $0x46c] sm:$0xf] }
 0x238   :  { %v2284_v43 = vadd.f32 %v2283_v57, %v1954_v4 }
 0x239   :  { %v8314_v48 = vadd.f32 %v2939_v63, %v2611_v5  ;;  %v5362_v5 = vld [vmem:[%s9718_s0 + $0x450] sm:$0xf0]  ;;  %v5368_v63 = vld [vmem:[%s9718_s0 + $0x448] sm:$0xf] }
 0x23a   :  { %v5365_v35 = vor.u32 %v6886_v7, %v5362_v5  ;;  %v5369_v22 = vor.u32 %v6889_v24, %v5368_v63  ;;  %v5376_v5 = vld [vmem:[%s9718_s0 + $0x460] sm:$0xf]  ;;  %v6892_v63 = vld [vmem:[%s9718_s0 + $0x46c] sm:$0xf0] }
 0x23b   :  { %9764 = vst [vmem:[#allocation18_spill] sm:$0xff] %v8314_v48 }
 0x23e   :  { %v2612_v31 = vpop.f32.mrf.mxu2  ;;  %v1957_v46 = vpop.f32.mrf.mxu0 }
 0x23f   :  { %v2941_v55 = vpop.f32.mrf.mxu3  ;;  %v2613_v37 = vadd.f32 %v2612_v31, %v2284_v43  ;;  %v2286_v53 = vpop.f32.mrf.mxu1  ;;  %v5386_v31 = vld [vmem:[%s9718_s0 + $0x478] sm:$0xf0] }
 0x240   :  { %v2287_v4 = vadd.f32 %v2286_v53, %v1957_v46 }
 0x241   :  { %v8342_v57 = vadd.f32 %v2941_v55, %v2613_v37  ;;  %1996 = vmatmul.bf16.gmra.mxu0 %v5361_v21 }
 0x242   :  { %2325 = vmatmul.bf16.gmra.mxu1 %v5365_v35  ;;  %v5377_v35 = vor.u32 %v6892_v63, %v5376_v5 }
 0x243   :  { %2654 = vmatmul.bf16.gmra.mxu2 %v5369_v22 }
 0x244   :  { %2983 = vmatmul.bf16.gmra.mxu3 %v5373_v38 }
 0x246   :  { %v2615_v15 = vpop.f32.mrf.mxu2  ;;  %v1959_v36 = vpop.f32.mrf.mxu0 }
 0x247   :  { %v2944_v48 = vpop.f32.mrf.mxu3  ;;  %v2616_v41 = vadd.f32 %v2615_v15, %v2287_v4  ;;  %v2288_v17 = vpop.f32.mrf.mxu1  ;;  %v6890_v15 = vld [vmem:[%s9718_s0 + $0x464] sm:$0xf]  ;;  %v5389_v4 = vor.u32 %v6891_v26, %v5386_v31  ;;  %v7057_v26 = vld [vmem:[%s9719_s3 + $0x98] sm:$0xff] }
 0x248   :  { %v2289_v43 = vadd.f32 %v2288_v17, %v1959_v36  ;;  %v6897_v31 = vld [vmem:[%s9718_s0 + $0x494] sm:$0xf0]  ;;  %3574 = vmatpush.bf16.msrb.mxu2 %v7057_v26 }
 0x249   :  { %v8346_v7 = vadd.f32 %v2944_v48, %v2616_v41  ;;  %v5378_v41 = vld [vmem:[%s9718_s0 + $0x470] sm:$0xf0]  ;;  %v5384_v48 = vld [vmem:[%s9718_s0 + $0x468] sm:$0xf] }
 0x24a   :  { %v5381_v37 = vor.u32 %v6890_v15, %v5378_v41  ;;  %v5385_v38 = vor.u32 %v6893_v10, %v5384_v48  ;;  %v5392_v41 = vld [vmem:[%s9718_s0 + $0x480] sm:$0xf]  ;;  %v6896_v48 = vld [vmem:[%s9718_s0 + $0x48c] sm:$0xf0]  ;;  %v6894_v10 = vld [vmem:[%s9718_s0 + $0x484] sm:$0xf] }
 0x24b   :  { %9765 = vst [vmem:[#allocation19_spill] sm:$0xff] %v8346_v7 }
 0x24e   :  { %v2617_v55 = vpop.f32.mrf.mxu2  ;;  %v1962_v53 = vpop.f32.mrf.mxu0 }
 0x24f   :  { %v2946_v21 = vpop.f32.mrf.mxu3  ;;  %v2618_v46 = vadd.f32 %v2617_v55, %v2289_v43  ;;  %v2291_v22 = vpop.f32.mrf.mxu1  ;;  %v6895_v55 = vld [vmem:[%s9718_s0 + $0x48c] sm:$0xf] }
 0x250   :  { %v2292_v36 = vadd.f32 %v2291_v22, %v1962_v53 }
 0x251   :  { %v8374_v17 = vadd.f32 %v2946_v21, %v2618_v46  ;;  %2001 = vmatmul.bf16.gmra.mxu0 %v5377_v35  ;;  %v5402_v21 = vld [vmem:[%s9718_s0 + $0x498] sm:$0xf0]  ;;  %v5393_v46 = vor.u32 %v6896_v48, %v5392_v41 }
 0x252   :  { %2330 = vmatmul.bf16.gmra.mxu1 %v5381_v37  ;;  %v7049_v41 = vld [vmem:[%s9719_s3 + $0x58] sm:$0xff] }
 0x253   :  { %2659 = vmatmul.bf16.gmra.mxu2 %v5385_v38  ;;  %v7041_v48 = vld [vmem:[%s9719_s3 + $0x18] sm:$0xff]  ;;  %3421 = vmatpush.bf16.msrb.mxu0 %v7049_v41 }
 0x254   :  { %2988 = vmatmul.bf16.gmra.mxu3 %v5389_v4  ;;  %3489 = vmatpush.bf16.msrb.mxu1 %v7041_v48 }
 0x256   :  { %v2620_v19 = vpop.f32.mrf.mxu2  ;;  %v1964_v5 = vpop.f32.mrf.mxu0 }
 0x257   :  { %v2949_v7 = vpop.f32.mrf.mxu3  ;;  %v2621_v12 = vadd.f32 %v2620_v19, %v2292_v36  ;;  %v2293_v63 = vpop.f32.mrf.mxu1 }
 0x258   :  { %v2294_v43 = vadd.f32 %v2293_v63, %v1964_v5  ;;  %v5405_v5 = vor.u32 %v6895_v55, %v5402_v21 }
 0x259   :  { %v8378_v15 = vadd.f32 %v2949_v7, %v2621_v12  ;;  %v5394_v12 = vld [vmem:[%s9718_s0 + $0x490] sm:$0xf0]  ;;  %v5400_v7 = vld [vmem:[%s9718_s0 + $0x488] sm:$0xf] }
 0x25a   :  { %v5397_v53 = vor.u32 %v6894_v10, %v5394_v12  ;;  %v5401_v36 = vor.u32 %v6897_v31, %v5400_v7 }
 0x25e   :  { %v2622_v35 = vpop.f32.mrf.mxu2  ;;  %v1967_v38 = vpop.f32.mrf.mxu0 }
 0x25f   :  { %v2951_v37 = vpop.f32.mrf.mxu3  ;;  %v2623_v22 = vadd.f32 %v2622_v35, %v2294_v43  ;;  %v2296_v4 = vpop.f32.mrf.mxu1  ;;  %v7065_v43 = vld [vmem:[%s9719_s3 + $0xd8] sm:$0xff]  ;;  %v5408_v35 = vld [vmem:[%s9718_s0 + $0x4a0] sm:$0xf] }
 0x260   :  { %v2297_v63 = vadd.f32 %v2296_v4, %v1967_v38  ;;  %3661 = vmatpush.bf16.msrb.mxu3 %v7065_v43  ;;  %v5416_v38 = vld [vmem:[%s9718_s0 + $0x4a8] sm:$0xf]  ;;  %v6901_v4 = vld [vmem:[%s9718_s0 + $0x4b4] sm:$0xf0] }
 0x261   :  { %v8409_v19 = vadd.f32 %v2951_v37, %v2623_v22  ;;  %2006 = vmatmul.bf16.gmra.mxu0 %v5393_v46  ;;  %v6900_v37 = vld [vmem:[%s9718_s0 + $0x4ac] sm:$0xf0]  ;;  %v5410_v22 = vld [vmem:[%s9718_s0 + $0x4b0] sm:$0xf0] }
 0x262   :  { %2335 = vmatmul.bf16.gmra.mxu1 %v5397_v53  ;;  %v6898_v53 = vld [vmem:[%s9718_s0 + $0x4a4] sm:$0xf]  ;;  %v5409_v43 = vor.u32 %v6900_v37, %v5408_v35 }
 0x263   :  { %9766 = vst [vmem:[#allocation20_spill] sm:$0xff] %v8409_v19  ;;  %2664 = vmatmul.bf16.gmra.mxu2 %v5401_v36  ;;  %v6899_v36 = vld [vmem:[%s9718_s0 + $0x4ac] sm:$0xf]  ;;  %v5413_v48 = vor.u32 %v6898_v53, %v5410_v22  ;;  %v5424_v22 = vld [vmem:[%s9718_s0 + $0x4c0] sm:$0xf] }
 0x264   :  { %2993 = vmatmul.bf16.gmra.mxu3 %v5405_v5  ;;  %v5418_v5 = vld [vmem:[%s9718_s0 + $0x4b8] sm:$0xf0] }
 0x266   :  { %v2625_v10 = vpop.f32.mrf.mxu2  ;;  %v1969_v26 = vpop.f32.mrf.mxu0 }
 0x267   :  { %v2954_v12 = vpop.f32.mrf.mxu3  ;;  %v2626_v7 = vadd.f32 %v2625_v10, %v2297_v63  ;;  %v2298_v31 = vpop.f32.mrf.mxu1 }
 0x268   :  { %v2299_v55 = vadd.f32 %v2298_v31, %v1969_v26  ;;  %v5417_v26 = vor.u32 %v6901_v4, %v5416_v38  ;;  %v5421_v31 = vor.u32 %v6899_v36, %v5418_v5  ;;  %v6904_v38 = vld [vmem:[%s9718_s0 + $0x4cc] sm:$0xf0]  ;;  %v6903_v36 = vld [vmem:[%s9718_s0 + $0x4cc] sm:$0xf]  ;;  %v5434_v5 = vld [vmem:[%s9718_s0 + $0x4d8] sm:$0xf0] }
 0x269   :  { %v8422_v21 = vadd.f32 %v2954_v12, %v2626_v7 }
 0x26b   :  { %9767 = vst [vmem:[#allocation21_spill] sm:$0xff] %v8422_v21 }
 0x26e   :  { %v2627_v63 = vpop.f32.mrf.mxu2  ;;  %v1972_v12 = vpop.f32.mrf.mxu0 }
 0x26f   :  { %v2956_v41 = vpop.f32.mrf.mxu3  ;;  %v2628_v10 = vadd.f32 %v2627_v63, %v2299_v55  ;;  %v2301_v7 = vpop.f32.mrf.mxu1 }
 0x270   :  { %v2302_v46 = vadd.f32 %v2301_v7, %v1972_v12 }
 0x271   :  { %v8450_v24 = vadd.f32 %v2956_v41, %v2628_v10  ;;  %2011 = vmatmul.bf16.gmra.mxu0 %v5409_v43  ;;  %v5425_v43 = vor.u32 %v6904_v38, %v5424_v22 }
 0x272   :  { %2340 = vmatmul.bf16.gmra.mxu1 %v5413_v48 }
 0x273   :  { %2669 = vmatmul.bf16.gmra.mxu2 %v5417_v26 }
 0x274   :  { %2998 = vmatmul.bf16.gmra.mxu3 %v5421_v31  ;;  %v5437_v31 = vor.u32 %v6903_v36, %v5434_v5  ;;  %v6909_v36 = vld [vmem:[%s9718_s0 + $0x4f4] sm:$0xf0]  ;;  %v6907_v5 = vld [vmem:[%s9718_s0 + $0x4ec] sm:$0xf] }
 0x276   :  { %v2630_v28 = vpop.f32.mrf.mxu2  ;;  %v1974_v35 = vpop.f32.mrf.mxu0 }
 0x277   :  { %v2959_v19 = vpop.f32.mrf.mxu3  ;;  %v2631_v16 = vadd.f32 %v2630_v28, %v2302_v46  ;;  %v2303_v37 = vpop.f32.mrf.mxu1  ;;  %v6902_v28 = vld [vmem:[%s9718_s0 + $0x4c4] sm:$0xf]  ;;  %v6905_v46 = vld [vmem:[%s9718_s0 + $0x4d4] sm:$0xf0] }
 0x278   :  { %v2304_v55 = vadd.f32 %v2303_v37, %v1974_v35 }
 0x279   :  { %v8454_v53 = vadd.f32 %v2959_v19, %v2631_v16  ;;  %v5426_v16 = vld [vmem:[%s9718_s0 + $0x4d0] sm:$0xf0]  ;;  %v5432_v19 = vld [vmem:[%s9718_s0 + $0x4c8] sm:$0xf] }
 0x27a   :  { %v5429_v48 = vor.u32 %v6902_v28, %v5426_v16  ;;  %v5433_v26 = vor.u32 %v6905_v46, %v5432_v19  ;;  %v5440_v16 = vld [vmem:[%s9718_s0 + $0x4e0] sm:$0xf]  ;;  %v6908_v19 = vld [vmem:[%s9718_s0 + $0x4ec] sm:$0xf0] }
 0x27b   :  { %9768 = vst [vmem:[#allocation22_spill] sm:$0xff] %v8454_v53 }
 0x27e   :  { %v2632_v63 = vpop.f32.mrf.mxu2  ;;  %v1977_v12 = vpop.f32.mrf.mxu0 }
 0x27f   :  { %v2961_v41 = vpop.f32.mrf.mxu3  ;;  %v2633_v10 = vadd.f32 %v2632_v63, %v2304_v55  ;;  %v2306_v7 = vpop.f32.mrf.mxu1  ;;  %v5450_v63 = vld [vmem:[%s9718_s0 + $0x4f8] sm:$0xf0] }
 0x280   :  { %v2307_v35 = vadd.f32 %v2306_v7, %v1977_v12 }
 0x281   :  { %v8482_v37 = vadd.f32 %v2961_v41, %v2633_v10  ;;  %2016 = vmatmul.bf16.gmra.mxu0 %v5425_v43 }
 0x282   :  { %2345 = vmatmul.bf16.gmra.mxu1 %v5429_v48  ;;  %v5441_v48 = vor.u32 %v6908_v19, %v5440_v16 }
 0x283   :  { %2674 = vmatmul.bf16.gmra.mxu2 %v5433_v26 }
 0x284   :  { %3003 = vmatmul.bf16.gmra.mxu3 %v5437_v31 }
 0x286   :  { %v2635_v21 = vpop.f32.mrf.mxu2  ;;  %v1979_v22 = vpop.f32.mrf.mxu0 }
 0x287   :  { %v2964_v53 = vpop.f32.mrf.mxu3  ;;  %v2636_v8 = vadd.f32 %v2635_v21, %v2307_v35  ;;  %v2308_v38 = vpop.f32.mrf.mxu1  ;;  %v6906_v21 = vld [vmem:[%s9718_s0 + $0x4e4] sm:$0xf]  ;;  %v5453_v35 = vor.u32 %v6907_v5, %v5450_v63  ;;  %v6913_v5 = vld [vmem:[%s9718_s0 + $0x514] sm:$0xf0]  ;;  %v6911_v63 = vld [vmem:[%s9718_s0 + $0x50c] sm:$0xf] }
 0x288   :  { %v2309_v55 = vadd.f32 %v2308_v38, %v1979_v22 }
 0x289   :  { %v8486_v28 = vadd.f32 %v2964_v53, %v2636_v8  ;;  %v5442_v8 = vld [vmem:[%s9718_s0 + $0x4f0] sm:$0xf0]  ;;  %v5448_v53 = vld [vmem:[%s9718_s0 + $0x4e8] sm:$0xf] }
 0x28a   :  { %v5445_v10 = vor.u32 %v6906_v21, %v5442_v8  ;;  %v5449_v31 = vor.u32 %v6909_v36, %v5448_v53  ;;  %v5456_v8 = vld [vmem:[%s9718_s0 + $0x500] sm:$0xf]  ;;  %v6912_v53 = vld [vmem:[%s9718_s0 + $0x50c] sm:$0xf0] }
 0x28b   :  { %9769 = vst [vmem:[#allocation23_spill] sm:$0xff] %v8486_v28 }
 0x28e   :  { %v2637_v41 = vpop.f32.mrf.mxu2  ;;  %v1982_v7 = vpop.f32.mrf.mxu0 }
 0x28f   :  { %v2966_v43 = vpop.f32.mrf.mxu3  ;;  %v2638_v12 = vadd.f32 %v2637_v41, %v2309_v55  ;;  %v2311_v26 = vpop.f32.mrf.mxu1  ;;  %v5466_v41 = vld [vmem:[%s9718_s0 + $0x518] sm:$0xf0] }
 0x290   :  { %v2312_v22 = vadd.f32 %v2311_v26, %v1982_v7 }
 0x291   :  { %v8514_v38 = vadd.f32 %v2966_v43, %v2638_v12  ;;  %2021 = vmatmul.bf16.gmra.mxu0 %v5441_v48 }
 0x292   :  { %2350 = vmatmul.bf16.gmra.mxu1 %v5445_v10  ;;  %v5457_v10 = vor.u32 %v6912_v53, %v5456_v8 }
 0x293   :  { %2679 = vmatmul.bf16.gmra.mxu2 %v5449_v31 }
 0x294   :  { %3008 = vmatmul.bf16.gmra.mxu3 %v5453_v35 }
 0x296   :  { %v2640_v4 = vpop.f32.mrf.mxu2  ;;  %v1984_v16 = vpop.f32.mrf.mxu0 }
 0x297   :  { %v2969_v28 = vpop.f32.mrf.mxu3  ;;  %v2641_v52 = vadd.f32 %v2640_v4, %v2312_v22  ;;  %v2313_v19 = vpop.f32.mrf.mxu1  ;;  %v6910_v4 = vld [vmem:[%s9718_s0 + $0x504] sm:$0xf]  ;;  %v5469_v22 = vor.u32 %v6911_v63, %v5466_v41  ;;  %v6917_v41 = vld [vmem:[%s9718_s0 + $0x534] sm:$0xf0] }
 0x298   :  { %v2314_v55 = vadd.f32 %v2313_v19, %v1984_v16 }
 0x299   :  { %v8518_v21 = vadd.f32 %v2969_v28, %v2641_v52  ;;  %v5458_v52 = vld [vmem:[%s9718_s0 + $0x510] sm:$0xf0]  ;;  %v5464_v28 = vld [vmem:[%s9718_s0 + $0x508] sm:$0xf] }
 0x29a   :  { %v5461_v12 = vor.u32 %v6910_v4, %v5458_v52  ;;  %v5465_v35 = vor.u32 %v6913_v5, %v5464_v28  ;;  %v5472_v52 = vld [vmem:[%s9718_s0 + $0x520] sm:$0xf]  ;;  %v6916_v28 = vld [vmem:[%s9718_s0 + $0x52c] sm:$0xf0]  ;;  %v9771_v5 = vmax.f32 %v7542_v25, %v8014_v18  ;;  %v6915_v25 = vld [vmem:[%s9718_s0 + $0x52c] sm:$0xf] }
 0x29b   :  { %9770 = vst [vmem:[#allocation24_spill] sm:$0xff] %v8518_v21  ;;  %v5482_v18 = vld [vmem:[%s9718_s0 + $0x538] sm:$0xf0] }
 0x29e   :  { %v2642_v43 = vpop.f32.mrf.mxu2  ;;  %v1987_v26 = vpop.f32.mrf.mxu0 }
 0x29f   :  { %v2971_v48 = vpop.f32.mrf.mxu3  ;;  %v2643_v7 = vadd.f32 %v2642_v43, %v2314_v55  ;;  %v2316_v31 = vpop.f32.mrf.mxu1 }
 0x2a0   :  { %v2317_v16 = vadd.f32 %v2316_v31, %v1987_v26 }
 0x2a1   :  { %v8546_v19 = vadd.f32 %v2971_v48, %v2643_v7  ;;  %2026 = vmatmul.bf16.gmra.mxu0 %v5457_v10  ;;  %v5473_v10 = vor.u32 %v6916_v28, %v5472_v52 }
 0x2a2   :  { %2355 = vmatmul.bf16.gmra.mxu1 %v5461_v12 }
 0x2a3   :  { %2684 = vmatmul.bf16.gmra.mxu2 %v5465_v35 }
 0x2a4   :  { %3013 = vmatmul.bf16.gmra.mxu3 %v5469_v22  ;;  %v5485_v22 = vor.u32 %v6915_v25, %v5482_v18  ;;  %v6918_v25 = vld [vmem:[%s9718_s0 + $0x544] sm:$0xf]  ;;  %v5496_v18 = vld [vmem:[%s9718_s0 + $0x548] sm:$0xf] }
 0x2a6   :  { %v2645_v46 = vpop.f32.mrf.mxu2  ;;  %v1989_v8 = vpop.f32.mrf.mxu0 }
 0x2a7   :  { %v2974_v21 = vpop.f32.mrf.mxu3  ;;  %v2646_v32 = vadd.f32 %v2645_v46, %v2317_v16  ;;  %v2318_v53 = vpop.f32.mrf.mxu1  ;;  %v6914_v46 = vld [vmem:[%s9718_s0 + $0x524] sm:$0xf] }
 0x2a8   :  { %v2319_v55 = vadd.f32 %v2318_v53, %v1989_v8  ;;  %v9772_v53 = vmax.f32 %v7568_v44, %v8042_v56  ;;  %v9773_v44 = vmax.f32 %v7570_v51, %v8046_v11  ;;  %v6919_v51 = vld [vmem:[%s9718_s0 + $0x54c] sm:$0xf]  ;;  %v5498_v11 = vld [vmem:[%s9718_s0 + $0x558] sm:$0xf0] }
 0x2a9   :  { %v2975_v4 = vadd.f32 %v2974_v21, %v2646_v32  ;;  %v5474_v32 = vld [vmem:[%s9718_s0 + $0x530] sm:$0xf0]  ;;  %v5480_v21 = vld [vmem:[%s9718_s0 + $0x528] sm:$0xf] }
 0x2aa   :  { %v5477_v12 = vor.u32 %v6914_v46, %v5474_v32  ;;  %v5481_v35 = vor.u32 %v6917_v41, %v5480_v21  ;;  %v5488_v21 = vld [vmem:[%s9718_s0 + $0x540] sm:$0xf]  ;;  %v6920_v41 = vld [vmem:[%s9718_s0 + $0x54c] sm:$0xf0] }
 0x2ab   :  { %v8559_v63 = vmax.f32 %v9771_v5, %v2975_v4 }
 0x2ae   :  { %v2647_v43 = vpop.f32.mrf.mxu2  ;;  %v1992_v26 = vpop.f32.mrf.mxu0 }
 0x2af   :  { %v2976_v48 = vpop.f32.mrf.mxu3  ;;  %v2648_v7 = vadd.f32 %v2647_v43, %v2319_v55  ;;  %v2321_v31 = vpop.f32.mrf.mxu1  ;;  %v6921_v43 = vld [vmem:[%s9718_s0 + $0x554] sm:$0xf0] }
 0x2b0   :  { %v2322_v16 = vadd.f32 %v2321_v31, %v1992_v26 }
 0x2b1   :  { %v2977_v8 = vadd.f32 %v2976_v48, %v2648_v7  ;;  %2031 = vmatmul.bf16.gmra.mxu0 %v5473_v10 }
 0x2b2   :  { %2360 = vmatmul.bf16.gmra.mxu1 %v5477_v12  ;;  %v5489_v12 = vor.u32 %v6920_v41, %v5488_v21 }
 0x2b3   :  { %v8582_v4 = vmax.f32 %v9772_v53, %v2977_v8  ;;  %2689 = vmatmul.bf16.gmra.mxu2 %v5481_v35 }
 0x2b4   :  { %3018 = vmatmul.bf16.gmra.mxu3 %v5485_v22  ;;  %v5497_v22 = vor.u32 %v6921_v43, %v5496_v18  ;;  %v6922_v18 = vld [vmem:[%s9718_s0 + $0x564] sm:$0xf]  ;;  %v5506_v43 = vld [vmem:[%s9718_s0 + $0x570] sm:$0xf0] }
 0x2b6   :  { %v2650_v5 = vpop.f32.mrf.mxu2  ;;  %v1994_v28 = vpop.f32.mrf.mxu0 }
 0x2b7   :  { %v2979_v36 = vpop.f32.mrf.mxu3  ;;  %v2651_v52 = vadd.f32 %v2650_v5, %v2322_v16  ;;  %v2323_v55 = vpop.f32.mrf.mxu1  ;;  %v5501_v16 = vor.u32 %v6919_v51, %v5498_v11  ;;  %v9774_v5 = vmax.f32 %v7596_v6, %v8074_v54  ;;  %v9775_v6 = vmax.f32 %v7598_v13, %v8078_v14  ;;  %v5512_v51 = vld [vmem:[%s9718_s0 + $0x568] sm:$0xf]  ;;  %v6925_v11 = vld [vmem:[%s9718_s0 + $0x574] sm:$0xf0]  ;;  %v6923_v13 = vld [vmem:[%s9718_s0 + $0x56c] sm:$0xf] }
 0x2b8   :  { %v2324_v46 = vadd.f32 %v2323_v55, %v1994_v28  ;;  %v5514_v14 = vld [vmem:[%s9718_s0 + $0x578] sm:$0xf0] }
 0x2b9   :  { %v2980_v32 = vadd.f32 %v2979_v36, %v2651_v52  ;;  %v5490_v36 = vld [vmem:[%s9718_s0 + $0x550] sm:$0xf0] }
 0x2ba   :  { %v5493_v7 = vor.u32 %v6918_v25, %v5490_v36  ;;  %v5504_v25 = vld [vmem:[%s9718_s0 + $0x560] sm:$0xf]  ;;  %v6924_v36 = vld [vmem:[%s9718_s0 + $0x56c] sm:$0xf0] }
 0x2bb   :  { %v8593_v56 = vmax.f32 %v9773_v44, %v2980_v32 }
 0x2be   :  { %v2652_v48 = vpop.f32.mrf.mxu2  ;;  %v1997_v31 = vpop.f32.mrf.mxu0 }
 0x2bf   :  { %v2981_v10 = vpop.f32.mrf.mxu3  ;;  %v2653_v26 = vadd.f32 %v2652_v48, %v2324_v46  ;;  %v2326_v35 = vpop.f32.mrf.mxu1 }
 0x2c0   :  { %v2327_v8 = vadd.f32 %v2326_v35, %v1997_v31 }
 0x2c1   :  { %v2982_v53 = vadd.f32 %v2981_v10, %v2653_v26  ;;  %2036 = vmatmul.bf16.gmra.mxu0 %v5489_v12  ;;  %v5505_v12 = vor.u32 %v6924_v36, %v5504_v25  ;;  %v5520_v36 = vld [vmem:[%s9718_s0 + $0x580] sm:$0xf] }
 0x2c2   :  { %2365 = vmatmul.bf16.gmra.mxu1 %v5493_v7  ;;  %v5509_v7 = vor.u32 %v6922_v18, %v5506_v43  ;;  %v5522_v43 = vld [vmem:[%s9718_s0 + $0x590] sm:$0xf0] }
 0x2c3   :  { %v8616_v52 = vmax.f32 %v9774_v5, %v2982_v53  ;;  %2694 = vmatmul.bf16.gmra.mxu2 %v5497_v22  ;;  %v5513_v22 = vor.u32 %v6925_v11, %v5512_v51  ;;  %v9776_v5 = vmax.f32 %v7624_v33, %v8106_v0  ;;  %v6926_v33 = vld [vmem:[%s9718_s0 + $0x584] sm:$0xf]  ;;  %v9777_v0 = vmax.f32 %v7626_v40, %v8110_v23  ;;  %v5528_v51 = vld [vmem:[%s9718_s0 + $0x588] sm:$0xf]  ;;  %v7056_v11 = vld [vmem:[%s9719_s3 + $0x90] sm:$0xff] }
 0x2c4   :  { %3023 = vmatmul.bf16.gmra.mxu3 %v5501_v16  ;;  %v5517_v16 = vor.u32 %v6923_v13, %v5514_v14  ;;  %v6929_v13 = vld [vmem:[%s9718_s0 + $0x594] sm:$0xf0]  ;;  %v6927_v40 = vld [vmem:[%s9718_s0 + $0x58c] sm:$0xf]  ;;  %v5530_v23 = vld [vmem:[%s9718_s0 + $0x598] sm:$0xf0]  ;;  %3575 = vmatpush.bf16.msrb.mxu2 %v7056_v11 }
 0x2c5   :  { %v6930_v11 = vld [vmem:[%s9718_s0 + $0x5a4] sm:$0xf] }
 0x2c6   :  { %v2655_v28 = vpop.f32.mrf.mxu2  ;;  %v1999_v21 = vpop.f32.mrf.mxu0 }
 0x2c7   :  { %v2984_v55 = vpop.f32.mrf.mxu3  ;;  %v2656_v32 = vadd.f32 %v2655_v28, %v2327_v8  ;;  %v2328_v46 = vpop.f32.mrf.mxu1 }
 0x2c8   :  { %v2329_v41 = vadd.f32 %v2328_v46, %v1999_v21 }
 0x2c9   :  { %v2985_v44 = vadd.f32 %v2984_v55, %v2656_v32 }
 0x2cb   :  { %v8627_v54 = vmax.f32 %v9775_v6, %v2985_v44  ;;  %v6928_v6 = vld [vmem:[%s9718_s0 + $0x58c] sm:$0xf0] }
 0x2ce   :  { %v2657_v48 = vpop.f32.mrf.mxu2  ;;  %v2002_v31 = vpop.f32.mrf.mxu0 }
 0x2cf   :  { %v2986_v10 = vpop.f32.mrf.mxu3  ;;  %v2658_v26 = vadd.f32 %v2657_v48, %v2329_v41  ;;  %v2331_v35 = vpop.f32.mrf.mxu1 }
 0x2d0   :  { %v2332_v8 = vadd.f32 %v2331_v35, %v2002_v31  ;;  %v5529_v35 = vor.u32 %v6929_v13, %v5528_v51  ;;  %v5538_v13 = vld [vmem:[%s9718_s0 + $0x5b0] sm:$0xf0] }
 0x2d1   :  { %v2987_v53 = vadd.f32 %v2986_v10, %v2658_v26  ;;  %2041 = vmatmul.bf16.gmra.mxu0 %v5505_v12  ;;  %v5521_v10 = vor.u32 %v6928_v6, %v5520_v36  ;;  %v5525_v12 = vor.u32 %v6926_v33, %v5522_v43  ;;  %v5536_v6 = vld [vmem:[%s9718_s0 + $0x5a0] sm:$0xf]  ;;  %v6932_v33 = vld [vmem:[%s9718_s0 + $0x5ac] sm:$0xf0] }
 0x2d2   :  { %2370 = vmatmul.bf16.gmra.mxu1 %v5509_v7 }
 0x2d3   :  { %v8650_v28 = vmax.f32 %v9776_v5, %v2987_v53  ;;  %2699 = vmatmul.bf16.gmra.mxu2 %v5513_v22  ;;  %v5533_v22 = vor.u32 %v6927_v40, %v5530_v23  ;;  %v9778_v53 = vmax.f32 %v7655_v62, %v8141_v34  ;;  %v5544_v40 = vld [vmem:[%s9718_s0 + $0x5a8] sm:$0xf]  ;;  %v6933_v23 = vld [vmem:[%s9718_s0 + $0x5b4] sm:$0xf0] }
 0x2d4   :  { %3028 = vmatmul.bf16.gmra.mxu3 %v5517_v16 }
 0x2d6   :  { %v2660_v55 = vpop.f32.mrf.mxu2  ;;  %v2004_v46 = vpop.f32.mrf.mxu0 }
 0x2d7   :  { %v2989_v32 = vpop.f32.mrf.mxu3  ;;  %v2661_v21 = vadd.f32 %v2660_v55, %v2332_v8  ;;  %v2333_v41 = vpop.f32.mrf.mxu1  ;;  %v7048_v55 = vld [vmem:[%s9719_s3 + $0x50] sm:$0xff] }
 0x2d8   :  { %v2334_v44 = vadd.f32 %v2333_v41, %v2004_v46  ;;  %3422 = vmatpush.bf16.msrb.mxu0 %v7048_v55  ;;  %v9781_v55 = vmax.f32 %v7692_v30, %v8182_v2  ;;  %v9782_v30 = vld [vmem:[#allocation2_spill] sm:$0xff] }
 0x2d9   :  { %v2990_v25 = vadd.f32 %v2989_v32, %v2661_v21  ;;  %v7064_v32 = vld [vmem:[%s9719_s3 + $0xd0] sm:$0xff]  ;;  %v9783_v2 = vld [vmem:[#allocation14_spill] sm:$0xff] }
 0x2da   :  { %v7040_v21 = vld [vmem:[%s9719_s3 + $0x10] sm:$0xff]  ;;  %3662 = vmatpush.bf16.msrb.mxu3 %v7064_v32 }
 0x2db   :  { %v8664_v18 = vmax.f32 %v9777_v0, %v2990_v25  ;;  %3490 = vmatpush.bf16.msrb.mxu1 %v7040_v21  ;;  %v9779_v0 = vld [vmem:[#allocation13_spill] sm:$0xff] }
 0x2dc   :  { %v9780_v43 = vmax.f32 %v7666_v9, %v9779_v0  ;;  %v6931_v9 = vld [vmem:[%s9718_s0 + $0x5ac] sm:$0xf] }
 0x2de   :  { %v2662_v14 = vpop.f32.mrf.mxu2  ;;  %v2007_v26 = vpop.f32.mrf.mxu0 }
 0x2df   :  { %v2991_v48 = vpop.f32.mrf.mxu3  ;;  %v2663_v7 = vadd.f32 %v2662_v14, %v2334_v44  ;;  %v2336_v31 = vpop.f32.mrf.mxu1  ;;  %v5546_v14 = vld [vmem:[%s9718_s0 + $0x5b8] sm:$0xf0] }
 0x2e0   :  { %v2337_v16 = vadd.f32 %v2336_v31, %v2007_v26 }
 0x2e1   :  { %v2992_v8 = vadd.f32 %v2991_v48, %v2663_v7  ;;  %2046 = vmatmul.bf16.gmra.mxu0 %v5521_v10  ;;  %v5541_v7 = vor.u32 %v6930_v11, %v5538_v13  ;;  %v5554_v11 = vld [vmem:[%s9718_s0 + $0x5d0] sm:$0xf0]  ;;  %v5560_v13 = vld [vmem:[%s9718_s0 + $0x5c8] sm:$0xf] }
 0x2e2   :  { %2375 = vmatmul.bf16.gmra.mxu1 %v5525_v12  ;;  %v5537_v12 = vor.u32 %v6932_v33, %v5536_v6  ;;  %v6936_v6 = vld [vmem:[%s9718_s0 + $0x5cc] sm:$0xf0]  ;;  %v9784_v33 = vmax.f32 %v9782_v30, %v9783_v2 }
 0x2e3   :  { %v8687_v5 = vmax.f32 %v9778_v53, %v2992_v8  ;;  %2704 = vmatmul.bf16.gmra.mxu2 %v5529_v35 }
 0x2e4   :  { %3033 = vmatmul.bf16.gmra.mxu3 %v5533_v22  ;;  %v5545_v22 = vor.u32 %v6933_v23, %v5544_v40  ;;  %v6937_v40 = vld [vmem:[%s9718_s0 + $0x5d4] sm:$0xf0]  ;;  %v6935_v23 = vld [vmem:[%s9718_s0 + $0x5cc] sm:$0xf] }
 0x2e6   :  { %v2665_v46 = vpop.f32.mrf.mxu2  ;;  %v2009_v41 = vpop.f32.mrf.mxu0 }
 0x2e7   :  { %v2994_v62 = vpop.f32.mrf.mxu3  ;;  %v2666_v34 = vadd.f32 %v2665_v46, %v2337_v16  ;;  %v2338_v44 = vpop.f32.mrf.mxu1  ;;  %v5549_v16 = vor.u32 %v6931_v9, %v5546_v14  ;;  %v5562_v9 = vld [vmem:[%s9718_s0 + $0x5d8] sm:$0xf0] }
 0x2e8   :  { %v2339_v25 = vadd.f32 %v2338_v44, %v2009_v41 }
 0x2e9   :  { %v2995_v36 = vadd.f32 %v2994_v62, %v2666_v34 }
 0x2eb   :  { %v8707_v51 = vmax.f32 %v9780_v43, %v2995_v36  ;;  %v5552_v36 = vld [vmem:[%s9718_s0 + $0x5c0] sm:$0xf]  ;;  %v6934_v43 = vld [vmem:[%s9718_s0 + $0x5c4] sm:$0xf] }
 0x2ee   :  { %v2667_v48 = vpop.f32.mrf.mxu2  ;;  %v2012_v31 = vpop.f32.mrf.mxu0 }
 0x2ef   :  { %v2996_v10 = vpop.f32.mrf.mxu3  ;;  %v2668_v26 = vadd.f32 %v2667_v48, %v2339_v25  ;;  %v2341_v35 = vpop.f32.mrf.mxu1 }
 0x2f0   :  { %v2342_v8 = vadd.f32 %v2341_v35, %v2012_v31  ;;  %v5561_v35 = vor.u32 %v6937_v40, %v5560_v13  ;;  %v6941_v13 = vld [vmem:[%s9718_s0 + $0x5f4] sm:$0xf0]  ;;  %v6939_v40 = vld [vmem:[%s9718_s0 + $0x5ec] sm:$0xf] }
 0x2f1   :  { %v2997_v53 = vadd.f32 %v2996_v10, %v2668_v26  ;;  %2051 = vmatmul.bf16.gmra.mxu0 %v5537_v12  ;;  %v5553_v10 = vor.u32 %v6936_v6, %v5552_v36  ;;  %v5557_v12 = vor.u32 %v6934_v43, %v5554_v11  ;;  %v5568_v36 = vld [vmem:[%s9718_s0 + $0x5e0] sm:$0xf]  ;;  %v6940_v6 = vld [vmem:[%s9718_s0 + $0x5ec] sm:$0xf0]  ;;  %v5570_v43 = vld [vmem:[%s9718_s0 + $0x5f0] sm:$0xf0] }
 0x2f2   :  { %2380 = vmatmul.bf16.gmra.mxu1 %v5541_v7  ;;  %v5576_v11 = vld [vmem:[%s9718_s0 + $0x5e8] sm:$0xf] }
 0x2f3   :  { %v8730_v32 = vmax.f32 %v9781_v55, %v2997_v53  ;;  %2709 = vmatmul.bf16.gmra.mxu2 %v5545_v22  ;;  %v5565_v22 = vor.u32 %v6935_v23, %v5562_v9  ;;  %v9785_v53 = vmax.f32 %v7720_v60, %v8214_v47  ;;  %v9786_v60 = vld [vmem:[#allocation3_spill] sm:$0xff]  ;;  %v5578_v23 = vld [vmem:[%s9718_s0 + $0x5f8] sm:$0xf0] }
 0x2f4   :  { %3038 = vmatmul.bf16.gmra.mxu3 %v5549_v16  ;;  %v9787_v47 = vld [vmem:[#allocation15_spill] sm:$0xff] }
 0x2f5   :  { %v9788_v30 = vmax.f32 %v9786_v60, %v9787_v47 }
 0x2f6   :  { %v2670_v21 = vpop.f32.mrf.mxu2  ;;  %v2014_v34 = vpop.f32.mrf.mxu0 }
 0x2f7   :  { %v2999_v46 = vpop.f32.mrf.mxu3  ;;  %v2671_v62 = vadd.f32 %v2670_v21, %v2342_v8  ;;  %v2343_v41 = vpop.f32.mrf.mxu1 }
 0x2f8   :  { %v2344_v44 = vadd.f32 %v2343_v41, %v2014_v34 }
 0x2f9   :  { %v3000_v25 = vadd.f32 %v2999_v46, %v2671_v62 }
 0x2fb   :  { %v8741_v0 = vmax.f32 %v9784_v33, %v3000_v25  ;;  %v6938_v33 = vld [vmem:[%s9718_s0 + $0x5e4] sm:$0xf] }
 0x2fe   :  { %v2672_v14 = vpop.f32.mrf.mxu2  ;;  %v2017_v26 = vpop.f32.mrf.mxu0 }
 0x2ff   :  { %v3001_v48 = vpop.f32.mrf.mxu3  ;;  %v2673_v7 = vadd.f32 %v2672_v14, %v2344_v44  ;;  %v2346_v31 = vpop.f32.mrf.mxu1 }
 0x300   :  { %v2347_v16 = vadd.f32 %v2346_v31, %v2017_v26  ;;  %v5577_v31 = vor.u32 %v6941_v13, %v5576_v11  ;;  %v6945_v11 = vld [vmem:[%s9718_s0 + $0x614] sm:$0xf0]  ;;  %v6943_v13 = vld [vmem:[%s9718_s0 + $0x60c] sm:$0xf] }
 0x301   :  { %v3002_v8 = vadd.f32 %v3001_v48, %v2673_v7  ;;  %2056 = vmatmul.bf16.gmra.mxu0 %v5553_v10  ;;  %v5569_v48 = vor.u32 %v6940_v6, %v5568_v36  ;;  %v5573_v10 = vor.u32 %v6938_v33, %v5570_v43  ;;  %v5584_v36 = vld [vmem:[%s9718_s0 + $0x600] sm:$0xf]  ;;  %v6944_v6 = vld [vmem:[%s9718_s0 + $0x60c] sm:$0xf0]  ;;  %v5586_v33 = vld [vmem:[%s9718_s0 + $0x610] sm:$0xf0] }
 0x302   :  { %2385 = vmatmul.bf16.gmra.mxu1 %v5557_v12  ;;  %v5592_v43 = vld [vmem:[%s9718_s0 + $0x608] sm:$0xf] }
 0x303   :  { %v8764_v55 = vmax.f32 %v9785_v53, %v3002_v8  ;;  %2714 = vmatmul.bf16.gmra.mxu2 %v5561_v35  ;;  %v5581_v35 = vor.u32 %v6939_v40, %v5578_v23  ;;  %v9789_v8 = vmax.f32 %v7748_v27, %v8246_v61  ;;  %v9790_v27 = vld [vmem:[#allocation4_spill] sm:$0xff]  ;;  %v5594_v40 = vld [vmem:[%s9718_s0 + $0x618] sm:$0xf0] }
 0x304   :  { %3043 = vmatmul.bf16.gmra.mxu3 %v5565_v22  ;;  %v9791_v61 = vld [vmem:[#allocation16_spill] sm:$0xff] }
 0x305   :  { %v9792_v60 = vmax.f32 %v9790_v27, %v9791_v61 }
 0x306   :  { %v2675_v21 = vpop.f32.mrf.mxu2  ;;  %v2019_v34 = vpop.f32.mrf.mxu0 }
 0x307   :  { %v3004_v46 = vpop.f32.mrf.mxu3  ;;  %v2676_v62 = vadd.f32 %v2675_v21, %v2347_v16  ;;  %v2348_v41 = vpop.f32.mrf.mxu1 }
 0x308   :  { %v2349_v44 = vadd.f32 %v2348_v41, %v2019_v34 }
 0x309   :  { %v3005_v25 = vadd.f32 %v3004_v46, %v2676_v62 }
 0x30b   :  { %v8775_v2 = vmax.f32 %v9788_v30, %v3005_v25  ;;  %v6942_v30 = vld [vmem:[%s9718_s0 + $0x604] sm:$0xf] }
 0x30e   :  { %v2677_v9 = vpop.f32.mrf.mxu2  ;;  %v2022_v7 = vpop.f32.mrf.mxu0 }
 0x30f   :  { %v3006_v14 = vpop.f32.mrf.mxu3  ;;  %v2678_v12 = vadd.f32 %v2677_v9, %v2349_v44  ;;  %v2351_v26 = vpop.f32.mrf.mxu1 }
 0x310   :  { %v2352_v22 = vadd.f32 %v2351_v26, %v2022_v7  ;;  %v5593_v26 = vor.u32 %v6945_v11, %v5592_v43  ;;  %v6949_v43 = vld [vmem:[%s9718_s0 + $0x634] sm:$0xf0]  ;;  %v6947_v11 = vld [vmem:[%s9718_s0 + $0x62c] sm:$0xf] }
 0x311   :  { %v3007_v16 = vadd.f32 %v3006_v14, %v2678_v12  ;;  %2061 = vmatmul.bf16.gmra.mxu0 %v5569_v48  ;;  %v5585_v14 = vor.u32 %v6944_v6, %v5584_v36  ;;  %v5589_v48 = vor.u32 %v6942_v30, %v5586_v33  ;;  %v5600_v36 = vld [vmem:[%s9718_s0 + $0x620] sm:$0xf]  ;;  %v6948_v6 = vld [vmem:[%s9718_s0 + $0x62c] sm:$0xf0]  ;;  %v5602_v30 = vld [vmem:[%s9718_s0 + $0x630] sm:$0xf0] }
 0x312   :  { %2390 = vmatmul.bf16.gmra.mxu1 %v5573_v10  ;;  %v5608_v33 = vld [vmem:[%s9718_s0 + $0x628] sm:$0xf] }
 0x313   :  { %v8798_v53 = vmax.f32 %v9789_v8, %v3007_v16  ;;  %2719 = vmatmul.bf16.gmra.mxu2 %v5577_v31  ;;  %v5597_v31 = vor.u32 %v6943_v13, %v5594_v40  ;;  %v9793_v16 = vmax.f32 %v7776_v59, %v8278_v45  ;;  %v9794_v59 = vld [vmem:[#allocation5_spill] sm:$0xff] }
 0x314   :  { %3048 = vmatmul.bf16.gmra.mxu3 %v5581_v35  ;;  %v9795_v45 = vld [vmem:[#allocation17_spill] sm:$0xff] }
 0x315   :  { %v9796_v27 = vmax.f32 %v9794_v59, %v9795_v45  ;;  %v5610_v13 = vld [vmem:[%s9718_s0 + $0x638] sm:$0xf0] }
 0x316   :  { %v2680_v21 = vpop.f32.mrf.mxu2  ;;  %v2024_v34 = vpop.f32.mrf.mxu0 }
 0x317   :  { %v3009_v46 = vpop.f32.mrf.mxu3  ;;  %v2681_v62 = vadd.f32 %v2680_v21, %v2352_v22  ;;  %v2353_v41 = vpop.f32.mrf.mxu1 }
 0x318   :  { %v2354_v44 = vadd.f32 %v2353_v41, %v2024_v34 }
 0x319   :  { %v3010_v25 = vadd.f32 %v3009_v46, %v2681_v62 }
 0x31b   :  { %v8809_v47 = vmax.f32 %v9792_v60, %v3010_v25  ;;  %v6946_v60 = vld [vmem:[%s9718_s0 + $0x624] sm:$0xf] }
 0x31e   :  { %v2682_v23 = vpop.f32.mrf.mxu2  ;;  %v2027_v12 = vpop.f32.mrf.mxu0 }
 0x31f   :  { %v3011_v9 = vpop.f32.mrf.mxu3  ;;  %v2683_v10 = vadd.f32 %v2682_v23, %v2354_v44  ;;  %v2356_v7 = vpop.f32.mrf.mxu1 }
 0x320   :  { %v2357_v35 = vadd.f32 %v2356_v7, %v2027_v12  ;;  %v5609_v7 = vor.u32 %v6949_v43, %v5608_v33  ;;  %v6953_v33 = vld [vmem:[%s9718_s0 + $0x654] sm:$0xf0]  ;;  %v6951_v43 = vld [vmem:[%s9718_s0 + $0x64c] sm:$0xf] }
 0x321   :  { %v3012_v22 = vadd.f32 %v3011_v9, %v2683_v10  ;;  %2066 = vmatmul.bf16.gmra.mxu0 %v5585_v14  ;;  %v5601_v9 = vor.u32 %v6948_v6, %v5600_v36  ;;  %v5605_v14 = vor.u32 %v6946_v60, %v5602_v30  ;;  %v5616_v36 = vld [vmem:[%s9718_s0 + $0x640] sm:$0xf]  ;;  %v6952_v6 = vld [vmem:[%s9718_s0 + $0x64c] sm:$0xf0]  ;;  %v5618_v60 = vld [vmem:[%s9718_s0 + $0x650] sm:$0xf0] }
 0x322   :  { %2395 = vmatmul.bf16.gmra.mxu1 %v5589_v48  ;;  %v5624_v30 = vld [vmem:[%s9718_s0 + $0x648] sm:$0xf] }
 0x323   :  { %v8832_v8 = vmax.f32 %v9793_v16, %v3012_v22  ;;  %2724 = vmatmul.bf16.gmra.mxu2 %v5593_v26  ;;  %v5613_v26 = vor.u32 %v6947_v11, %v5610_v13  ;;  %v9797_v22 = vmax.f32 %v7804_v29, %v8310_v50  ;;  %v9798_v29 = vld [vmem:[#allocation6_spill] sm:$0xff]  ;;  %v5626_v11 = vld [vmem:[%s9718_s0 + $0x658] sm:$0xf0] }
 0x324   :  { %3053 = vmatmul.bf16.gmra.mxu3 %v5597_v31  ;;  %v9799_v50 = vld [vmem:[#allocation18_spill] sm:$0xff] }
 0x325   :  { %v9800_v59 = vmax.f32 %v9798_v29, %v9799_v50 }
 0x326   :  { %v2685_v21 = vpop.f32.mrf.mxu2  ;;  %v2029_v34 = vpop.f32.mrf.mxu0 }
 0x327   :  { %v3014_v46 = vpop.f32.mrf.mxu3  ;;  %v2686_v62 = vadd.f32 %v2685_v21, %v2357_v35  ;;  %v2358_v41 = vpop.f32.mrf.mxu1 }
 0x328   :  { %v2359_v44 = vadd.f32 %v2358_v41, %v2029_v34 }
 0x329   :  { %v3015_v25 = vadd.f32 %v3014_v46, %v2686_v62 }
 0x32b   :  { %v8843_v61 = vmax.f32 %v9796_v27, %v3015_v25  ;;  %v6950_v27 = vld [vmem:[%s9718_s0 + $0x644] sm:$0xf] }
 0x32e   :  { %v2687_v40 = vpop.f32.mrf.mxu2  ;;  %v2032_v10 = vpop.f32.mrf.mxu0 }
 0x32f   :  { %v3016_v23 = vpop.f32.mrf.mxu3  ;;  %v2688_v48 = vadd.f32 %v2687_v40, %v2359_v44  ;;  %v2361_v12 = vpop.f32.mrf.mxu1 }
 0x330   :  { %v2362_v31 = vadd.f32 %v2361_v12, %v2032_v10  ;;  %v5625_v12 = vor.u32 %v6953_v33, %v5624_v30  ;;  %v6957_v30 = vld [vmem:[%s9718_s0 + $0x674] sm:$0xf0]  ;;  %v6955_v33 = vld [vmem:[%s9718_s0 + $0x66c] sm:$0xf] }
 0x331   :  { %v3017_v35 = vadd.f32 %v3016_v23, %v2688_v48  ;;  %2071 = vmatmul.bf16.gmra.mxu0 %v5601_v9  ;;  %v5617_v23 = vor.u32 %v6952_v6, %v5616_v36  ;;  %v5621_v9 = vor.u32 %v6950_v27, %v5618_v60  ;;  %v5632_v36 = vld [vmem:[%s9718_s0 + $0x660] sm:$0xf]  ;;  %v6956_v6 = vld [vmem:[%s9718_s0 + $0x66c] sm:$0xf0]  ;;  %v5634_v27 = vld [vmem:[%s9718_s0 + $0x670] sm:$0xf0] }
 0x332   :  { %2400 = vmatmul.bf16.gmra.mxu1 %v5605_v14  ;;  %v5640_v60 = vld [vmem:[%s9718_s0 + $0x668] sm:$0xf] }
 0x333   :  { %v8866_v16 = vmax.f32 %v9797_v22, %v3017_v35  ;;  %2729 = vmatmul.bf16.gmra.mxu2 %v5609_v7  ;;  %v5629_v7 = vor.u32 %v6951_v43, %v5626_v11  ;;  %v9801_v35 = vmax.f32 %v7832_v1, %v8342_v57  ;;  %v9802_v1 = vld [vmem:[#allocation7_spill] sm:$0xff]  ;;  %v5642_v43 = vld [vmem:[%s9718_s0 + $0x678] sm:$0xf0] }
 0x334   :  { %3058 = vmatmul.bf16.gmra.mxu3 %v5613_v26  ;;  %v9803_v57 = vld [vmem:[#allocation19_spill] sm:$0xff] }
 0x335   :  { %v9804_v29 = vmax.f32 %v9802_v1, %v9803_v57  ;;  %v5650_v57 = vld [vmem:[%s9718_s0 + $0x690] sm:$0xf0] }
 0x336   :  { %v2690_v21 = vpop.f32.mrf.mxu2  ;;  %v2034_v34 = vpop.f32.mrf.mxu0 }
 0x337   :  { %v3019_v46 = vpop.f32.mrf.mxu3  ;;  %v2691_v62 = vadd.f32 %v2690_v21, %v2362_v31  ;;  %v2363_v41 = vpop.f32.mrf.mxu1 }
 0x338   :  { %v2364_v44 = vadd.f32 %v2363_v41, %v2034_v34 }
 0x339   :  { %v3020_v25 = vadd.f32 %v3019_v46, %v2691_v62 }
 0x33b   :  { %v8877_v45 = vmax.f32 %v9800_v59, %v3020_v25  ;;  %v6954_v59 = vld [vmem:[%s9718_s0 + $0x664] sm:$0xf] }
 0x33e   :  { %v2692_v13 = vpop.f32.mrf.mxu2  ;;  %v2037_v48 = vpop.f32.mrf.mxu0 }
 0x33f   :  { %v3021_v40 = vpop.f32.mrf.mxu3  ;;  %v2693_v14 = vadd.f32 %v2692_v13, %v2364_v44  ;;  %v2366_v10 = vpop.f32.mrf.mxu1 }
 0x340   :  { %v2367_v26 = vadd.f32 %v2366_v10, %v2037_v48  ;;  %v5641_v10 = vor.u32 %v6957_v30, %v5640_v60 }
 0x341   :  { %v3022_v31 = vadd.f32 %v3021_v40, %v2693_v14  ;;  %2076 = vmatmul.bf16.gmra.mxu0 %v5617_v23  ;;  %v5633_v40 = vor.u32 %v6956_v6, %v5632_v36  ;;  %v5637_v23 = vor.u32 %v6954_v59, %v5634_v27  ;;  %v5648_v36 = vld [vmem:[%s9718_s0 + $0x680] sm:$0xf]  ;;  %v6960_v6 = vld [vmem:[%s9718_s0 + $0x68c] sm:$0xf0]  ;;  %v7055_v59 = vld [vmem:[%s9719_s3 + $0x88] sm:$0xff] }
 0x342   :  { %2405 = vmatmul.bf16.gmra.mxu1 %v5621_v9  ;;  %v6961_v27 = vld [vmem:[%s9718_s0 + $0x694] sm:$0xf0]  ;;  %3576 = vmatpush.bf16.msrb.mxu2 %v7055_v59 }
 0x343   :  { %v8900_v22 = vmax.f32 %v9801_v35, %v3022_v31  ;;  %2734 = vmatmul.bf16.gmra.mxu2 %v5625_v12  ;;  %v5645_v12 = vor.u32 %v6955_v33, %v5642_v43  ;;  %v9805_v31 = vmax.f32 %v7860_v39, %v8374_v17  ;;  %v6958_v39 = vld [vmem:[%s9718_s0 + $0x684] sm:$0xf]  ;;  %v9806_v17 = vmax.f32 %v7862_v49, %v8378_v15  ;;  %v6959_v49 = vld [vmem:[%s9718_s0 + $0x68c] sm:$0xf]  ;;  %v5658_v15 = vld [vmem:[%s9718_s0 + $0x698] sm:$0xf0] }
 0x344   :  { %3063 = vmatmul.bf16.gmra.mxu3 %v5629_v7  ;;  %v5649_v33 = vor.u32 %v6960_v6, %v5648_v36  ;;  %v5653_v43 = vor.u32 %v6958_v39, %v5650_v57  ;;  %v5664_v39 = vld [vmem:[%s9718_s0 + $0x6a0] sm:$0xf]  ;;  %v9810_v57 = vld [vmem:[#allocation9_spill] sm:$0xff] }
 0x346   :  { %v2695_v21 = vpop.f32.mrf.mxu2  ;;  %v2039_v34 = vpop.f32.mrf.mxu0 }
 0x347   :  { %v3024_v46 = vpop.f32.mrf.mxu3  ;;  %v2696_v62 = vadd.f32 %v2695_v21, %v2367_v26  ;;  %v2368_v41 = vpop.f32.mrf.mxu1 }
 0x348   :  { %v2369_v44 = vadd.f32 %v2368_v41, %v2039_v34 }
 0x349   :  { %v3025_v25 = vadd.f32 %v3024_v46, %v2696_v62 }
 0x34b   :  { %v8911_v50 = vmax.f32 %v9804_v29, %v3025_v25  ;;  %v5656_v29 = vld [vmem:[%s9718_s0 + $0x688] sm:$0xf] }
 0x34e   :  { %v2697_v11 = vpop.f32.mrf.mxu2  ;;  %v2042_v14 = vpop.f32.mrf.mxu0 }
 0x34f   :  { %v3026_v13 = vpop.f32.mrf.mxu3  ;;  %v2698_v9 = vadd.f32 %v2697_v11, %v2369_v44  ;;  %v2371_v48 = vpop.f32.mrf.mxu1 }
 0x350   :  { %v2372_v7 = vadd.f32 %v2371_v48, %v2042_v14 }
 0x351   :  { %v3027_v26 = vadd.f32 %v3026_v13, %v2698_v9  ;;  %2081 = vmatmul.bf16.gmra.mxu0 %v5633_v40  ;;  %v5661_v9 = vor.u32 %v6959_v49, %v5658_v15  ;;  %v6962_v49 = vld [vmem:[%s9718_s0 + $0x6a4] sm:$0xf]  ;;  %v5666_v15 = vld [vmem:[%s9718_s0 + $0x6b0] sm:$0xf0] }
 0x352   :  { %2410 = vmatmul.bf16.gmra.mxu1 %v5637_v23  ;;  %v5657_v23 = vor.u32 %v6961_v27, %v5656_v29  ;;  %v9811_v29 = vld [vmem:[#allocation21_spill] sm:$0xff] }
 0x353   :  { %v8934_v35 = vmax.f32 %v9805_v31, %v3027_v26  ;;  %2739 = vmatmul.bf16.gmra.mxu2 %v5641_v10  ;;  %v9807_v10 = vld [vmem:[#allocation8_spill] sm:$0xff]  ;;  %v7047_v31 = vld [vmem:[%s9719_s3 + $0x48] sm:$0xff]  ;;  %v9812_v59 = vmax.f32 %v9810_v57, %v9811_v29 }
 0x354   :  { %3068 = vmatmul.bf16.gmra.mxu3 %v5645_v12  ;;  %v9808_v12 = vld [vmem:[#allocation20_spill] sm:$0xff]  ;;  %3423 = vmatpush.bf16.msrb.mxu0 %v7047_v31 }
 0x356   :  { %v2700_v21 = vpop.f32.mrf.mxu2  ;;  %v2044_v34 = vpop.f32.mrf.mxu0 }
 0x357   :  { %v3029_v46 = vpop.f32.mrf.mxu3  ;;  %v2701_v62 = vadd.f32 %v2700_v21, %v2372_v7  ;;  %v2373_v41 = vpop.f32.mrf.mxu1  ;;  %v9809_v7 = vmax.f32 %v9807_v10, %v9808_v12  ;;  %v7063_v21 = vld [vmem:[%s9719_s3 + $0xc8] sm:$0xff] }
 0x358   :  { %v2374_v44 = vadd.f32 %v2373_v41, %v2044_v34  ;;  %3663 = vmatpush.bf16.msrb.mxu3 %v7063_v21  ;;  %v9813_v21 = vmax.f32 %v7928_v58, %v8450_v24  ;;  %v9814_v58 = vld [vmem:[#allocation10_spill] sm:$0xff] }
 0x359   :  { %v3030_v25 = vadd.f32 %v3029_v46, %v2701_v62  ;;  %v7039_v46 = vld [vmem:[%s9719_s3 + $0x8] sm:$0xff]  ;;  %v9815_v24 = vld [vmem:[#allocation22_spill] sm:$0xff] }
 0x35a   :  { %3491 = vmatpush.bf16.msrb.mxu1 %v7039_v46  ;;  %v9816_v57 = vmax.f32 %v9814_v58, %v9815_v24 }
 0x35b   :  { %v8948_v1 = vmax.f32 %v9806_v17, %v3030_v25  ;;  %v6964_v17 = vld [vmem:[%s9718_s0 + $0x6ac] sm:$0xf0] }
 0x35e   :  { %v2702_v60 = vpop.f32.mrf.mxu2  ;;  %v2047_v13 = vpop.f32.mrf.mxu0 }
 0x35f   :  { %v3031_v30 = vpop.f32.mrf.mxu3  ;;  %v2703_v11 = vadd.f32 %v2702_v60, %v2374_v44  ;;  %v2376_v40 = vpop.f32.mrf.mxu1  ;;  %v5672_v60 = vld [vmem:[%s9718_s0 + $0x6a8] sm:$0xf] }
 0x360   :  { %v2377_v14 = vadd.f32 %v2376_v40, %v2047_v13  ;;  %v5665_v40 = vor.u32 %v6964_v17, %v5664_v39  ;;  %v5680_v39 = vld [vmem:[%s9718_s0 + $0x6c0] sm:$0xf]  ;;  %v6968_v17 = vld [vmem:[%s9718_s0 + $0x6cc] sm:$0xf0] }
 0x361   :  { %v3032_v48 = vadd.f32 %v3031_v30, %v2703_v11  ;;  %2086 = vmatmul.bf16.gmra.mxu0 %v5649_v33  ;;  %v6965_v30 = vld [vmem:[%s9718_s0 + $0x6b4] sm:$0xf0]  ;;  %v6963_v33 = vld [vmem:[%s9718_s0 + $0x6ac] sm:$0xf] }
 0x362   :  { %2415 = vmatmul.bf16.gmra.mxu1 %v5653_v43  ;;  %v5674_v43 = vld [vmem:[%s9718_s0 + $0x6b8] sm:$0xf0]  ;;  %v5673_v10 = vor.u32 %v6965_v30, %v5672_v60  ;;  %v6969_v60 = vld [vmem:[%s9718_s0 + $0x6d4] sm:$0xf0]  ;;  %v6967_v30 = vld [vmem:[%s9718_s0 + $0x6cc] sm:$0xf] }
 0x363   :  { %v8971_v26 = vmax.f32 %v9809_v7, %v3032_v48  ;;  %2744 = vmatmul.bf16.gmra.mxu2 %v5657_v23  ;;  %v5669_v23 = vor.u32 %v6962_v49, %v5666_v15  ;;  %v5677_v12 = vor.u32 %v6963_v33, %v5674_v43  ;;  %v5682_v49 = vld [vmem:[%s9718_s0 + $0x6d0] sm:$0xf0]  ;;  %v5688_v15 = vld [vmem:[%s9718_s0 + $0x6c8] sm:$0xf]  ;;  %v5690_v33 = vld [vmem:[%s9718_s0 + $0x6d8] sm:$0xf0] }
 0x364   :  { %3073 = vmatmul.bf16.gmra.mxu3 %v5661_v9 }
 0x366   :  { %v2705_v62 = vpop.f32.mrf.mxu2  ;;  %v2049_v44 = vpop.f32.mrf.mxu0 }
 0x367   :  { %v3034_v34 = vpop.f32.mrf.mxu3  ;;  %v2706_v41 = vadd.f32 %v2705_v62, %v2377_v14  ;;  %v2378_v25 = vpop.f32.mrf.mxu1 }
 0x368   :  { %v2379_v36 = vadd.f32 %v2378_v25, %v2049_v44 }
 0x369   :  { %v3035_v6 = vadd.f32 %v3034_v34, %v2706_v41 }
 0x36b   :  { %v8991_v27 = vmax.f32 %v9812_v59, %v3035_v6  ;;  %v6966_v59 = vld [vmem:[%s9718_s0 + $0x6c4] sm:$0xf] }
 0x36e   :  { %v2707_v11 = vpop.f32.mrf.mxu2  ;;  %v2052_v14 = vpop.f32.mrf.mxu0 }
 0x36f   :  { %v3036_v13 = vpop.f32.mrf.mxu3  ;;  %v2708_v9 = vadd.f32 %v2707_v11, %v2379_v36  ;;  %v2381_v48 = vpop.f32.mrf.mxu1 }
 0x370   :  { %v2382_v7 = vadd.f32 %v2381_v48, %v2052_v14  ;;  %v5689_v48 = vor.u32 %v6969_v60, %v5688_v15  ;;  %v6973_v15 = vld [vmem:[%s9718_s0 + $0x6f4] sm:$0xf0]  ;;  %v6971_v60 = vld [vmem:[%s9718_s0 + $0x6ec] sm:$0xf] }
 0x371   :  { %v3037_v31 = vadd.f32 %v3036_v13, %v2708_v9  ;;  %2091 = vmatmul.bf16.gmra.mxu0 %v5665_v40  ;;  %v5681_v13 = vor.u32 %v6968_v17, %v5680_v39  ;;  %v5685_v40 = vor.u32 %v6966_v59, %v5682_v49  ;;  %v5696_v39 = vld [vmem:[%s9718_s0 + $0x6e0] sm:$0xf]  ;;  %v6972_v17 = vld [vmem:[%s9718_s0 + $0x6ec] sm:$0xf0]  ;;  %v5698_v59 = vld [vmem:[%s9718_s0 + $0x6f0] sm:$0xf0] }
 0x372   :  { %2420 = vmatmul.bf16.gmra.mxu1 %v5669_v23  ;;  %v5704_v49 = vld [vmem:[%s9718_s0 + $0x6e8] sm:$0xf] }
 0x373   :  { %v9014_v46 = vmax.f32 %v9813_v21, %v3037_v31  ;;  %2749 = vmatmul.bf16.gmra.mxu2 %v5673_v10  ;;  %v5693_v10 = vor.u32 %v6967_v30, %v5690_v33  ;;  %v9817_v31 = vmax.f32 %v7956_v42, %v8482_v37  ;;  %v9818_v42 = vld [vmem:[#allocation11_spill] sm:$0xff]  ;;  %v5706_v30 = vld [vmem:[%s9718_s0 + $0x6f8] sm:$0xf0] }
 0x374   :  { %3078 = vmatmul.bf16.gmra.mxu3 %v5677_v12  ;;  %v9819_v37 = vld [vmem:[#allocation23_spill] sm:$0xff] }
 0x375   :  { %v9820_v58 = vmax.f32 %v9818_v42, %v9819_v37 }
 0x376   :  { %v2710_v62 = vpop.f32.mrf.mxu2  ;;  %v2054_v44 = vpop.f32.mrf.mxu0 }
 0x377   :  { %v3039_v34 = vpop.f32.mrf.mxu3  ;;  %v2711_v41 = vadd.f32 %v2710_v62, %v2382_v7  ;;  %v2383_v25 = vpop.f32.mrf.mxu1 }
 0x378   :  { %v2384_v36 = vadd.f32 %v2383_v25, %v2054_v44 }
 0x379   :  { %v3040_v6 = vadd.f32 %v3039_v34, %v2711_v41 }
 0x37b   :  { %v9025_v29 = vmax.f32 %v9816_v57, %v3040_v6  ;;  %v6970_v57 = vld [vmem:[%s9718_s0 + $0x6e4] sm:$0xf] }
 0x37e   :  { %v2712_v43 = vpop.f32.mrf.mxu2  ;;  %v2057_v9 = vpop.f32.mrf.mxu0 }
 0x37f   :  { %v3041_v11 = vpop.f32.mrf.mxu3  ;;  %v2713_v23 = vadd.f32 %v2712_v43, %v2384_v36  ;;  %v2386_v14 = vpop.f32.mrf.mxu1 }
 0x380   :  { %v2387_v12 = vadd.f32 %v2386_v14, %v2057_v9  ;;  %v5705_v14 = vor.u32 %v6973_v15, %v5704_v49  ;;  %v6977_v49 = vld [vmem:[%s9718_s0 + $0x714] sm:$0xf0]  ;;  %v6975_v15 = vld [vmem:[%s9718_s0 + $0x70c] sm:$0xf] }
 0x381   :  { %v3042_v7 = vadd.f32 %v3041_v11, %v2713_v23  ;;  %2096 = vmatmul.bf16.gmra.mxu0 %v5681_v13  ;;  %v5697_v11 = vor.u32 %v6972_v17, %v5696_v39  ;;  %v5701_v13 = vor.u32 %v6970_v57, %v5698_v59  ;;  %v5712_v39 = vld [vmem:[%s9718_s0 + $0x700] sm:$0xf]  ;;  %v6976_v17 = vld [vmem:[%s9718_s0 + $0x70c] sm:$0xf0]  ;;  %v5714_v57 = vld [vmem:[%s9718_s0 + $0x710] sm:$0xf0] }
 0x382   :  { %2425 = vmatmul.bf16.gmra.mxu1 %v5685_v40  ;;  %v5720_v59 = vld [vmem:[%s9718_s0 + $0x708] sm:$0xf] }
 0x383   :  { %v9048_v21 = vmax.f32 %v9817_v31, %v3042_v7  ;;  %2754 = vmatmul.bf16.gmra.mxu2 %v5689_v48  ;;  %v5709_v48 = vor.u32 %v6971_v60, %v5706_v30  ;;  %v9821_v7 = vmax.f32 %v7984_v20, %v8514_v38  ;;  %v9822_v20 = vld [vmem:[#allocation12_spill] sm:$0xff]  ;;  %v5722_v60 = vld [vmem:[%s9718_s0 + $0x718] sm:$0xf0] }
 0x384   :  { %3083 = vmatmul.bf16.gmra.mxu3 %v5693_v10  ;;  %v9823_v38 = vld [vmem:[#allocation24_spill] sm:$0xff] }
 0x385   :  { %v9824_v42 = vmax.f32 %v9822_v20, %v9823_v38  ;;  %v6978_v20 = vld [vmem:[%s9718_s0 + $0x724] sm:$0xf]  ;;  %v5730_v38 = vld [vmem:[%s9718_s0 + $0x730] sm:$0xf0] }
 0x386   :  { %v2715_v62 = vpop.f32.mrf.mxu2  ;;  %v2059_v44 = vpop.f32.mrf.mxu0 }
 0x387   :  { %v3044_v34 = vpop.f32.mrf.mxu3  ;;  %v2716_v41 = vadd.f32 %v2715_v62, %v2387_v12  ;;  %v2388_v25 = vpop.f32.mrf.mxu1 }
 0x388   :  { %v2389_v36 = vadd.f32 %v2388_v25, %v2059_v44 }
 0x389   :  { %v3045_v6 = vadd.f32 %v3044_v34, %v2716_v41 }
 0x38b   :  { %v9059_v24 = vmax.f32 %v9820_v58, %v3045_v6  ;;  %v6974_v58 = vld [vmem:[%s9718_s0 + $0x704] sm:$0xf] }
 0x38e   :  { %v2717_v33 = vpop.f32.mrf.mxu2  ;;  %v2062_v23 = vpop.f32.mrf.mxu0 }
 0x38f   :  { %v3046_v43 = vpop.f32.mrf.mxu3  ;;  %v2718_v40 = vadd.f32 %v2717_v33, %v2389_v36  ;;  %v2391_v9 = vpop.f32.mrf.mxu1 }
 0x390   :  { %v2392_v10 = vadd.f32 %v2391_v9, %v2062_v23  ;;  %v5721_v9 = vor.u32 %v6977_v49, %v5720_v59 }
 0x391   :  { %v3047_v12 = vadd.f32 %v3046_v43, %v2718_v40  ;;  %2101 = vmatmul.bf16.gmra.mxu0 %v5697_v11  ;;  %v5713_v43 = vor.u32 %v6976_v17, %v5712_v39  ;;  %v5717_v11 = vor.u32 %v6974_v58, %v5714_v57  ;;  %v9121_v39 = vld [vmem:[%s9720_s2] ss:$0 sm:$0xff]  ;;  %v6981_v58 = vld [vmem:[%s9718_s0 + $0x734] sm:$0xf0]  ;;  %v5738_v57 = vld [vmem:[%s9718_s0 + $0x738] sm:$0xf0] }
 0x392   :  { %2430 = vmatmul.bf16.gmra.mxu1 %v5701_v13 }
 0x393   :  { %v9082_v31 = vmax.f32 %v9821_v7, %v3047_v12  ;;  %2759 = vmatmul.bf16.gmra.mxu2 %v5705_v14  ;;  %v5725_v14 = vor.u32 %v6975_v15, %v5722_v60  ;;  %v9825_v12 = vmax.f32 %v8012_v3, %v8546_v19  ;;  %v5728_v3 = vld [vmem:[%s9718_s0 + $0x720] sm:$0xf]  ;;  %v6980_v19 = vld [vmem:[%s9718_s0 + $0x72c] sm:$0xf0]  ;;  %v5733_v60 = vor.u32 %v6978_v20, %v5730_v38 }
 0x394   :  { %3088 = vmatmul.bf16.gmra.mxu3 %v5709_v48  ;;  %v5729_v15 = vor.u32 %v6980_v19, %v5728_v3 }
 0x396   :  { %v2720_v62 = vpop.f32.mrf.mxu2  ;;  %v2064_v44 = vpop.f32.mrf.mxu0 }
 0x397   :  { %v3049_v34 = vpop.f32.mrf.mxu3  ;;  %v2721_v41 = vadd.f32 %v2720_v62, %v2392_v10  ;;  %v2393_v25 = vpop.f32.mrf.mxu1 }
 0x398   :  { %v2394_v36 = vadd.f32 %v2393_v25, %v2064_v44 }
 0x399   :  { %v3050_v6 = vadd.f32 %v3049_v34, %v2721_v41 }
 0x39b   :  { %v9093_v37 = vmax.f32 %v9824_v42, %v3050_v6  ;;  %v5736_v42 = vld [vmem:[%s9718_s0 + $0x728] sm:$0xf] }
 0x39e   :  { %v2722_v30 = vpop.f32.mrf.mxu2  ;;  %v2067_v40 = vpop.f32.mrf.mxu0 }
 0x39f   :  { %v3051_v33 = vpop.f32.mrf.mxu3  ;;  %v2723_v13 = vadd.f32 %v2722_v30, %v2394_v36  ;;  %v2396_v23 = vpop.f32.mrf.mxu1 }
 0x3a0   :  { %v2397_v48 = vadd.f32 %v2396_v23, %v2067_v40 }
 0x3a1   :  { %v3052_v10 = vadd.f32 %v3051_v33, %v2723_v13  ;;  %2106 = vmatmul.bf16.gmra.mxu0 %v5713_v43  ;;  %v5737_v13 = vor.u32 %v6981_v58, %v5736_v42  ;;  %v6982_v58 = vld [vmem:[%s9718_s0 + $0x744] sm:$0xf] }
 0x3a2   :  { %2435 = vmatmul.bf16.gmra.mxu1 %v5717_v11 }
 0x3a3   :  { %v9116_v7 = vmax.f32 %v9825_v12, %v3052_v10  ;;  %2764 = vmatmul.bf16.gmra.mxu2 %v5721_v9 }
 0x3a4   :  { %3093 = vmatmul.bf16.gmra.mxu3 %v5725_v14 }
 0x3a6   :  { %v2725_v62 = vpop.f32.mrf.mxu2  ;;  %v2069_v44 = vpop.f32.mrf.mxu0 }
 0x3a7   :  { %v3054_v34 = vpop.f32.mrf.mxu3  ;;  %v2726_v41 = vadd.f32 %v2725_v62, %v2397_v48  ;;  %v2398_v25 = vpop.f32.mrf.mxu1 }
 0x3a8   :  { %v2399_v36 = vadd.f32 %v2398_v25, %v2069_v44 }
 0x3a9   :  { %v3055_v6 = vadd.f32 %v3054_v34, %v2726_v41 }
 0x3ab   :  { %v3136_v17 = vmax.f32 %v8559_v63, %v3055_v6  ;;  %v6979_v63 = vld [vmem:[%s9718_s0 + $0x72c] sm:$0xf] }
 0x3ac   :  { %v5741_v40 = vor.u32 %v6979_v63, %v5738_v57  ;;  %v5746_v63 = vld [vmem:[%s9718_s0 + $0x750] sm:$0xf0]  ;;  %v5752_v57 = vld [vmem:[%s9718_s0 + $0x748] sm:$0xf] }
 0x3ad   :  { %v3234_v30 = vadd.f32 %v9121_v39, %v3136_v17  ;;  %v5744_v17 = vld [vmem:[%s9718_s0 + $0x740] sm:$0xf] }
 0x3ae   :  { %v2727_v59 = vpop.f32.mrf.mxu2  ;;  %v2072_v43 = vpop.f32.mrf.mxu0 }
 0x3af   :  { %v3056_v49 = vpop.f32.mrf.mxu3  ;;  %v2728_v33 = vadd.f32 %v2727_v59, %v2399_v36  ;;  %v2401_v11 = vpop.f32.mrf.mxu1  ;;  %v3266_v14 = vmax.f32 %v3234_v30, 0.0  ;;  %v6985_v59 = vld [vmem:[%s9718_s0 + $0x754] sm:$0xf0] }
 0x3b0   :  { %v2402_v23 = vadd.f32 %v2401_v11, %v2072_v43  ;;  %v5749_v43 = vor.u32 %v6982_v58, %v5746_v63 }
 0x3b1   :  { %v3057_v9 = vadd.f32 %v3056_v49, %v2728_v33  ;;  %2111 = vmatmul.bf16.gmra.mxu0 %v5729_v15  ;;  %v3298_v34 = vpack.c.bf16 %v3266_v14, %v3266_v14  ;;  %v5754_v49 = vld [vmem:[%s9718_s0 + $0x758] sm:$0xf0] }
 0x3b2   :  { %2440 = vmatmul.bf16.gmra.mxu1 %v5733_v60 }
 0x3b3   :  { %v3139_v48 = vmax.f32 %v8582_v4, %v3057_v9  ;;  %2769 = vmatmul.bf16.gmra.mxu2 %v5737_v13  ;;  %v6984_v4 = vld [vmem:[%s9718_s0 + $0x74c] sm:$0xf0]  ;;  %v3433_v20 = vunpack.c.l.b16 %v3298_v34  ;;  %v5753_v9 = vor.u32 %v6985_v59, %v5752_v57  ;;  %v6986_v57 = vld [vmem:[%s9718_s0 + $0x764] sm:$0xf]  ;;  %v5762_v59 = vld [vmem:[%s9718_s0 + $0x770] sm:$0xf0] }
 0x3b4   :  { %3098 = vmatmul.bf16.gmra.mxu3 %v5741_v40  ;;  %v5745_v33 = vor.u32 %v6984_v4, %v5744_v17 }
 0x3b5   :  { %v3235_v10 = vadd.f32 %v9121_v39, %v3139_v48 }
 0x3b6   :  { %v2730_v12 = vpop.f32.mrf.mxu2  ;;  %v2074_v25 = vpop.f32.mrf.mxu0 }
 0x3b7   :  { %v3059_v62 = vpop.f32.mrf.mxu3  ;;  %v3267_v41 = vmax.f32 %v3235_v10, 0.0  ;;  %v2731_v44 = vadd.f32 %v2730_v12, %v2402_v23  ;;  %v2403_v36 = vpop.f32.mrf.mxu1 }
 0x3b8   :  { %v2404_v6 = vadd.f32 %v2403_v36, %v2074_v25 }
 0x3b9   :  { %v3299_v3 = vpack.c.bf16 %v3267_v41, %v3267_v41  ;;  %v3060_v19 = vadd.f32 %v3059_v62, %v2731_v44 }
 0x3bb   :  { %v3434_v38 = vunpack.c.l.b16 %v3299_v3  ;;  %v3142_v42 = vmax.f32 %v8593_v56, %v3060_v19  ;;  %v6983_v56 = vld [vmem:[%s9718_s0 + $0x74c] sm:$0xf] }
 0x3bc   :  { %v5757_v14 = vor.u32 %v6983_v56, %v5754_v49  ;;  %v5768_v56 = vld [vmem:[%s9718_s0 + $0x768] sm:$0xf]  ;;  %v6989_v49 = vld [vmem:[%s9718_s0 + $0x774] sm:$0xf0] }
 0x3bd   :  { %v9176_v15 = vpack.c.b16 %v3434_v38, %v3433_v20  ;;  %v3236_v11 = vadd.f32 %v9121_v39, %v3142_v42  ;;  %v5760_v38 = vld [vmem:[%s9718_s0 + $0x760] sm:$0xf] }
 0x3be   :  { %v2732_v60 = vpop.f32.mrf.mxu2  ;;  %v2077_v40 = vpop.f32.mrf.mxu0 }
 0x3bf   :  { %v3061_v30 = vpop.f32.mrf.mxu3  ;;  %v2733_v13 = vadd.f32 %v2732_v60, %v2404_v6  ;;  %v2406_v23 = vpop.f32.mrf.mxu1  ;;  %v3268_v12 = vmax.f32 %v3236_v11, 0.0  ;;  %v5770_v60 = vld [vmem:[%s9718_s0 + $0x778] sm:$0xf0] }
 0x3c0   :  { %v2407_v48 = vadd.f32 %v2406_v23, %v2077_v40 }
 0x3c1   :  { %v3062_v10 = vadd.f32 %v3061_v30, %v2733_v13  ;;  %2116 = vmatmul.bf16.gmra.mxu0 %v5745_v33  ;;  %v3300_v25 = vpack.c.bf16 %v3268_v12, %v3268_v12  ;;  %v5765_v13 = vor.u32 %v6986_v57, %v5762_v59  ;;  %v6990_v57 = vld [vmem:[%s9718_s0 + $0x784] sm:$0xf]  ;;  %v5778_v59 = vld [vmem:[%s9718_s0 + $0x790] sm:$0xf0] }
 0x3c2   :  { %2445 = vmatmul.bf16.gmra.mxu1 %v5749_v43 }
 0x3c3   :  { %v3145_v62 = vmax.f32 %v8616_v52, %v3062_v10  ;;  %2774 = vmatmul.bf16.gmra.mxu2 %v5753_v9  ;;  %v6988_v52 = vld [vmem:[%s9718_s0 + $0x76c] sm:$0xf0]  ;;  %v3365_v42 = vunpack.c.l.b16 %v3300_v25 }
 0x3c4   :  { %3103 = vmatmul.bf16.gmra.mxu3 %v5757_v14  ;;  %v5761_v11 = vor.u32 %v6988_v52, %v5760_v38  ;;  %v5776_v52 = vld [vmem:[%s9718_s0 + $0x780] sm:$0xf] }
 0x3c5   :  { %v3237_v34 = vadd.f32 %v9121_v39, %v3145_v62 }
 0x3c6   :  { %v2735_v41 = vpop.f32.mrf.mxu2  ;;  %v2079_v3 = vpop.f32.mrf.mxu0 }
 0x3c7   :  { %v3064_v44 = vpop.f32.mrf.mxu3  ;;  %v3269_v36 = vmax.f32 %v3237_v34, 0.0  ;;  %v2736_v6 = vadd.f32 %v2735_v41, %v2407_v48  ;;  %v2408_v19 = vpop.f32.mrf.mxu1  ;;  %v5769_v48 = vor.u32 %v6989_v49, %v5768_v56  ;;  %v5784_v56 = vld [vmem:[%s9718_s0 + $0x788] sm:$0xf]  ;;  %v6993_v49 = vld [vmem:[%s9718_s0 + $0x794] sm:$0xf0] }
 0x3c8   :  { %v2409_v17 = vadd.f32 %v2408_v19, %v2079_v3 }
 0x3c9   :  { %v3301_v4 = vpack.c.bf16 %v3269_v36, %v3269_v36  ;;  %v3065_v20 = vadd.f32 %v3064_v44, %v2736_v6 }
 0x3cb   :  { %v3366_v58 = vunpack.c.l.b16 %v3301_v4  ;;  %v3148_v63 = vmax.f32 %v8627_v54, %v3065_v20  ;;  %v6987_v54 = vld [vmem:[%s9718_s0 + $0x76c] sm:$0xf] }
 0x3cc   :  { %v5773_v10 = vor.u32 %v6987_v54, %v5770_v60  ;;  %v5786_v54 = vld [vmem:[%s9718_s0 + $0x798] sm:$0xf0] }
 0x3cd   :  { %v9206_v30 = vpack.c.b16 %v3366_v58, %v3365_v42  ;;  %v3238_v40 = vadd.f32 %v9121_v39, %v3148_v63 }
 0x3ce   :  { %v2737_v33 = vpop.f32.mrf.mxu2  ;;  %v2082_v9 = vpop.f32.mrf.mxu0 }
 0x3cf   :  { %v3066_v43 = vpop.f32.mrf.mxu3  ;;  %v2738_v23 = vadd.f32 %v2737_v33, %v2409_v17  ;;  %v2411_v14 = vpop.f32.mrf.mxu1  ;;  %v3270_v62 = vmax.f32 %v3238_v40, 0.0  ;;  %v5781_v40 = vor.u32 %v6990_v57, %v5778_v59  ;;  %v6996_v57 = vld [vmem:[%s9718_s0 + $0x7ac] sm:$0xf0]  ;;  %v6994_v59 = vld [vmem:[%s9718_s0 + $0x7a4] sm:$0xf] }
 0x3d0   :  { %v2412_v41 = vadd.f32 %v2411_v14, %v2082_v9 }
 0x3d1   :  { %v3067_v12 = vadd.f32 %v3066_v43, %v2738_v23  ;;  %2121 = vmatmul.bf16.gmra.mxu0 %v5761_v11  ;;  %v3302_v6 = vpack.c.bf16 %v3270_v62, %v3270_v62 }
 0x3d2   :  { %2450 = vmatmul.bf16.gmra.mxu1 %v5765_v13 }
 0x3d3   :  { %v3151_v34 = vmax.f32 %v8650_v28, %v3067_v12  ;;  %2779 = vmatmul.bf16.gmra.mxu2 %v5769_v48  ;;  %v6992_v28 = vld [vmem:[%s9718_s0 + $0x78c] sm:$0xf0]  ;;  %v3518_v42 = vunpack.c.l.b16 %v3302_v6 }
 0x3d4   :  { %3108 = vmatmul.bf16.gmra.mxu3 %v5773_v10  ;;  %v5777_v13 = vor.u32 %v6992_v28, %v5776_v52  ;;  %v5785_v10 = vor.u32 %v6993_v49, %v5784_v56 }
 0x3d5   :  { %v3239_v44 = vadd.f32 %v9121_v39, %v3151_v34 }
 0x3d6   :  { %v2740_v25 = vpop.f32.mrf.mxu2  ;;  %v2084_v17 = vpop.f32.mrf.mxu0 }
 0x3d7   :  { %v3069_v36 = vpop.f32.mrf.mxu3  ;;  %v3271_v3 = vmax.f32 %v3239_v44, 0.0  ;;  %v2741_v19 = vadd.f32 %v2740_v25, %v2412_v41  ;;  %v2413_v4 = vpop.f32.mrf.mxu1  ;;  %v7054_v25 = vld [vmem:[%s9719_s3 + $0x80] sm:$0xff] }
 0x3d8   :  { %v2414_v60 = vadd.f32 %v2413_v4, %v2084_v17  ;;  %3577 = vmatpush.bf16.msrb.mxu2 %v7054_v25 }
 0x3d9   :  { %v3303_v20 = vpack.c.bf16 %v3271_v3, %v3271_v3  ;;  %v3070_v38 = vadd.f32 %v3069_v36, %v2741_v19  ;;  %v7046_v36 = vld [vmem:[%s9719_s3 + $0x40] sm:$0xff]  ;;  %v7077_v3 = vld [vmem:[%s9719_s3 + $0x138] sm:$0xff] }
 0x3da   :  { %3424 = vmatpush.bf16.msrb.mxu0 %v7046_v36 }
 0x3db   :  { %v3519_v58 = vunpack.c.l.b16 %v3303_v20  ;;  %v3154_v63 = vmax.f32 %v8664_v18, %v3070_v38  ;;  %v6991_v18 = vld [vmem:[%s9718_s0 + $0x78c] sm:$0xf] }
 0x3dc   :  { %v5789_v12 = vor.u32 %v6991_v18, %v5786_v54  ;;  %v5794_v54 = vld [vmem:[%s9718_s0 + $0x7b0] sm:$0xf0] }
 0x3dd   :  { %v9236_v33 = vpack.c.b16 %v3519_v58, %v3518_v42  ;;  %v3240_v23 = vadd.f32 %v9121_v39, %v3154_v63  ;;  %v7076_v58 = vld [vmem:[%s9719_s3 + $0x130] sm:$0xff]  ;;  %v5792_v63 = vld [vmem:[%s9718_s0 + $0x7a0] sm:$0xf] }
 0x3de   :  { %v2742_v43 = vpop.f32.mrf.mxu2  ;;  %v2087_v14 = vpop.f32.mrf.mxu0  ;;  %3744 = vmatpush.bf16.msra.mxu0 %v7077_v3 }
 0x3df   :  { %v3071_v11 = vpop.f32.mrf.mxu3  ;;  %v2743_v9 = vadd.f32 %v2742_v43, %v2414_v60  ;;  %v2416_v48 = vpop.f32.mrf.mxu1  ;;  %v3272_v34 = vmax.f32 %v3240_v23, 0.0  ;;  %v5800_v60 = vld [vmem:[%s9718_s0 + $0x7a8] sm:$0xf]  ;;  %v6997_v43 = vld [vmem:[%s9718_s0 + $0x7b4] sm:$0xf0]  ;;  %v7038_v23 = vld [vmem:[%s9719_s3] sm:$0xff] }
 0x3e0   :  { %v2417_v44 = vadd.f32 %v2416_v48, %v2087_v14  ;;  %3492 = vmatpush.bf16.msrb.mxu1 %v7038_v23  ;;  %v7000_v23 = vld [vmem:[%s9718_s0 + $0x7cc] sm:$0xf0] }
 0x3e1   :  { %v3072_v62 = vadd.f32 %v3071_v11, %v2743_v9  ;;  %2126 = vmatmul.bf16.gmra.mxu0 %v5777_v13  ;;  %v3304_v17 = vpack.c.bf16 %v3272_v34, %v3272_v34  ;;  %v6995_v11 = vld [vmem:[%s9718_s0 + $0x7ac] sm:$0xf]  ;;  %v5801_v34 = vor.u32 %v6997_v43, %v5800_v60 }
 0x3e2   :  { %2455 = vmatmul.bf16.gmra.mxu1 %v5781_v40  ;;  %3745 = vmatpush.bf16.msra.mxu0 %v7076_v58  ;;  %v7062_v40 = vld [vmem:[%s9719_s3 + $0xc0] sm:$0xff]  ;;  %v7075_v9 = vld [vmem:[%s9719_s3 + $0x128] sm:$0xff] }
 0x3e3   :  { %v3157_v41 = vmax.f32 %v8687_v5, %v3072_v62  ;;  %2784 = vmatmul.bf16.gmra.mxu2 %v5785_v10  ;;  %v3605_v56 = vunpack.c.l.b16 %v3304_v17  ;;  %v5797_v62 = vor.u32 %v6994_v59, %v5794_v54  ;;  %3664 = vmatpush.bf16.msrb.mxu3 %v7062_v40  ;;  %v7100_v59 = vld [vmem:[%s9719_s3 + $0x1f0] sm:$0xff]  ;;  %v7083_v40 = vld [vmem:[%s9719_s3 + $0x168] sm:$0xff] }
 0x3e4   :  { %3113 = vmatmul.bf16.gmra.mxu3 %v5789_v12  ;;  %v5793_v12 = vor.u32 %v6996_v57, %v5792_v63  ;;  %v7092_v57 = vld [vmem:[%s9719_s3 + $0x1b0] sm:$0xff] }
 0x3e5   :  { %v3241_v6 = vadd.f32 %v9121_v39, %v3157_v41 }
 0x3e6   :  { %v2745_v19 = vpop.f32.mrf.mxu2  ;;  %v2089_v38 = vpop.f32.mrf.mxu0  ;;  %3746 = vmatpush.bf16.msra.mxu0 %v7075_v9  ;;  %v7091_v9 = vld [vmem:[%s9719_s3 + $0x1a8] sm:$0xff] }
 0x3e7   :  { %v3074_v5 = vpop.f32.mrf.mxu3  ;;  %v3273_v4 = vmax.f32 %v3241_v6, 0.0  ;;  %v2746_v20 = vadd.f32 %v2745_v19, %v2417_v44  ;;  %v2418_v52 = vpop.f32.mrf.mxu1  ;;  %v7074_v19 = vld [vmem:[%s9719_s3 + $0x120] sm:$0xff] }
 0x3e8   :  { %v2419_v13 = vadd.f32 %v2418_v52, %v2089_v38  ;;  %v7093_v38 = vld [vmem:[%s9719_s3 + $0x1b8] sm:$0xff] }
 0x3e9   :  { %v3305_v28 = vpack.c.bf16 %v3273_v4, %v3273_v4  ;;  %v3075_v42 = vadd.f32 %v3074_v5, %v2746_v20  ;;  %v7085_v20 = vld [vmem:[%s9719_s3 + $0x178] sm:$0xff]  ;;  %3918 = vmatpush.bf16.msra.mxu2 %v7093_v38 }
 0x3ea   :  { %v7101_v52 = vld [vmem:[%s9719_s3 + $0x1f8] sm:$0xff]  ;;  %3747 = vmatpush.bf16.msra.mxu0 %v7074_v19  ;;  %3831 = vmatpush.bf16.msra.mxu1 %v7085_v20  ;;  %v7071_v19 = vld [vmem:[%s9719_s3 + $0x108] sm:$0xff] }
 0x3eb   :  { %v3606_v49 = vunpack.c.l.b16 %v3305_v28  ;;  %v3160_v18 = vmax.f32 %v8707_v51, %v3075_v42  ;;  %v5802_v51 = vld [vmem:[%s9718_s0 + $0x7b8] sm:$0xf0]  ;;  %v7084_v42 = vld [vmem:[%s9719_s3 + $0x170] sm:$0xff]  ;;  %4005 = vmatpush.bf16.msra.mxu3 %v7101_v52  ;;  %v7090_v52 = vld [vmem:[%s9719_s3 + $0x1a0] sm:$0xff] }
 0x3ec   :  { %v5805_v6 = vor.u32 %v6995_v11, %v5802_v51  ;;  %v5808_v51 = vld [vmem:[%s9718_s0 + $0x7c0] sm:$0xf] }
 0x3ed   :  { %v9287_v14 = vpack.c.b16 %v3606_v49, %v3605_v56  ;;  %v3242_v41 = vadd.f32 %v9121_v39, %v3160_v18  ;;  %3919 = vmatpush.bf16.msra.mxu2 %v7092_v57  ;;  %v5809_v20 = vor.u32 %v7000_v23, %v5808_v51  ;;  %v7097_v51 = vld [vmem:[%s9719_s3 + $0x1d8] sm:$0xff] }
 0x3ee   :  { %v2747_v48 = vpop.f32.mrf.mxu2  ;;  %v2092_v25 = vpop.f32.mrf.mxu0  ;;  %3832 = vmatpush.bf16.msra.mxu1 %v7084_v42 }
 0x3ef   :  { %v3076_v10 = vpop.f32.mrf.mxu3  ;;  %v2748_v44 = vadd.f32 %v2747_v48, %v2419_v13  ;;  %v2421_v36 = vpop.f32.mrf.mxu1  ;;  %v3274_v5 = vmax.f32 %v3242_v41, 0.0  ;;  %v7072_v13 = vld [vmem:[%s9719_s3 + $0x110] sm:$0xff]  ;;  %4006 = vmatpush.bf16.msra.mxu3 %v7100_v59  ;;  %v7099_v48 = vld [vmem:[%s9719_s3 + $0x1e8] sm:$0xff]  ;;  %v7098_v59 = vld [vmem:[%s9719_s3 + $0x1e0] sm:$0xff] }
 0x3f0   :  { %v2422_v4 = vadd.f32 %v2421_v36, %v2092_v25  ;;  %v5810_v41 = vld [vmem:[%s9718_s0 + $0x7d0] sm:$0xf0]  ;;  %v7001_v25 = vld [vmem:[%s9718_s0 + $0x7d4] sm:$0xf0]  ;;  %v5818_v36 = vld [vmem:[%s9718_s0 + $0x7d8] sm:$0xf0] }
 0x3f1   :  { %v3077_v3 = vadd.f32 %v3076_v10, %v2748_v44  ;;  %2131 = vmatmul.bf16.gmra.mxu0 %v5793_v12  ;;  %v3306_v56 = vpack.c.bf16 %v3274_v5, %v3274_v5  ;;  %v5816_v44 = vld [vmem:[%s9718_s0 + $0x7c8] sm:$0xf]  ;;  %3920 = vmatpush.bf16.msra.mxu2 %v7091_v9  ;;  %v7082_v5 = vld [vmem:[%s9719_s3 + $0x160] sm:$0xff] }
 0x3f2   :  { %2460 = vmatmul.bf16.gmra.mxu1 %v5797_v62 }
 0x3f3   :  { %v3163_v17 = vmax.f32 %v8730_v32, %v3077_v3  ;;  %2789 = vmatmul.bf16.gmra.mxu2 %v5801_v34  ;;  %v7073_v32 = vld [vmem:[%s9719_s3 + $0x118] sm:$0xff]  ;;  %v3692_v10 = vunpack.c.l.b16 %v3306_v56  ;;  %v6998_v34 = vld [vmem:[%s9718_s0 + $0x7c4] sm:$0xf]  ;;  %3833 = vmatpush.bf16.msra.mxu1 %v7083_v40  ;;  %v7080_v40 = vld [vmem:[%s9719_s3 + $0x150] sm:$0xff] }
 0x3f4   :  { %3118 = vmatmul.bf16.gmra.mxu3 %v5805_v6  ;;  %3748 = vmatpush.bf16.msra.mxu0 %v7073_v32  ;;  %v5813_v38 = vor.u32 %v6998_v34, %v5810_v41  ;;  %v7096_v41 = vld [vmem:[%s9719_s3 + $0x1d0] sm:$0xff] }
 0x3f5   :  { %v3243_v28 = vadd.f32 %v9121_v39, %v3163_v17  ;;  %4007 = vmatpush.bf16.msra.mxu3 %v7099_v48  ;;  %3921 = vmatpush.bf16.msra.mxu2 %v7090_v52  ;;  %v5832_v52 = vld [vmem:[%s9718_s0 + $0x7e8] sm:$0xf] }
 0x3f6   :  { %v2750_v58 = vpop.f32.mrf.mxu2  ;;  %v2094_v54 = vpop.f32.mrf.mxu0 }
 0x3f7   :  { %v3079_v63 = vpop.f32.mrf.mxu3  ;;  %v3275_v49 = vmax.f32 %v3243_v28, 0.0  ;;  %v2751_v18 = vadd.f32 %v2750_v58, %v2422_v4  ;;  %v2423_v60 = vpop.f32.mrf.mxu1  ;;  %3834 = vmatpush.bf16.msra.mxu1 %v7082_v5  ;;  %v7087_v5 = vld [vmem:[%s9719_s3 + $0x188] sm:$0xff] }
 0x3f8   :  { %3749 = vmatpush.bf16.msra.mxu0 %v7072_v13  ;;  %v2424_v3 = vadd.f32 %v2423_v60, %v2094_v54  ;;  %v7089_v54 = vld [vmem:[%s9719_s3 + $0x198] sm:$0xff] }
 0x3f9   :  { %v3307_v43 = vpack.c.bf16 %v3275_v49, %v3275_v49  ;;  %v3080_v11 = vadd.f32 %v3079_v63, %v2751_v18  ;;  %v5817_v63 = vor.u32 %v7001_v25, %v5816_v44  ;;  %v7070_v49 = vld [vmem:[%s9719_s3 + $0x100] sm:$0xff]  ;;  %v7081_v18 = vld [vmem:[%s9719_s3 + $0x158] sm:$0xff]  ;;  %4008 = vmatpush.bf16.msra.mxu3 %v7098_v59  ;;  %3922 = vmatpush.bf16.msra.mxu2 %v7089_v54 }
 0x3fa   :  { %v7086_v54 = vld [vmem:[%s9719_s3 + $0x180] sm:$0xff] }
 0x3fb   :  { %v3693_v12 = vunpack.c.l.b16 %v3307_v43  ;;  %v3166_v62 = vmax.f32 %v8741_v0, %v3080_v11  ;;  %v6999_v0 = vld [vmem:[%s9718_s0 + $0x7cc] sm:$0xf]  ;;  %3835 = vmatpush.bf16.msra.mxu1 %v7081_v18 }
 0x3fc   :  { %v5821_v57 = vor.u32 %v6999_v0, %v5818_v36  ;;  %3750 = vmatpush.bf16.msra.mxu0 %v7071_v19  ;;  %v5824_v0 = vld [vmem:[%s9718_s0 + $0x7e0] sm:$0xf]  ;;  %v7079_v36 = vld [vmem:[%s9719_s3 + $0x148] sm:$0xff]  ;;  %v7002_v19 = vld [vmem:[%s9718_s0 + $0x7e4] sm:$0xf] }
 0x3fd   :  { %v9353_v6 = vpack.c.b16 %v3693_v12, %v3692_v10  ;;  %v3244_v28 = vadd.f32 %v9121_v39, %v3166_v62  ;;  %4009 = vmatpush.bf16.msra.mxu3 %v7097_v51 }
 0x3fe   :  { %v2752_v17 = vpop.f32.mrf.mxu2  ;;  %v2097_v42 = vpop.f32.mrf.mxu0 }
 0x3ff   :  { %v3081_v4 = vpop.f32.mrf.mxu3  ;;  %v2753_v32 = vadd.f32 %v2752_v17, %v2424_v3  ;;  %v2426_v58 = vpop.f32.mrf.mxu1  ;;  %v3276_v60 = vmax.f32 %v3244_v28, 0.0  ;;  %3836 = vmatpush.bf16.msra.mxu1 %v7080_v40  ;;  %v7004_v3 = vld [vmem:[%s9718_s0 + $0x7ec] sm:$0xf0]  ;;  %v7005_v28 = vld [vmem:[%s9718_s0 + $0x7f4] sm:$0xf0] }
 0x400   :  { %v2427_v11 = vadd.f32 %v2426_v58, %v2097_v42  ;;  %3751 = vmatpush.bf16.msra.mxu0 %v7070_v49  ;;  %v7095_v42 = vld [vmem:[%s9719_s3 + $0x1c8] sm:$0xff]  ;;  %v5825_v49 = vor.u32 %v7004_v3, %v5824_v0 }
 0x401   :  { %v3082_v56 = vadd.f32 %v3081_v4, %v2753_v32  ;;  %2136 = vmatmul.bf16.gmra.mxu0 %v5809_v20  ;;  %v3308_v48 = vpack.c.bf16 %v3276_v60, %v3276_v60  ;;  %v7003_v32 = vld [vmem:[%s9718_s0 + $0x7ec] sm:$0xf]  ;;  %4010 = vmatpush.bf16.msra.mxu3 %v7096_v41 }
 0x402   :  { %2465 = vmatmul.bf16.gmra.mxu1 %v5813_v38  ;;  %v5826_v38 = vld [vmem:[%s9718_s0 + $0x7f0] sm:$0xf0] }
 0x403   :  { %v3169_v43 = vmax.f32 %v8764_v55, %v3082_v56  ;;  %2794 = vmatmul.bf16.gmra.mxu2 %v5817_v63  ;;  %v7088_v55 = vld [vmem:[%s9719_s3 + $0x190] sm:$0xff]  ;;  %v3779_v17 = vunpack.c.l.b16 %v3308_v48  ;;  %3837 = vmatpush.bf16.msra.mxu1 %v7079_v36  ;;  %v5829_v18 = vor.u32 %v7002_v19, %v5826_v38 }
 0x404   :  { %3123 = vmatmul.bf16.gmra.mxu3 %v5821_v57  ;;  %3923 = vmatpush.bf16.msra.mxu2 %v7088_v55  ;;  %v7078_v57 = vld [vmem:[%s9719_s3 + $0x140] sm:$0xff] }
 0x405   :  { %v3245_v13 = vadd.f32 %v9121_v39, %v3169_v43  ;;  %4011 = vmatpush.bf16.msra.mxu3 %v7095_v42 }
 0x406   :  { %v2755_v23 = vpop.f32.mrf.mxu2  ;;  %v2099_v62 = vpop.f32.mrf.mxu0 }
 0x407   :  { %v3084_v9 = vpop.f32.mrf.mxu3  ;;  %v3277_v10 = vmax.f32 %v3245_v13, 0.0  ;;  %v2756_v12 = vadd.f32 %v2755_v23, %v2427_v11  ;;  %v2428_v34 = vpop.f32.mrf.mxu1  ;;  %v5833_v13 = vor.u32 %v7005_v28, %v5832_v52  ;;  %v7094_v23 = vld [vmem:[%s9719_s3 + $0x1c0] sm:$0xff]  ;;  %3838 = vmatpush.bf16.msra.mxu1 %v7078_v57  ;;  %v7117_v57 = vld [vmem:[%s9719_s3 + $0x278] sm:$0xff] }
 0x408   :  { %v2429_v63 = vadd.f32 %v2428_v34, %v2099_v62  ;;  %3924 = vmatpush.bf16.msra.mxu2 %v7087_v5 }
 0x409   :  { %v3309_v44 = vpack.c.bf16 %v3277_v10, %v3277_v10  ;;  %v3085_v25 = vadd.f32 %v3084_v9, %v2756_v12  ;;  %4012 = vmatpush.bf16.msra.mxu3 %v7094_v23  ;;  %v7115_v23 = vld [vmem:[%s9719_s3 + $0x268] sm:$0xff] }
 0x40b   :  { %v3780_v4 = vunpack.c.l.b16 %v3309_v44  ;;  %v3172_v20 = vmax.f32 %v8775_v2, %v3085_v25  ;;  %v5834_v2 = vld [vmem:[%s9718_s0 + $0x7f8] sm:$0xf0] }
 0x40c   :  { %v5837_v40 = vor.u32 %v7003_v32, %v5834_v2  ;;  %3925 = vmatpush.bf16.msra.mxu2 %v7086_v54  ;;  %v7108_v54 = vld [vmem:[%s9719_s3 + $0x230] sm:$0xff] }
 0x40d   :  { %v9425_v58 = vpack.c.b16 %v3780_v4, %v3779_v17  ;;  %v3246_v60 = vadd.f32 %v9121_v39, %v3172_v20 }
 0x40e   :  { %v2757_v59 = vpop.f32.mrf.mxu2  ;;  %v2102_v11 = vpop.f32.mrf.mxu0 }
 0x40f   :  { %v3086_v56 = vpop.f32.mrf.mxu3  ;;  %v2758_v43 = vadd.f32 %v2757_v59, %v2429_v63  ;;  %v2431_v51 = vpop.f32.mrf.mxu1  ;;  %v3278_v55 = vmax.f32 %v3246_v60, 0.0  ;;  %v7109_v63 = vld [vmem:[%s9719_s3 + $0x238] sm:$0xff] }
 0x410   :  { %v2432_v10 = vadd.f32 %v2431_v51, %v2102_v11 }
 0x411   :  { %v3087_v9 = vadd.f32 %v3086_v56, %v2758_v43  ;;  %2141 = vmatmul.bf16.gmra.mxu0 %v5825_v49  ;;  %v3310_v41 = vpack.c.bf16 %v3278_v55, %v3278_v55 }
 0x412   :  { %2470 = vmatmul.bf16.gmra.mxu1 %v5829_v18 }
 0x413   :  { %v3175_v48 = vmax.f32 %v8798_v53, %v3087_v9  ;;  %2799 = vmatmul.bf16.gmra.mxu2 %v5833_v13  ;;  %v3866_v5 = vunpack.c.l.b16 %v3310_v41  ;;  %v7114_v41 = vld [vmem:[%s9719_s3 + $0x260] sm:$0xff] }
 0x414   :  { %3128 = vmatmul.bf16.gmra.mxu3 %v5837_v40  ;;  %v7107_v40 = vld [vmem:[%s9719_s3 + $0x228] sm:$0xff] }
 0x415   :  { %v3247_v12 = vadd.f32 %v9121_v39, %v3175_v48  ;;  %v7123_v48 = vld [vmem:[%s9719_s3 + $0x2a8] sm:$0xff] }
 0x416   :  { %v2760_v62 = vpop.f32.mrf.mxu2  ;;  %v2104_v0 = vpop.f32.mrf.mxu0 }
 0x417   :  { %v3089_v34 = vpop.f32.mrf.mxu3  ;;  %v3279_v44 = vmax.f32 %v3247_v12, 0.0  ;;  %v2761_v25 = vadd.f32 %v2760_v62, %v2432_v10  ;;  %v2433_v36 = vpop.f32.mrf.mxu1 }
 0x418   :  { %v2434_v20 = vadd.f32 %v2433_v36, %v2104_v0  ;;  %v7122_v0 = vld [vmem:[%s9719_s3 + $0x2a0] sm:$0xff] }
 0x419   :  { %v3311_v3 = vpack.c.bf16 %v3279_v44, %v3279_v44  ;;  %v3090_v19 = vadd.f32 %v3089_v34, %v2761_v25  ;;  %v7106_v34 = vld [vmem:[%s9719_s3 + $0x220] sm:$0xff] }
 0x41b   :  { %v3867_v17 = vunpack.c.l.b16 %v3311_v3  ;;  %v3178_v4 = vmax.f32 %v8809_v47, %v3090_v19  ;;  %v7125_v47 = vld [vmem:[%s9719_s3 + $0x2b8] sm:$0xff] }
 0x41d   :  { %v9440_v53 = vpack.c.b16 %v3867_v17, %v3866_v5  ;;  %v3248_v28 = vadd.f32 %v9121_v39, %v3178_v4 }
 0x41e   :  { %v2762_v38 = vpop.f32.mrf.mxu2  ;;  %v2107_v2 = vpop.f32.mrf.mxu0 }
 0x41f   :  { %v3091_v52 = vpop.f32.mrf.mxu3  ;;  %v2763_v32 = vadd.f32 %v2762_v38, %v2434_v20  ;;  %v2436_v42 = vpop.f32.mrf.mxu1  ;;  %v3280_v56 = vmax.f32 %v3248_v28, 0.0  ;;  %v7105_v20 = vld [vmem:[%s9719_s3 + $0x218] sm:$0xff] }
 0x420   :  { %v2437_v18 = vadd.f32 %v2436_v42, %v2107_v2  ;;  %v7113_v38 = vld [vmem:[%s9719_s3 + $0x258] sm:$0xff] }
 0x421   :  { %v3092_v59 = vadd.f32 %v3091_v52, %v2763_v32  ;;  %3425 = vmatmul.bf16.vlgmr.msrb.gmra.mxu0 %v9206_v30  ;;  %v7116_v30 = vld [vmem:[%s9719_s3 + $0x270] sm:$0xff]  ;;  %v7121_v28 = vld [vmem:[%s9719_s3 + $0x298] sm:$0xff] }
 0x422   :  { %3493 = vmatmul.bf16.vlgmr.msrb.gmra.mxu1 %v9176_v15  ;;  %4092 = vmatpush.bf16.msrb.mxu0 %v7109_v63  ;;  %v7132_v32 = vld [vmem:[%s9719_s3 + $0x2f0] sm:$0xff] }
 0x423   :  { %v3181_v49 = vmax.f32 %v8832_v8, %v3092_v59  ;;  %3578 = vmatmul.bf16.vlgmr.msrb.gmra.mxu2 %v9236_v33  ;;  %4179 = vmatpush.bf16.msrb.mxu1 %v7117_v57  ;;  %v7124_v8 = vld [vmem:[%s9719_s3 + $0x2b0] sm:$0xff] }
 0x424   :  { %3665 = vmatmul.bf16.vlgmr.msrb.gmra.mxu3 %v9287_v14  ;;  %4266 = vmatpush.bf16.msrb.mxu2 %v7125_v47  ;;  %v3312_v14 = vpack.c.bf16 %v3280_v56, %v3280_v56  ;;  %v7104_v57 = vld [vmem:[%s9719_s3 + $0x210] sm:$0xff]  ;;  %v7131_v47 = vld [vmem:[%s9719_s3 + $0x2e8] sm:$0xff] }
 0x425   :  { %v3249_v15 = vadd.f32 %v9121_v39, %v3181_v49 }
 0x426   :  { %v2765_v33 = vpop.f32.mrf.mxu2  ;;  %v2109_v51 = vpop.f32.mrf.mxu0  ;;  %4093 = vmatpush.bf16.msrb.mxu0 %v7108_v54  ;;  %v3953_v10 = vunpack.c.l.b16 %v3312_v14  ;;  %v7119_v14 = vld [vmem:[%s9719_s3 + $0x288] sm:$0xff] }
 0x427   :  { %v3094_v60 = vpop.f32.mrf.mxu3  ;;  %v3281_v43 = vmax.f32 %v3249_v15, 0.0  ;;  %v2766_v11 = vadd.f32 %v2765_v33, %v2437_v18  ;;  %v2438_v13 = vpop.f32.mrf.mxu1  ;;  %4180 = vmatpush.bf16.msrb.mxu1 %v7116_v30  ;;  %v7103_v15 = vld [vmem:[%s9719_s3 + $0x208] sm:$0xff] }
 0x428   :  { %4267 = vmatpush.bf16.msrb.mxu2 %v7124_v8  ;;  %v2439_v25 = vadd.f32 %v2438_v13, %v2109_v51  ;;  %v7111_v8 = vld [vmem:[%s9719_s3 + $0x248] sm:$0xff] }
 0x429   :  { %v3313_v9 = vpack.c.bf16 %v3281_v43, %v3281_v43  ;;  %v3095_v55 = vadd.f32 %v3094_v60, %v2766_v11  ;;  %v7130_v43 = vld [vmem:[%s9719_s3 + $0x2e0] sm:$0xff] }
 0x42a   :  { %4094 = vmatpush.bf16.msrb.mxu0 %v7107_v40  ;;  %v7102_v40 = vld [vmem:[%s9719_s3 + $0x200] sm:$0xff] }
 0x42b   :  { %v3954_v12 = vunpack.c.l.b16 %v3313_v9  ;;  %v3184_v62 = vmax.f32 %v8843_v61, %v3095_v55  ;;  %4181 = vmatpush.bf16.msrb.mxu1 %v7115_v23  ;;  %v7133_v61 = vld [vmem:[%s9719_s3 + $0x2f8] sm:$0xff]  ;;  %v7110_v23 = vld [vmem:[%s9719_s3 + $0x240] sm:$0xff] }
 0x42c   :  { %4268 = vmatpush.bf16.msrb.mxu2 %v7123_v48  ;;  %4353 = vmatpush.bf16.msrb.mxu3 %v7133_v61  ;;  %v7118_v48 = vld [vmem:[%s9719_s3 + $0x280] sm:$0xff] }
 0x42d   :  { %v3955_v44 = vpack.c.b16 %v3954_v12, %v3953_v10  ;;  %v3250_v19 = vadd.f32 %v9121_v39, %v3184_v62  ;;  %v7129_v12 = vld [vmem:[%s9719_s3 + $0x2d8] sm:$0xff] }
 0x42e   :  { %v2767_v36 = vpop.f32.mrf.mxu2  ;;  %v2112_v17 = vpop.f32.mrf.mxu0  ;;  %4095 = vmatpush.bf16.msrb.mxu0 %v7106_v34  ;;  %v7141_v62 = vld [vmem:[%s9719_s3 + $0x338] sm:$0xff] }
 0x42f   :  { %v3096_v3 = vpop.f32.mrf.mxu3  ;;  %v2768_v5 = vadd.f32 %v2767_v36, %v2439_v25  ;;  %v2441_v4 = vpop.f32.mrf.mxu1  ;;  %4182 = vmatpush.bf16.msrb.mxu1 %v7114_v41  ;;  %v3282_v2 = vmax.f32 %v3250_v19, 0.0  ;;  %v7128_v36 = vld [vmem:[%s9719_s3 + $0x2d0] sm:$0xff] }
 0x430   :  { %4269 = vmatpush.bf16.msrb.mxu2 %v7122_v0  ;;  %v2442_v63 = vadd.f32 %v2441_v4, %v2112_v17  ;;  %4354 = vmatpush.bf16.msrb.mxu3 %v7132_v32 }
 0x431   :  { %v3097_v52 = vadd.f32 %v3096_v3, %v2768_v5  ;;  %3752 = vmatmul.bf16.vlgmr.msra.gmra.mxu0 %v9353_v6  ;;  %v7112_v6 = vld [vmem:[%s9719_s3 + $0x250] sm:$0xff]  ;;  %v3314_v56 = vpack.c.bf16 %v3282_v2, %v3282_v2 }
 0x432   :  { %3839 = vmatmul.bf16.vlgmr.msra.gmra.mxu1 %v9425_v58  ;;  %4096 = vmatpush.bf16.msrb.mxu0 %v7105_v20  ;;  %v7140_v3 = vld [vmem:[%s9719_s3 + $0x330] sm:$0xff] }
 0x433   :  { %v3187_v42 = vmax.f32 %v8866_v16, %v3097_v52  ;;  %3926 = vmatmul.bf16.vlgmr.msra.gmra.mxu2 %v9440_v53  ;;  %4183 = vmatpush.bf16.msrb.mxu1 %v7113_v38  ;;  %v7120_v16 = vld [vmem:[%s9719_s3 + $0x290] sm:$0xff]  ;;  %v4040_v11 = vunpack.c.l.b16 %v3314_v56  ;;  %v7127_v38 = vld [vmem:[%s9719_s3 + $0x2c8] sm:$0xff] }
 0x434   :  { %4013 = vmatmul.bf16.vlgmr.msra.gmra.mxu3 %v3955_v44  ;;  %4270 = vmatpush.bf16.msrb.mxu2 %v7121_v28  ;;  %v7139_v52 = vld [vmem:[%s9719_s3 + $0x328] sm:$0xff] }
 0x435   :  { %v3251_v58 = vadd.f32 %v9121_v39, %v3187_v42  ;;  %4355 = vmatpush.bf16.msrb.mxu3 %v7131_v47 }
 0x436   :  { %v2770_v53 = vpop.f32.mrf.mxu2  ;;  %v2114_v54 = vpop.f32.mrf.mxu0  ;;  %4097 = vmatpush.bf16.msrb.mxu0 %v7104_v57 }
 0x437   :  { %v3099_v59 = vpop.f32.mrf.mxu3  ;;  %v3283_v49 = vmax.f32 %v3251_v58, 0.0  ;;  %v2771_v18 = vadd.f32 %v2770_v53, %v2442_v63  ;;  %v2443_v30 = vpop.f32.mrf.mxu1  ;;  %4184 = vmatpush.bf16.msrb.mxu1 %v7112_v6  ;;  %v7138_v6 = vld [vmem:[%s9719_s3 + $0x320] sm:$0xff] }
 0x438   :  { %4271 = vmatpush.bf16.msrb.mxu2 %v7120_v16  ;;  %v2444_v55 = vadd.f32 %v2443_v30, %v2114_v54  ;;  %v7149_v54 = vld [vmem:[%s9719_s3 + $0x378] sm:$0xff]  ;;  %v9578_v30 = vld [vmem:[%s9720_s2] ss:$0 sm:$0xff] }
 0x439   :  { %v3315_v33 = vpack.c.bf16 %v3283_v49, %v3283_v49  ;;  %v3100_v60 = vadd.f32 %v3099_v59, %v2771_v18  ;;  %4356 = vmatpush.bf16.msrb.mxu3 %v7130_v43  ;;  %v7137_v18 = vld [vmem:[%s9719_s3 + $0x318] sm:$0xff]  ;;  %v7148_v43 = vld [vmem:[%s9719_s3 + $0x370] sm:$0xff] }
 0x43a   :  { %4098 = vmatpush.bf16.msrb.mxu0 %v7103_v15 }
 0x43b   :  { %v4041_v51 = vunpack.c.l.b16 %v3315_v33  ;;  %v3190_v13 = vmax.f32 %v8877_v45, %v3100_v60  ;;  %4185 = vmatpush.bf16.msrb.mxu1 %v7111_v8 }
 0x43c   :  { %4272 = vmatpush.bf16.msrb.mxu2 %v7119_v14  ;;  %v7136_v14 = vld [vmem:[%s9719_s3 + $0x310] sm:$0xff] }
 0x43d   :  { %v4042_v9 = vpack.c.b16 %v4041_v51, %v4040_v11  ;;  %v3252_v34 = vadd.f32 %v9121_v39, %v3190_v13  ;;  %4357 = vmatpush.bf16.msrb.mxu3 %v7129_v12 }
 0x43e   :  { %v2772_v10 = vpop.f32.mrf.mxu2  ;;  %v2117_v44 = vpop.f32.mrf.mxu0  ;;  %4099 = vmatpush.bf16.msrb.mxu0 %v7102_v40 }
 0x43f   :  { %v3101_v45 = vpop.f32.mrf.mxu3  ;;  %v2773_v41 = vadd.f32 %v2772_v10, %v2444_v55  ;;  %v2446_v25 = vpop.f32.mrf.mxu1  ;;  %4186 = vmatpush.bf16.msrb.mxu1 %v7110_v23  ;;  %v3284_v61 = vmax.f32 %v3252_v34, 0.0  ;;  %v7135_v55 = vld [vmem:[%s9719_s3 + $0x308] sm:$0xff] }
 0x440   :  { %4273 = vmatpush.bf16.msrb.mxu2 %v7118_v48  ;;  %v2447_v5 = vadd.f32 %v2446_v25, %v2117_v44  ;;  %v7147_v48 = vld [vmem:[%s9719_s3 + $0x368] sm:$0xff]  ;;  %v7134_v44 = vld [vmem:[%s9719_s3 + $0x300] sm:$0xff] }
 0x441   :  { %v3102_v0 = vadd.f32 %v3101_v45, %v2773_v41  ;;  %4100 = vmatmul.bf16.vlgmr.msrb.gmra.mxu0 %v4042_v9  ;;  %4358 = vmatpush.bf16.msrb.mxu3 %v7128_v36  ;;  %v3316_v28 = vpack.c.bf16 %v3284_v61, %v3284_v61  ;;  %v7146_v25 = vld [vmem:[%s9719_s3 + $0x360] sm:$0xff] }
 0x442   :  { %4440 = vmatpush.bf16.msra.mxu0 %v7141_v62 }
 0x443   :  { %v3193_v19 = vmax.f32 %v8900_v22, %v3102_v0  ;;  %v4127_v58 = vunpack.c.l.b16 %v3316_v28  ;;  %4527 = vmatpush.bf16.msra.mxu1 %v7149_v54 }
 0x445   :  { %v3253_v17 = vadd.f32 %v9121_v39, %v3193_v19  ;;  %4359 = vmatpush.bf16.msrb.mxu3 %v7127_v38  ;;  %v7126_v39 = vld [vmem:[%s9719_s3 + $0x2c0] sm:$0xff] }
 0x446   :  { %v2775_v4 = vpop.f32.mrf.mxu2  ;;  %4441 = vmatpush.bf16.msra.mxu0 %v7140_v3  ;;  %v2119_v22 = vpop.f32.mrf.mxu0 }
 0x447   :  { %v3104_v20 = vpop.f32.mrf.mxu3  ;;  %v3285_v32 = vmax.f32 %v3253_v17, 0.0  ;;  %v2776_v2 = vadd.f32 %v2775_v4, %v2447_v5  ;;  %v2448_v42 = vpop.f32.mrf.mxu1  ;;  %4528 = vmatpush.bf16.msra.mxu1 %v7148_v43  ;;  %v7145_v4 = vld [vmem:[%s9719_s3 + $0x358] sm:$0xff] }
 0x448   :  { %v2449_v47 = vadd.f32 %v2448_v42, %v2119_v22  ;;  %v7156_v22 = vld [vmem:[%s9719_s3 + $0x3b0] sm:$0xff] }
 0x449   :  { %v3317_v63 = vpack.c.bf16 %v3285_v32, %v3285_v32  ;;  %v3105_v57 = vadd.f32 %v3104_v20, %v2776_v2  ;;  %4360 = vmatpush.bf16.msrb.mxu3 %v7126_v39  ;;  %v7157_v20 = vld [vmem:[%s9719_s3 + $0x3b8] sm:$0xff]  ;;  %v7144_v2 = vld [vmem:[%s9719_s3 + $0x350] sm:$0xff] }
 0x44a   :  { %4442 = vmatpush.bf16.msra.mxu0 %v7139_v52  ;;  %4614 = vmatpush.bf16.msra.mxu2 %v7157_v20  ;;  %v7162_v20 = vld [vmem:[%s9719_s3 + $0x3e0] sm:$0xff] }
 0x44b   :  { %v4128_v16 = vunpack.c.l.b16 %v3317_v63  ;;  %v3196_v53 = vmax.f32 %v8911_v50, %v3105_v57  ;;  %4529 = vmatpush.bf16.msra.mxu1 %v7147_v48 }
 0x44d   :  { %v4129_v59 = vpack.c.b16 %v4128_v16, %v4127_v58  ;;  %v3254_v50 = vadd.f32 %v9578_v30, %v3196_v53  ;;  %v7143_v16 = vld [vmem:[%s9719_s3 + $0x348] sm:$0xff] }
 0x44e   :  { %v2777_v56 = vpop.f32.mrf.mxu2  ;;  %4443 = vmatpush.bf16.msra.mxu0 %v7138_v6  ;;  %v2122_v8 = vpop.f32.mrf.mxu0  ;;  %4615 = vmatpush.bf16.msra.mxu2 %v7156_v22  ;;  %v7155_v53 = vld [vmem:[%s9719_s3 + $0x3a8] sm:$0xff] }
 0x44f   :  { %v3106_v49 = vpop.f32.mrf.mxu3  ;;  %v2778_v15 = vadd.f32 %v2777_v56, %v2449_v47  ;;  %4187 = vmatmul.bf16.vlgmr.msrb.gmra.mxu1 %v4129_v59  ;;  %v2451_v33 = vpop.f32.mrf.mxu1  ;;  %v3286_v11 = vmax.f32 %v3254_v50, 0.0  ;;  %v7142_v50 = vld [vmem:[%s9719_s3 + $0x340] sm:$0xff] }
 0x450   :  { %v2452_v13 = vadd.f32 %v2451_v33, %v2122_v8  ;;  %4530 = vmatpush.bf16.msra.mxu1 %v7146_v25  ;;  %v7151_v25 = vld [vmem:[%s9719_s3 + $0x388] sm:$0xff] }
 0x451   :  { %v3107_v60 = vadd.f32 %v3106_v49, %v2778_v15  ;;  %v3318_v10 = vpack.c.bf16 %v3286_v11, %v3286_v11  ;;  %v7154_v15 = vld [vmem:[%s9719_s3 + $0x3a0] sm:$0xff] }
 0x452   :  { %4444 = vmatpush.bf16.msra.mxu0 %v7137_v18  ;;  %4616 = vmatpush.bf16.msra.mxu2 %v7155_v53 }
 0x453   :  { %v3199_v51 = vmax.f32 %v8934_v35, %v3107_v60  ;;  %v4214_v0 = vunpack.c.l.b16 %v3318_v10  ;;  %v7152_v10 = vld [vmem:[%s9719_s3 + $0x390] sm:$0xff] }
 0x454   :  { %4531 = vmatpush.bf16.msra.mxu1 %v7145_v4  ;;  %v7150_v4 = vld [vmem:[%s9719_s3 + $0x380] sm:$0xff] }
 0x455   :  { %v3255_v40 = vadd.f32 %v9578_v30, %v3199_v51 }
 0x456   :  { %v2780_v23 = vpop.f32.mrf.mxu2  ;;  %4445 = vmatpush.bf16.msra.mxu0 %v7136_v14  ;;  %v2124_v62 = vpop.f32.mrf.mxu0  ;;  %4617 = vmatpush.bf16.msra.mxu2 %v7154_v15 }
 0x457   :  { %v3109_v9 = vpop.f32.mrf.mxu3  ;;  %v3287_v45 = vmax.f32 %v3255_v40, 0.0  ;;  %v2781_v12 = vadd.f32 %v2780_v23, %v2452_v13  ;;  %v2453_v35 = vpop.f32.mrf.mxu1  ;;  %v7153_v13 = vld [vmem:[%s9719_s3 + $0x398] sm:$0xff] }
 0x458   :  { %v2454_v19 = vadd.f32 %v2453_v35, %v2124_v62  ;;  %4532 = vmatpush.bf16.msra.mxu1 %v7144_v2  ;;  %v7165_v40 = vld [vmem:[%s9719_s3 + $0x3f8] sm:$0xff] }
 0x459   :  { %v3319_v34 = vpack.c.bf16 %v3287_v45, %v3287_v45  ;;  %v3110_v41 = vadd.f32 %v3109_v9, %v2781_v12  ;;  %4701 = vmatpush.bf16.msra.mxu3 %v7165_v40  ;;  %v7164_v45 = vld [vmem:[%s9719_s3 + $0x3f0] sm:$0xff] }
 0x45a   :  { %4446 = vmatpush.bf16.msra.mxu0 %v7135_v55  ;;  %4618 = vmatpush.bf16.msra.mxu2 %v7153_v13 }
 0x45b   :  { %v4215_v36 = vunpack.c.l.b16 %v3319_v34  ;;  %v3202_v3 = vmax.f32 %v8948_v1, %v3110_v41 }
 0x45c   :  { %4533 = vmatpush.bf16.msra.mxu1 %v7143_v16 }
 0x45d   :  { %v4216_v61 = vpack.c.b16 %v4215_v36, %v4214_v0  ;;  %v3256_v38 = vadd.f32 %v9578_v30, %v3202_v3  ;;  %4702 = vmatpush.bf16.msra.mxu3 %v7164_v45  ;;  %v7163_v0 = vld [vmem:[%s9719_s3 + $0x3e8] sm:$0xff] }
 0x45e   :  { %v2782_v5 = vpop.f32.mrf.mxu2  ;;  %4447 = vmatpush.bf16.msra.mxu0 %v7134_v44  ;;  %v2127_v28 = vpop.f32.mrf.mxu0  ;;  %4619 = vmatpush.bf16.msra.mxu2 %v7152_v10 }
 0x45f   :  { %v3111_v17 = vpop.f32.mrf.mxu3  ;;  %v2783_v52 = vadd.f32 %v2782_v5, %v2454_v19  ;;  %4274 = vmatmul.bf16.vlgmr.msrb.gmra.mxu2 %v4216_v61  ;;  %v2456_v1 = vpop.f32.mrf.mxu1  ;;  %v3288_v42 = vmax.f32 %v3256_v38, 0.0 }
 0x460   :  { %v2457_v57 = vadd.f32 %v2456_v1, %v2127_v28  ;;  %4534 = vmatpush.bf16.msra.mxu1 %v7142_v50 }
 0x461   :  { %v3112_v32 = vadd.f32 %v3111_v17, %v2783_v52  ;;  %v3320_v59 = vpack.c.bf16 %v3288_v42, %v3288_v42  ;;  %4703 = vmatpush.bf16.msra.mxu3 %v7163_v0  ;;  %v7161_v42 = vld [vmem:[%s9719_s3 + $0x3d8] sm:$0xff] }
 0x462   :  { %4620 = vmatpush.bf16.msra.mxu2 %v7151_v25 }
 0x463   :  { %v3205_v63 = vmax.f32 %v8971_v26, %v3112_v32  ;;  %v4301_v8 = vunpack.c.l.b16 %v3320_v59 }
 0x465   :  { %v3257_v39 = vadd.f32 %v9578_v30, %v3205_v63  ;;  %4704 = vmatpush.bf16.msra.mxu3 %v7162_v20 }
 0x466   :  { %v2785_v6 = vpop.f32.mrf.mxu2  ;;  %v2129_v49 = vpop.f32.mrf.mxu0  ;;  %4621 = vmatpush.bf16.msra.mxu2 %v7150_v4 }
 0x467   :  { %v3114_v58 = vpop.f32.mrf.mxu3  ;;  %v3289_v47 = vmax.f32 %v3257_v39, 0.0  ;;  %v2786_v56 = vadd.f32 %v2785_v6, %v2457_v57  ;;  %v2458_v26 = vpop.f32.mrf.mxu1 }
 0x468   :  { %v2459_v43 = vadd.f32 %v2458_v26, %v2129_v49  ;;  %v7159_v26 = vld [vmem:[%s9719_s3 + $0x3c8] sm:$0xff] }
 0x469   :  { %v3321_v18 = vpack.c.bf16 %v3289_v47, %v3289_v47  ;;  %v3115_v54 = vadd.f32 %v3114_v58, %v2786_v56  ;;  %4705 = vmatpush.bf16.msra.mxu3 %v7161_v42 }
 0x46b   :  { %v4302_v33 = vunpack.c.l.b16 %v3321_v18  ;;  %v3208_v60 = vmax.f32 %v8991_v27, %v3115_v54 }
 0x46d   :  { %v4303_v14 = vpack.c.b16 %v4302_v33, %v4301_v8  ;;  %v3258_v23 = vadd.f32 %v9578_v30, %v3208_v60 }
 0x46e   :  { %v2787_v11 = vpop.f32.mrf.mxu2  ;;  %v2132_v55 = vpop.f32.mrf.mxu0 }
 0x46f   :  { %v3116_v51 = vpop.f32.mrf.mxu3  ;;  %v2788_v9 = vadd.f32 %v2787_v11, %v2459_v43  ;;  %4361 = vmatmul.bf16.vlgmr.msrb.gmra.mxu3 %v4303_v14  ;;  %v2461_v27 = vpop.f32.mrf.mxu1  ;;  %v3290_v12 = vmax.f32 %v3258_v23, 0.0 }
 0x470   :  { %v2462_v35 = vadd.f32 %v2461_v27, %v2132_v55 }
 0x471   :  { %v3117_v48 = vadd.f32 %v3116_v51, %v2788_v9  ;;  %v3322_v36 = vpack.c.bf16 %v3290_v12, %v3290_v12 }
 0x473   :  { %v3211_v62 = vmax.f32 %v9014_v46, %v3117_v48  ;;  %v4388_v38 = vunpack.c.l.b16 %v3322_v36 }
 0x475   :  { %v3259_v34 = vadd.f32 %v9578_v30, %v3211_v62 }
 0x476   :  { %v2790_v41 = vpop.f32.mrf.mxu2  ;;  %v2134_v19 = vpop.f32.mrf.mxu0 }
 0x477   :  { %v3119_v44 = vpop.f32.mrf.mxu3  ;;  %v3291_v3 = vmax.f32 %v3259_v34, 0.0  ;;  %v2791_v61 = vadd.f32 %v2790_v41, %v2462_v35  ;;  %v2463_v46 = vpop.f32.mrf.mxu1 }
 0x478   :  { %v2464_v32 = vadd.f32 %v2463_v46, %v2134_v19 }
 0x479   :  { %v3323_v5 = vpack.c.bf16 %v3291_v3, %v3291_v3  ;;  %v3120_v17 = vadd.f32 %v3119_v44, %v2791_v61 }
 0x47b   :  { %v4389_v52 = vunpack.c.l.b16 %v3323_v5  ;;  %v3214_v28 = vmax.f32 %v9025_v29, %v3120_v17  ;;  %v7160_v29 = vld [vmem:[%s9719_s3 + $0x3d0] sm:$0xff] }
 0x47c   :  { %4706 = vmatpush.bf16.msra.mxu3 %v7160_v29 }
 0x47d   :  { %v4390_v1 = vpack.c.b16 %v4389_v52, %v4388_v38  ;;  %v3260_v63 = vadd.f32 %v9578_v30, %v3214_v28 }
 0x47e   :  { %v2792_v2 = vpop.f32.mrf.mxu2  ;;  %v2137_v39 = vpop.f32.mrf.mxu0 }
 0x47f   :  { %v3121_v22 = vpop.f32.mrf.mxu3  ;;  %v2793_v57 = vadd.f32 %v2792_v2, %v2464_v32  ;;  %4448 = vmatmul.bf16.vlgmr.msra.gmra.mxu0 %v4390_v1  ;;  %v2466_v6 = vpop.f32.mrf.mxu1  ;;  %v3292_v16 = vmax.f32 %v3260_v63, 0.0 }
 0x480   :  { %v2467_v59 = vadd.f32 %v2466_v6, %v2137_v39  ;;  %4707 = vmatpush.bf16.msra.mxu3 %v7159_v26 }
 0x481   :  { %v3122_v58 = vadd.f32 %v3121_v22, %v2793_v57  ;;  %v3324_v18 = vpack.c.bf16 %v3292_v16, %v3292_v16 }
 0x483   :  { %v3217_v53 = vmax.f32 %v9048_v21, %v3122_v58  ;;  %v7158_v21 = vld [vmem:[%s9719_s3 + $0x3c0] sm:$0xff]  ;;  %v4475_v14 = vunpack.c.l.b16 %v3324_v18 }
 0x484   :  { %4708 = vmatpush.bf16.msra.mxu3 %v7158_v21  ;;  %v7169_v21 = vld [vmem:[%s9723_s5 + $0x18] sm:$0xff] }
 0x485   :  { %v3261_v47 = vadd.f32 %v9578_v30, %v3217_v53 }
 0x486   :  { %v2795_v56 = vpop.f32.mrf.mxu2  ;;  %v2139_v15 = vpop.f32.mrf.mxu0 }
 0x487   :  { %v3124_v49 = vpop.f32.mrf.mxu3  ;;  %v3293_v54 = vmax.f32 %v3261_v47, 0.0  ;;  %v2796_v50 = vadd.f32 %v2795_v56, %v2467_v59  ;;  %v2468_v8 = vpop.f32.mrf.mxu1 }
 0x488   :  { %v2469_v13 = vadd.f32 %v2468_v8, %v2139_v15  ;;  %v7170_v15 = vld [vmem:[%s9723_s5 + $0x20] sm:$0xff] }
 0x489   :  { %v3325_v33 = vpack.c.bf16 %v3293_v54, %v3293_v54  ;;  %v3125_v60 = vadd.f32 %v3124_v49, %v2796_v50  ;;  %v7172_v49 = vld [vmem:[%s9723_s5 + $0x30] sm:$0xff]  ;;  %v7171_v54 = vld [vmem:[%s9723_s5 + $0x28] sm:$0xff] }
 0x48b   :  { %v4476_v43 = vunpack.c.l.b16 %v3325_v33  ;;  %v3220_v11 = vmax.f32 %v9059_v24, %v3125_v60 }
 0x48d   :  { %v4477_v51 = vpack.c.b16 %v4476_v43, %v4475_v14  ;;  %v3262_v9 = vadd.f32 %v9578_v30, %v3220_v11  ;;  %v7168_v11 = vld [vmem:[%s9723_s5 + $0x10] sm:$0xff] }
 0x48e   :  { %v2797_v40 = vpop.f32.mrf.mxu2  ;;  %v2142_v27 = vpop.f32.mrf.mxu0 }
 0x48f   :  { %v3126_v23 = vpop.f32.mrf.mxu3  ;;  %v2798_v55 = vadd.f32 %v2797_v40, %v2469_v13  ;;  %4535 = vmatmul.bf16.vlgmr.msra.gmra.mxu1 %v4477_v51  ;;  %v2471_v48 = vpop.f32.mrf.mxu1  ;;  %v3294_v45 = vmax.f32 %v3262_v9, 0.0 }
 0x490   :  { %v2472_v62 = vadd.f32 %v2471_v48, %v2142_v27 }
 0x491   :  { %v3127_v10 = vadd.f32 %v3126_v23, %v2798_v55  ;;  %v3326_v41 = vpack.c.bf16 %v3294_v45, %v3294_v45  ;;  %v7167_v55 = vld [vmem:[%s9723_s5 + $0x8] sm:$0xff]  ;;  %v7166_v45 = vld [vmem:[%s9723_s5] sm:$0xff] }
 0x493   :  { %v3223_v12 = vmax.f32 %v9082_v31, %v3127_v10  ;;  %v4562_v19 = vunpack.c.l.b16 %v3326_v41 }
 0x495   :  { %v3263_v35 = vadd.f32 %v9578_v30, %v3223_v12 }
 0x496   :  { %v2800_v34 = vpop.f32.mrf.mxu2  ;;  %v2144_v3 = vpop.f32.mrf.mxu0 }
 0x497   :  { %v3129_v24 = vpop.f32.mrf.mxu3  ;;  %v3295_v44 = vmax.f32 %v3263_v35, 0.0  ;;  %v2801_v25 = vadd.f32 %v2800_v34, %v2472_v62  ;;  %v2473_v61 = vpop.f32.mrf.mxu1 }
 0x498   :  { %v2474_v4 = vadd.f32 %v2473_v61, %v2144_v3 }
 0x499   :  { %v3327_v0 = vpack.c.bf16 %v3295_v44, %v3295_v44  ;;  %v3130_v36 = vadd.f32 %v3129_v24, %v2801_v25 }
 0x49b   :  { %v4563_v46 = vunpack.c.l.b16 %v3327_v0  ;;  %v3226_v5 = vmax.f32 %v9093_v37, %v3130_v36 }
 0x49d   :  { %v4564_v17 = vpack.c.b16 %v4563_v46, %v4562_v19  ;;  %v3264_v31 = vadd.f32 %v9578_v30, %v3226_v5 }
 0x49e   :  { %v2802_v20 = vpop.f32.mrf.mxu2  ;;  %v3426_v6 = vpop.f32.mrf.mxu0 }
 0x49f   :  { %v2803_v38 = vadd.f32 %v2802_v20, %v2474_v4  ;;  %4622 = vmatmul.bf16.vlgmr.msra.gmra.mxu2 %v4564_v17  ;;  %v3131_v52 = vpop.f32.mrf.mxu3  ;;  %v3296_v1 = vmax.f32 %v3264_v31, 0.0  ;;  %v3494_v58 = vpop.f32.mrf.mxu1 }
 0x4a0   :  { %v3495_v14 = vadd.f32 %v3494_v58, %v3426_v6 }
 0x4a1   :  { %v3132_v28 = vadd.f32 %v3131_v52, %v2803_v38  ;;  %v3328_v22 = vpack.c.bf16 %v3296_v1, %v3296_v1 }
 0x4a3   :  { %v3229_v32 = vmax.f32 %v9116_v7, %v3132_v28  ;;  %v4649_v57 = vunpack.c.l.b16 %v3328_v22  ;;  %v7173_v7 = vld [vmem:[%s9723_s5 + $0x38] sm:$0xff] }
 0x4a4   :  { %4794 = vmatpush.bf16.msrb.mxu0 %v7173_v7 }
 0x4a5   :  { %v3265_v2 = vadd.f32 %v9578_v30, %v3229_v32 }
 0x4a6   :  { %v3579_v29 = vpop.f32.mrf.mxu2  ;;  %v3428_v16 = vpop.f32.mrf.mxu0 }
 0x4a7   :  { %v3297_v42 = vmax.f32 %v3265_v2, 0.0  ;;  %v3666_v53 = vpop.f32.mrf.mxu3  ;;  %v3496_v59 = vpop.f32.mrf.mxu1  ;;  %v3584_v51 = vadd.f32 %v3579_v29, %v3495_v14 }
 0x4a8   :  { %4795 = vmatpush.bf16.msrb.mxu0 %v7172_v49  ;;  %v3497_v23 = vadd.f32 %v3496_v59, %v3428_v16  ;;  %v7175_v16 = vld [vmem:[%s9721_s4] ss:$0 sm:$0xff] }
 0x4a9   :  { %v3329_v63 = vpack.c.bf16 %v3297_v42, %v3297_v42  ;;  %v3671_v27 = vadd.f32 %v3666_v53, %v3584_v51 }
 0x4ab   :  { %v4650_v39 = vunpack.c.l.b16 %v3329_v63 }
 0x4ac   :  { %4796 = vmatpush.bf16.msrb.mxu0 %v7171_v54 }
 0x4ad   :  { %v4651_v37 = vpack.c.b16 %v4650_v39, %v4649_v57 }
 0x4ae   :  { %v3581_v47 = vpop.f32.mrf.mxu2  ;;  %v3753_v56 = vpop.f32.mrf.mxu0 }
 0x4af   :  { %4709 = vmatmul.bf16.vlgmr.msra.gmra.mxu3 %v4651_v37  ;;  %v3668_v30 = vpop.f32.mrf.mxu3  ;;  %v3840_v26 = vpop.f32.mrf.mxu1  ;;  %v3585_v48 = vadd.f32 %v3581_v47, %v3497_v23  ;;  %v3758_v10 = vadd.f32 %v3753_v56, %v3671_v27 }
 0x4b0   :  { %4797 = vmatpush.bf16.msrb.mxu0 %v7170_v15 }
 0x4b1   :  { %v3672_v12 = vadd.f32 %v3668_v30, %v3585_v48  ;;  %v3845_v34 = vadd.f32 %v3840_v26, %v3758_v10 }
 0x4b4   :  { %4798 = vmatpush.bf16.msrb.mxu0 %v7169_v21 }
 0x4b6   :  { %v3927_v18 = vpop.f32.mrf.mxu2  ;;  %v3755_v50 = vpop.f32.mrf.mxu0 }
 0x4b7   :  { %v4014_v8 = vpop.f32.mrf.mxu3  ;;  %v3842_v33 = vpop.f32.mrf.mxu1  ;;  %v3759_v24 = vadd.f32 %v3755_v50, %v3672_v12  ;;  %v3932_v44 = vadd.f32 %v3927_v18, %v3845_v34  ;;  %v7176_v18 = vld [vmem:[%s9722_s6] ss:$0 sm:$0xff] }
 0x4b8   :  { %4799 = vmatpush.bf16.msrb.mxu0 %v7168_v11 }
 0x4b9   :  { %v3846_v0 = vadd.f32 %v3842_v33, %v3759_v24  ;;  %v4019_v36 = vadd.f32 %v4014_v8, %v3932_v44 }
 0x4bc   :  { %4800 = vmatpush.bf16.msrb.mxu0 %v7167_v55 }
 0x4be   :  { %v3929_v60 = vpop.f32.mrf.mxu2  ;;  %v4101_v43 = vpop.f32.mrf.mxu0 }
 0x4bf   :  { %v4016_v13 = vpop.f32.mrf.mxu3  ;;  %v3933_v3 = vadd.f32 %v3929_v60, %v3846_v0  ;;  %v4106_v19 = vadd.f32 %v4101_v43, %v4019_v36 }
 0x4c0   :  { %4801 = vmatpush.bf16.msrb.mxu0 %v7166_v45 }
 0x4c1   :  { %v4020_v17 = vadd.f32 %v4016_v13, %v3933_v3 }
 0x4c6   :  { %v4103_v62 = vpop.f32.mrf.mxu0 }
 0x4c7   :  { %v4107_v31 = vadd.f32 %v4103_v62, %v4020_v17 }
 0x4cc   :  { %v4188_v40 = vpop.f32.mrf.mxu1 }
 0x4cd   :  { %v4193_v4 = vadd.f32 %v4188_v40, %v4106_v19 }
 0x4d4   :  { %v4190_v41 = vpop.f32.mrf.mxu1 }
 0x4d5   :  { %v4194_v52 = vadd.f32 %v4190_v41, %v4107_v31 }
 0x4e2   :  { %v4275_v9 = vpop.f32.mrf.mxu2 }
 0x4e3   :  { %v4280_v38 = vadd.f32 %v4275_v9, %v4193_v4 }
 0x4ea   :  { %v4277_v25 = vpop.f32.mrf.mxu2 }
 0x4eb   :  { %v4281_v1 = vadd.f32 %v4277_v25, %v4194_v52 }
 0x4f2   :  { %v4362_v35 = vpop.f32.mrf.mxu3 }
 0x4f3   :  { %v4367_v28 = vadd.f32 %v4362_v35, %v4280_v38 }
 0x4fa   :  { %v4364_v46 = vpop.f32.mrf.mxu3 }
 0x4fb   :  { %v4368_v42 = vadd.f32 %v4364_v46, %v4281_v1 }
 0x4fc   :  { %v4449_v61 = vpop.f32.mrf.mxu0 }
 0x4fd   :  { %v4454_v32 = vadd.f32 %v4449_v61, %v4367_v28 }
 0x504   :  { %v4451_v2 = vpop.f32.mrf.mxu0 }
 0x505   :  { %v4455_v39 = vadd.f32 %v4451_v2, %v4368_v42 }
 0x50c   :  { %v4536_v5 = vpop.f32.mrf.mxu1 }
 0x50d   :  { %v4541_v63 = vadd.f32 %v4536_v5, %v4454_v32 }
 0x514   :  { %v4538_v57 = vpop.f32.mrf.mxu1 }
 0x515   :  { %v4542_v58 = vadd.f32 %v4538_v57, %v4455_v39 }
 0x522   :  { %v4623_v20 = vpop.f32.mrf.mxu2 }
 0x523   :  { %v4628_v37 = vadd.f32 %v4623_v20, %v4541_v63 }
 0x52a   :  { %v4625_v6 = vpop.f32.mrf.mxu2 }
 0x52b   :  { %v4629_v53 = vadd.f32 %v4625_v6, %v4542_v58 }
 0x532   :  { %v4710_v22 = vpop.f32.mrf.mxu3 }
 0x533   :  { %v4715_v29 = vadd.f32 %v4710_v22, %v4628_v37 }
 0x535   :  { %v4721_v47 = vadd.f32 %v7175_v16, %v4715_v29 }
 0x537   :  { %v4723_v30 = vmax.f32 %v4721_v47, 0.0 }
 0x53a   :  { %v4712_v59 = vpop.f32.mrf.mxu3 }
 0x53b   :  { %v4716_v56 = vadd.f32 %v4712_v59, %v4629_v53 }
 0x53d   :  { %v4722_v7 = vadd.f32 %v7175_v16, %v4716_v56 }
 0x53f   :  { %v4724_v49 = vmax.f32 %v4722_v7, 0.0 }
 0x541   :  { %v4725_v26 = vpack.c.bf16 %v4724_v49, %v4723_v30 }
 0x543   :  { %4802 = vmatmul.bf16.vlgmr.msrb.gmra.mxu0 %v4725_v26 }
 0x5c0   :  { %v4803_v54 = vpop.f32.mrf.mxu0 }
 0x5c1   :  { %v4804_v50 = vadd.f32 %v7176_v18, %v4803_v54 }
 0x5c3   :  { %4808 = vst [vmem:[%s9724_s7] sm:$0xff] %v4804_v50 }
 0x5c8   :  { %v4805_v15 = vpop.f32.mrf.mxu0 }
 0x5c9   :  { %v4806_v8 = vadd.f32 %v7176_v18, %v4805_v15 }
 0x5cb   :  { %4809 = vst [vmem:[%s9724_s7 + $0x8] sm:$0xff] %v4806_v8 }

</bundles_post_ra>
